<compile_context>
chip_gen: v5e
topology: v5e:2x2
jax: 0.10.0
libtpu: 0.0.40
codegen_flags: <defaults>
</compile_context>

<pallas_src>
import jax
import jax.numpy as jnp
from jax.experimental import pallas as pl
from jax.experimental.pallas import tpu as pltpu

_LANE = 128
_VMEM_LIMIT = 32 * 1024 * 1024  # safe on v5e/v6e/v7x; tiled design needs only a few MB


def _round_up(x, m):
    return ((x + m - 1) // m) * m


def _tile(dim, candidates=(512, 256, 128)):
    """Largest 128-multiple tile that divides a (already 128-padded) dim."""
    for c in candidates:
        if dim % c == 0:
            return c
    return dim


def _pad2(x, rows, cols):
    r, c = x.shape
    return jnp.pad(x, ((0, rows - r), (0, cols - c)))


# --------------------------------------------------------------------------- #
# Kernels
# --------------------------------------------------------------------------- #
def _proj_kernel(x_ref, w_ref, o_ref, acc_ref):
    """P[i] = X[i, :] @ W   (tiled over the feature/reduction axis)."""
    k = pl.program_id(1)

    @pl.when(k == 0)
    def _():
        acc_ref[...] = jnp.zeros_like(acc_ref)

    acc_ref[...] += jnp.dot(x_ref[...], w_ref[...],
                            preferred_element_type=jnp.float32)

    @pl.when(k == pl.num_programs(1) - 1)
    def _():
        o_ref[...] = acc_ref[...].astype(o_ref.dtype)


def _prop_kernel(a_ref, p_ref, b_ref, o_ref, acc_ref):
    """H'[i] = relu(A_hat[i, :] @ P + b)  with fused bias+relu epilogue."""
    k = pl.program_id(1)

    @pl.when(k == 0)
    def _():
        acc_ref[...] = jnp.zeros_like(acc_ref)

    acc_ref[...] += jnp.dot(a_ref[...], p_ref[...],
                            preferred_element_type=jnp.float32)

    @pl.when(k == pl.num_programs(1) - 1)
    def _():
        # dropout(p=0.5) is identity in eval mode
        o_ref[...] = jnp.maximum(acc_ref[...] + b_ref[...], 0.0).astype(o_ref.dtype)


def _prop_head_kernel(a_ref, p_ref, b_ref, wl_ref, bl_ref, o_ref, acc_ref):
    """out[i] = relu(A_hat[i,:] @ P + b) @ Wl + bl  (Linear head fused, lane-dense)."""
    k = pl.program_id(1)

    @pl.when(k == 0)
    def _():
        acc_ref[...] = jnp.zeros_like(acc_ref)

    acc_ref[...] += jnp.dot(a_ref[...], p_ref[...],
                            preferred_element_type=jnp.float32)

    @pl.when(k == pl.num_programs(1) - 1)
    def _():
        h = jnp.maximum(acc_ref[...] + b_ref[...], 0.0)              # f32
        o_ref[...] = (jnp.dot(h.astype(jnp.bfloat16), wl_ref[...],
                              preferred_element_type=jnp.float32)
                      + bl_ref[...])


# --------------------------------------------------------------------------- #
# pallas_call wrappers
# --------------------------------------------------------------------------- #
def _compiler_params():
    return pltpu.CompilerParams(
        dimension_semantics=("parallel", "arbitrary"),
        vmem_limit_bytes=_VMEM_LIMIT)


def _projection(x, w, *, tm):
    n, kdim = x.shape
    fout = w.shape[1]
    tk = _tile(kdim)
    cost = pl.CostEstimate(flops=2 * n * kdim * fout, transcendentals=0,
                           bytes_accessed=(x.size + w.size + n * fout) * 2)
    return pl.pallas_call(
        _proj_kernel,
        out_shape=jax.ShapeDtypeStruct((n, fout), jnp.bfloat16),
        grid_spec=pltpu.PrefetchScalarGridSpec(
            num_scalar_prefetch=0,
            grid=(n // tm, kdim // tk),
            in_specs=[pl.BlockSpec((tm, tk), lambda i, k: (i, k)),
                      pl.BlockSpec((tk, fout), lambda i, k: (k, 0))],
            out_specs=pl.BlockSpec((tm, fout), lambda i, k: (i, 0)),
            scratch_shapes=[pltpu.VMEM((tm, fout), jnp.float32)]),
        compiler_params=_compiler_params(),
        cost_estimate=cost,
    )(x, w)


def _propagation(a, p, b, *, tm):
    n = a.shape[0]
    fout = p.shape[1]
    tk = _tile(n)
    cost = pl.CostEstimate(flops=2 * n * n * fout, transcendentals=0,
                           bytes_accessed=(a.size + p.size + n * fout) * 2)
    return pl.pallas_call(
        _prop_kernel,
        out_shape=jax.ShapeDtypeStruct((n, fout), jnp.bfloat16),
        grid_spec=pltpu.PrefetchScalarGridSpec(
            num_scalar_prefetch=0,
            grid=(n // tm, n // tk),
            in_specs=[pl.BlockSpec((tm, tk), lambda i, k: (i, k)),
                      pl.BlockSpec((tk, fout), lambda i, k: (k, 0)),
                      pl.BlockSpec((1, fout), lambda i, k: (0, 0))],
            out_specs=pl.BlockSpec((tm, fout), lambda i, k: (i, 0)),
            scratch_shapes=[pltpu.VMEM((tm, fout), jnp.float32)]),
        compiler_params=_compiler_params(),
        cost_estimate=cost,
    )(a, p, b)


def _propagation_with_head(a, p, b, wl, bl, *, tm):
    n = a.shape[0]
    fmid = p.shape[1]
    fout = wl.shape[1]
    tk = _tile(n)
    cost = pl.CostEstimate(flops=2 * n * n * fmid + 2 * n * fmid * fout,
                           transcendentals=0,
                           bytes_accessed=(a.size + p.size + wl.size) * 2
                                          + n * fout * 4)
    return pl.pallas_call(
        _prop_head_kernel,
        out_shape=jax.ShapeDtypeStruct((n, fout), jnp.float32),
        grid_spec=pltpu.PrefetchScalarGridSpec(
            num_scalar_prefetch=0,
            grid=(n // tm, n // tk),
            in_specs=[pl.BlockSpec((tm, tk), lambda i, k: (i, k)),
                      pl.BlockSpec((tk, fmid), lambda i, k: (k, 0)),
                      pl.BlockSpec((1, fmid), lambda i, k: (0, 0)),
                      pl.BlockSpec((fmid, fout), lambda i, k: (0, 0)),
                      pl.BlockSpec((1, fout), lambda i, k: (0, 0))],
            out_specs=pl.BlockSpec((tm, fout), lambda i, k: (i, 0)),
            scratch_shapes=[pltpu.VMEM((tm, fmid), jnp.float32)]),
        compiler_params=_compiler_params(),
        cost_estimate=cost,
    )(a, p, b, wl, bl)


# --------------------------------------------------------------------------- #
# Model glue
# --------------------------------------------------------------------------- #
def build_normalized_adjacency(edge_index, num_nodes):
    """Dense A_hat = D^-1/2 (A + I) D^-1/2 (PyG GCNConv default normalization).

    Assumes a coalesced edge list (duplicate edges count once)."""
    src, dst = edge_index[0], edge_index[1]
    a = jnp.zeros((num_nodes, num_nodes), jnp.float32)
    a = a.at[dst, src].set(1.0)                       # message flows src -> dst
    a = a + jnp.eye(num_nodes, dtype=jnp.float32)     # self-loops
    deg = jnp.sum(a, axis=1)
    d_inv_sqrt = jnp.where(deg > 0, 1.0 / jnp.sqrt(deg), 0.0)
    return a * d_inv_sqrt[:, None] * d_inv_sqrt[None, :]


def gcn_forward(a_hat, x, params):
    """Forward pass of GCN(dim_in, dim_h, dim_out); returns [N, dim_out] f32."""
    n, f_in = x.shape
    dim_out = params["wl"].shape[1]

    n_pad = _round_up(n, _LANE)
    f_pad = _round_up(f_in, _LANE)
    tm = _tile(n_pad)

    def padw(w):   # zero-pad both dims to 128 multiples, bf16 for the MXU
        return _pad2(w, _round_up(w.shape[0], _LANE),
                     _round_up(w.shape[1], _LANE)).astype(jnp.bfloat16)

    def padb(b):   # biases stay f32 (added after f32 accumulation)
        return _pad2(b, 1, _round_up(b.shape[1], _LANE)).astype(jnp.float32)

    a = _pad2(a_hat, n_pad, n_pad).astype(jnp.bfloat16)
    h = _pad2(x, n_pad, f_pad).astype(jnp.bfloat16)

    w1, w2, w3, wl = (padw(params[k]) for k in ("w1", "w2", "w3", "wl"))
    b1, b2, b3, bl = (padb(params[k]) for k in ("b1", "b2", "b3", "bl"))

    # --- GCNConv 1: relu(A_hat @ (X @ W1) + b1) ; dropout = identity (eval) ---
    h = _propagation(a, _projection(h, w1, tm=tm), b1, tm=tm)
    # --- GCNConv 2 ---
    h = _propagation(a, _projection(h, w2, tm=tm), b2, tm=tm)
    # --- GCNConv 3 + fused Linear head (lane-dense 128-wide output) ---
    out = _propagation_with_head(a, _projection(h, w3, tm=tm), b3, wl, bl, tm=tm)

    return out[:n, :dim_out]


def gcn_reference(a_hat, x, params):
    """Pure-JAX f32 reference of the same forward pass."""
    h = jnp.maximum(a_hat @ (x @ params["w1"]) + params["b1"], 0.0)
    h = jnp.maximum(a_hat @ (h @ params["w2"]) + params["b2"], 0.0)
    h = jnp.maximum(a_hat @ (h @ params["w3"]) + params["b3"], 0.0)
    return h @ params["wl"] + params["bl"]


def init_params(key, dim_in, dim_h, dim_out):
    """Glorot-ish init matching GCN(dim_in, dim_h, dim_out) shapes."""
    ks = jax.random.split(key, 8)

    def glorot(k, fan_in, fan_out):
        s = jnp.sqrt(6.0 / (fan_in + fan_out))
        return jax.random.uniform(k, (fan_in, fan_out), jnp.float32, -s, s)

    def bias(k, fan_out):
        return 0.01 * jax.random.normal(k, (1, fan_out), jnp.float32)

    return {
        "w1": glorot(ks[0], dim_in, dim_h * 4), "b1": bias(ks[1], dim_h * 4),
        "w2": glorot(ks[2], dim_h * 4, dim_h * 2), "b2": bias(ks[3], dim_h * 2),
        "w3": glorot(ks[4], dim_h * 2, dim_h), "b3": bias(ks[5], dim_h),
        "wl": glorot(ks[6], dim_h, dim_out), "bl": bias(ks[7], dim_out),
    }


if __name__ == "__main__":
    key = jax.random.PRNGKey(0)
    k_feat, k_edge, k_param = jax.random.split(key, 3)

    # Small synthetic graph standing in for the chameleon dataset.
    num_nodes = 16
    num_edges = 48
    num_features = 32      # dataset.num_features stand-in (real chameleon: 2325)
    dim_h = 128            # matches GCN(dataset.num_features, 128, 1)
    dim_out = 1

    x = jax.random.normal(k_feat, (num_nodes, num_features), jnp.float32)
    edge_index = jax.random.randint(k_edge, (2, num_edges), 0, num_nodes, jnp.int32)

    # TODO(synk): block-sparse A_hat tiles via scalar prefetch for large graphs;
    # dense normalized adjacency is built host-side (scatter) for this demo.
    a_hat = build_normalized_adjacency(edge_index, num_nodes)
    params = init_params(k_param, num_features, dim_h, dim_out)

    gcn = jax.jit(gcn_forward)
    out = jax.block_until_ready(gcn(a_hat, x, params))
    ref = gcn_reference(a_hat, x, params)

    assert out.shape == (num_nodes, dim_out)
    assert bool(jnp.all(jnp.isfinite(out)))
    # bf16 MXU inputs with f32 accumulation -> loose tolerance vs f32 reference
    assert bool(jnp.allclose(out, ref, atol=5e-2, rtol=5e-2)), float(
        jnp.max(jnp.abs(out - ref)))
    print("KERNEL_OK")
</pallas_src>

<mosaic_0001>
module attributes {stable_mosaic.version = 11 : i64} {
  func.func @_prop_kernel(%arg0: i32, %arg1: i32, %arg2: memref<128x128xbf16, #tpu.memory_space<vmem>>, %arg3: memref<128x512xbf16, #tpu.memory_space<vmem>>, %arg4: memref<1x512xf32, #tpu.memory_space<vmem>>, %arg5: memref<128x512xbf16, #tpu.memory_space<vmem>>, %arg6: memref<128x512xf32, #tpu.memory_space<vmem>>) attributes {dimension_semantics = [#tpu.dimension_semantics<parallel>, #tpu.dimension_semantics<arbitrary>], iteration_bounds = array<i64: 1, 1>, scalar_prefetch = 0 : i64, scratch_operands = 1 : i64, tpu.core_type = #tpu.core_type<tc>, window_params = [{transform_indices = @transform_0, window_bounds = array<i64: 128, 128>}, {transform_indices = @transform_1, window_bounds = array<i64: 128, 512>}, {pipeline_mode = #tpu.pipeline_mode<synchronous>, transform_indices = @transform_2, window_bounds = array<i64: 1, 512>}, {transform_indices = @transform_3, window_bounds = array<i64: 128, 512>}]} {
    %c0_i32 = arith.constant 0 : i32
    %0 = arith.cmpi eq, %arg1, %c0_i32 : i32
    %1 = arith.extui %0 : i1 to i32
    %c0_i32_0 = arith.constant 0 : i32
    %2 = arith.cmpi ne, %1, %c0_i32_0 : i32
    scf.if %2 {
      %cst_10 = arith.constant 0.000000e+00 : f32
      %12 = vector.broadcast %cst_10 : f32 to vector<128x512xf32>
      %c0_11 = arith.constant 0 : index
      %c0_12 = arith.constant 0 : index
      %13 = vector.load %arg6[%c0_11, %c0_12] : memref<128x512xf32, #tpu.memory_space<vmem>>, vector<128x512xf32>
      tpu.vector_store %arg6[%c0_11, %c0_12], %12 {strides = array<i32>} : memref<128x512xf32, #tpu.memory_space<vmem>>, vector<128x512xf32>,
    } else {
    }
    %c0 = arith.constant 0 : index
    %c0_1 = arith.constant 0 : index
    %3 = vector.load %arg6[%c0, %c0_1] : memref<128x512xf32, #tpu.memory_space<vmem>>, vector<128x512xf32>
    %c0_2 = arith.constant 0 : index
    %c0_3 = arith.constant 0 : index
    %4 = vector.load %arg2[%c0_2, %c0_3] : memref<128x128xbf16, #tpu.memory_space<vmem>>, vector<128x128xbf16>
    %c0_4 = arith.constant 0 : index
    %c0_5 = arith.constant 0 : index
    %5 = vector.load %arg3[%c0_4, %c0_5] : memref<128x512xbf16, #tpu.memory_space<vmem>>, vector<128x512xbf16>
    %cst = arith.constant dense<0.000000e+00> : vector<128x512xf32>
    %6 = tpu.matmul %4, %5, %cst {dimension_numbers = #tpu.dot_dimension_numbers<[1], [0], [0], [1], [0, 0, 1, 1], [], []>} : vector<128x128xbf16>, vector<128x512xbf16>, vector<128x512xf32> -> vector<128x512xf32>
    %7 = arith.addf %3, %6 : vector<128x512xf32>
    %c0_6 = arith.constant 0 : index
    %c0_7 = arith.constant 0 : index
    %8 = vector.load %arg6[%c0_6, %c0_7] : memref<128x512xf32, #tpu.memory_space<vmem>>, vector<128x512xf32>
    tpu.vector_store %arg6[%c0_6, %c0_7], %7 {strides = array<i32>} : memref<128x512xf32, #tpu.memory_space<vmem>>, vector<128x512xf32>,
    %c0_i32_8 = arith.constant 0 : i32
    %9 = arith.cmpi eq, %arg1, %c0_i32_8 : i32
    %10 = arith.extui %9 : i1 to i32
    %c0_i32_9 = arith.constant 0 : i32
    %11 = arith.cmpi ne, %10, %c0_i32_9 : i32
    scf.if %11 {
      %c0_10 = arith.constant 0 : index
      %c0_11 = arith.constant 0 : index
      %12 = vector.load %arg6[%c0_10, %c0_11] : memref<128x512xf32, #tpu.memory_space<vmem>>, vector<128x512xf32>
      %c0_12 = arith.constant 0 : index
      %c0_13 = arith.constant 0 : index
      %13 = vector.load %arg4[%c0_12, %c0_13] : memref<1x512xf32, #tpu.memory_space<vmem>>, vector<1x512xf32>
      %14 = vector.broadcast %13 : vector<1x512xf32> to vector<128x512xf32>
      %15 = arith.addf %12, %14 : vector<128x512xf32>
      %cst_14 = arith.constant 0.000000e+00 : f32
      %16 = vector.broadcast %cst_14 : f32 to vector<128x512xf32>
      %17 = arith.maximumf %15, %16 : vector<128x512xf32>
      %18 = arith.truncf %17 : vector<128x512xf32> to vector<128x512xbf16>
      %c0_15 = arith.constant 0 : index
      %c0_16 = arith.constant 0 : index
      %19 = vector.load %arg5[%c0_15, %c0_16] : memref<128x512xbf16, #tpu.memory_space<vmem>>, vector<128x512xbf16>
      tpu.vector_store %arg5[%c0_15, %c0_16], %18 {strides = array<i32>} : memref<128x512xbf16, #tpu.memory_space<vmem>>, vector<128x512xbf16>,
    } else {
    }
    return
  }
  func.func @transform_0(%arg0: i32, %arg1: i32) -> (i32, i32) {
    %c0_i32 = arith.constant 0 : i32
    return %arg0, %arg1 : i32, i32
  }
  func.func @transform_1(%arg0: i32, %arg1: i32) -> (i32, i32) {
    %c0_i32 = arith.constant 0 : i32
    %c0_i32_0 = arith.constant 0 : i32
    return %arg1, %c0_i32 : i32, i32
  }
  func.func @transform_2(%arg0: i32, %arg1: i32) -> (i32, i32) {
    %c0_i32 = arith.constant 0 : i32
    %c0_i32_0 = arith.constant 0 : i32
    %c0_i32_1 = arith.constant 0 : i32
    return %c0_i32, %c0_i32_0 : i32, i32
  }
  func.func @transform_3(%arg0: i32, %arg1: i32) -> (i32, i32) {
    %c0_i32 = arith.constant 0 : i32
    %c0_i32_0 = arith.constant 0 : i32
    return %arg0, %c0_i32 : i32, i32
  }
}

module attributes {stable_mosaic.version = 11 : i64} {
  func.func @_proj_kernel(%arg0: i32, %arg1: i32, %arg2: memref<128x128xbf16, #tpu.memory_space<vmem>>, %arg3: memref<128x512xbf16, #tpu.memory_space<vmem>>, %arg4: memref<128x512xbf16, #tpu.memory_space<vmem>>, %arg5: memref<128x512xf32, #tpu.memory_space<vmem>>) attributes {dimension_semantics = [#tpu.dimension_semantics<parallel>, #tpu.dimension_semantics<arbitrary>], iteration_bounds = array<i64: 1, 1>, scalar_prefetch = 0 : i64, scratch_operands = 1 : i64, tpu.core_type = #tpu.core_type<tc>, window_params = [{transform_indices = @transform_0, window_bounds = array<i64: 128, 128>}, {transform_indices = @transform_1, window_bounds = array<i64: 128, 512>}, {transform_indices = @transform_2, window_bounds = array<i64: 128, 512>}]} {
    %c0_i32 = arith.constant 0 : i32
    %0 = arith.cmpi eq, %arg1, %c0_i32 : i32
    %1 = arith.extui %0 : i1 to i32
    %c0_i32_0 = arith.constant 0 : i32
    %2 = arith.cmpi ne, %1, %c0_i32_0 : i32
    scf.if %2 {
      %cst_10 = arith.constant 0.000000e+00 : f32
      %12 = vector.broadcast %cst_10 : f32 to vector<128x512xf32>
      %c0_11 = arith.constant 0 : index
      %c0_12 = arith.constant 0 : index
      %13 = vector.load %arg5[%c0_11, %c0_12] : memref<128x512xf32, #tpu.memory_space<vmem>>, vector<128x512xf32>
      tpu.vector_store %arg5[%c0_11, %c0_12], %12 {strides = array<i32>} : memref<128x512xf32, #tpu.memory_space<vmem>>, vector<128x512xf32>,
    } else {
    }
    %c0 = arith.constant 0 : index
    %c0_1 = arith.constant 0 : index
    %3 = vector.load %arg5[%c0, %c0_1] : memref<128x512xf32, #tpu.memory_space<vmem>>, vector<128x512xf32>
    %c0_2 = arith.constant 0 : index
    %c0_3 = arith.constant 0 : index
    %4 = vector.load %arg2[%c0_2, %c0_3] : memref<128x128xbf16, #tpu.memory_space<vmem>>, vector<128x128xbf16>
    %c0_4 = arith.constant 0 : index
    %c0_5 = arith.constant 0 : index
    %5 = vector.load %arg3[%c0_4, %c0_5] : memref<128x512xbf16, #tpu.memory_space<vmem>>, vector<128x512xbf16>
    %cst = arith.constant dense<0.000000e+00> : vector<128x512xf32>
    %6 = tpu.matmul %4, %5, %cst {dimension_numbers = #tpu.dot_dimension_numbers<[1], [0], [0], [1], [0, 0, 1, 1], [], []>} : vector<128x128xbf16>, vector<128x512xbf16>, vector<128x512xf32> -> vector<128x512xf32>
    %7 = arith.addf %3, %6 : vector<128x512xf32>
    %c0_6 = arith.constant 0 : index
    %c0_7 = arith.constant 0 : index
    %8 = vector.load %arg5[%c0_6, %c0_7] : memref<128x512xf32, #tpu.memory_space<vmem>>, vector<128x512xf32>
    tpu.vector_store %arg5[%c0_6, %c0_7], %7 {strides = array<i32>} : memref<128x512xf32, #tpu.memory_space<vmem>>, vector<128x512xf32>,
    %c0_i32_8 = arith.constant 0 : i32
    %9 = arith.cmpi eq, %arg1, %c0_i32_8 : i32
    %10 = arith.extui %9 : i1 to i32
    %c0_i32_9 = arith.constant 0 : i32
    %11 = arith.cmpi ne, %10, %c0_i32_9 : i32
    scf.if %11 {
      %c0_10 = arith.constant 0 : index
      %c0_11 = arith.constant 0 : index
      %12 = vector.load %arg5[%c0_10, %c0_11] : memref<128x512xf32, #tpu.memory_space<vmem>>, vector<128x512xf32>
      %13 = arith.truncf %12 : vector<128x512xf32> to vector<128x512xbf16>
      %c0_12 = arith.constant 0 : index
      %c0_13 = arith.constant 0 : index
      %14 = vector.load %arg4[%c0_12, %c0_13] : memref<128x512xbf16, #tpu.memory_space<vmem>>, vector<128x512xbf16>
      tpu.vector_store %arg4[%c0_12, %c0_13], %13 {strides = array<i32>} : memref<128x512xbf16, #tpu.memory_space<vmem>>, vector<128x512xbf16>,
    } else {
    }
    return
  }
  func.func @transform_0(%arg0: i32, %arg1: i32) -> (i32, i32) {
    %c0_i32 = arith.constant 0 : i32
    return %arg0, %arg1 : i32, i32
  }
  func.func @transform_1(%arg0: i32, %arg1: i32) -> (i32, i32) {
    %c0_i32 = arith.constant 0 : i32
    %c0_i32_0 = arith.constant 0 : i32
    return %arg1, %c0_i32 : i32, i32
  }
  func.func @transform_2(%arg0: i32, %arg1: i32) -> (i32, i32) {
    %c0_i32 = arith.constant 0 : i32
    %c0_i32_0 = arith.constant 0 : i32
    return %arg0, %c0_i32 : i32, i32
  }
}

module attributes {stable_mosaic.version = 11 : i64} {
  func.func @_proj_kernel(%arg0: i32, %arg1: i32, %arg2: memref<128x512xbf16, #tpu.memory_space<vmem>>, %arg3: memref<512x256xbf16, #tpu.memory_space<vmem>>, %arg4: memref<128x256xbf16, #tpu.memory_space<vmem>>, %arg5: memref<128x256xf32, #tpu.memory_space<vmem>>) attributes {dimension_semantics = [#tpu.dimension_semantics<parallel>, #tpu.dimension_semantics<arbitrary>], iteration_bounds = array<i64: 1, 1>, scalar_prefetch = 0 : i64, scratch_operands = 1 : i64, tpu.core_type = #tpu.core_type<tc>, window_params = [{transform_indices = @transform_0, window_bounds = array<i64: 128, 512>}, {transform_indices = @transform_1, window_bounds = array<i64: 512, 256>}, {transform_indices = @transform_2, window_bounds = array<i64: 128, 256>}]} {
    %c0_i32 = arith.constant 0 : i32
    %0 = arith.cmpi eq, %arg1, %c0_i32 : i32
    %1 = arith.extui %0 : i1 to i32
    %c0_i32_0 = arith.constant 0 : i32
    %2 = arith.cmpi ne, %1, %c0_i32_0 : i32
    scf.if %2 {
      %cst_10 = arith.constant 0.000000e+00 : f32
      %12 = vector.broadcast %cst_10 : f32 to vector<128x256xf32>
      %c0_11 = arith.constant 0 : index
      %c0_12 = arith.constant 0 : index
      %13 = vector.load %arg5[%c0_11, %c0_12] : memref<128x256xf32, #tpu.memory_space<vmem>>, vector<128x256xf32>
      tpu.vector_store %arg5[%c0_11, %c0_12], %12 {strides = array<i32>} : memref<128x256xf32, #tpu.memory_space<vmem>>, vector<128x256xf32>,
    } else {
    }
    %c0 = arith.constant 0 : index
    %c0_1 = arith.constant 0 : index
    %3 = vector.load %arg5[%c0, %c0_1] : memref<128x256xf32, #tpu.memory_space<vmem>>, vector<128x256xf32>
    %c0_2 = arith.constant 0 : index
    %c0_3 = arith.constant 0 : index
    %4 = vector.load %arg2[%c0_2, %c0_3] : memref<128x512xbf16, #tpu.memory_space<vmem>>, vector<128x512xbf16>
    %c0_4 = arith.constant 0 : index
    %c0_5 = arith.constant 0 : index
    %5 = vector.load %arg3[%c0_4, %c0_5] : memref<512x256xbf16, #tpu.memory_space<vmem>>, vector<512x256xbf16>
    %cst = arith.constant dense<0.000000e+00> : vector<128x256xf32>
    %6 = tpu.matmul %4, %5, %cst {dimension_numbers = #tpu.dot_dimension_numbers<[1], [0], [0], [1], [0, 0, 1, 1], [], []>} : vector<128x512xbf16>, vector<512x256xbf16>, vector<128x256xf32> -> vector<128x256xf32>
    %7 = arith.addf %3, %6 : vector<128x256xf32>
    %c0_6 = arith.constant 0 : index
    %c0_7 = arith.constant 0 : index
    %8 = vector.load %arg5[%c0_6, %c0_7] : memref<128x256xf32, #tpu.memory_space<vmem>>, vector<128x256xf32>
    tpu.vector_store %arg5[%c0_6, %c0_7], %7 {strides = array<i32>} : memref<128x256xf32, #tpu.memory_space<vmem>>, vector<128x256xf32>,
    %c0_i32_8 = arith.constant 0 : i32
    %9 = arith.cmpi eq, %arg1, %c0_i32_8 : i32
    %10 = arith.extui %9 : i1 to i32
    %c0_i32_9 = arith.constant 0 : i32
    %11 = arith.cmpi ne, %10, %c0_i32_9 : i32
    scf.if %11 {
      %c0_10 = arith.constant 0 : index
      %c0_11 = arith.constant 0 : index
      %12 = vector.load %arg5[%c0_10, %c0_11] : memref<128x256xf32, #tpu.memory_space<vmem>>, vector<128x256xf32>
      %13 = arith.truncf %12 : vector<128x256xf32> to vector<128x256xbf16>
      %c0_12 = arith.constant 0 : index
      %c0_13 = arith.constant 0 : index
      %14 = vector.load %arg4[%c0_12, %c0_13] : memref<128x256xbf16, #tpu.memory_space<vmem>>, vector<128x256xbf16>
      tpu.vector_store %arg4[%c0_12, %c0_13], %13 {strides = array<i32>} : memref<128x256xbf16, #tpu.memory_space<vmem>>, vector<128x256xbf16>,
    } else {
    }
    return
  }
  func.func @transform_0(%arg0: i32, %arg1: i32) -> (i32, i32) {
    %c0_i32 = arith.constant 0 : i32
    return %arg0, %arg1 : i32, i32
  }
  func.func @transform_1(%arg0: i32, %arg1: i32) -> (i32, i32) {
    %c0_i32 = arith.constant 0 : i32
    %c0_i32_0 = arith.constant 0 : i32
    return %arg1, %c0_i32 : i32, i32
  }
  func.func @transform_2(%arg0: i32, %arg1: i32) -> (i32, i32) {
    %c0_i32 = arith.constant 0 : i32
    %c0_i32_0 = arith.constant 0 : i32
    return %arg0, %c0_i32 : i32, i32
  }
}

module attributes {stable_mosaic.version = 11 : i64} {
  func.func @_prop_kernel(%arg0: i32, %arg1: i32, %arg2: memref<128x128xbf16, #tpu.memory_space<vmem>>, %arg3: memref<128x256xbf16, #tpu.memory_space<vmem>>, %arg4: memref<1x256xf32, #tpu.memory_space<vmem>>, %arg5: memref<128x256xbf16, #tpu.memory_space<vmem>>, %arg6: memref<128x256xf32, #tpu.memory_space<vmem>>) attributes {dimension_semantics = [#tpu.dimension_semantics<parallel>, #tpu.dimension_semantics<arbitrary>], iteration_bounds = array<i64: 1, 1>, scalar_prefetch = 0 : i64, scratch_operands = 1 : i64, tpu.core_type = #tpu.core_type<tc>, window_params = [{transform_indices = @transform_0, window_bounds = array<i64: 128, 128>}, {transform_indices = @transform_1, window_bounds = array<i64: 128, 256>}, {pipeline_mode = #tpu.pipeline_mode<synchronous>, transform_indices = @transform_2, window_bounds = array<i64: 1, 256>}, {transform_indices = @transform_3, window_bounds = array<i64: 128, 256>}]} {
    %c0_i32 = arith.constant 0 : i32
    %0 = arith.cmpi eq, %arg1, %c0_i32 : i32
    %1 = arith.extui %0 : i1 to i32
    %c0_i32_0 = arith.constant 0 : i32
    %2 = arith.cmpi ne, %1, %c0_i32_0 : i32
    scf.if %2 {
      %cst_10 = arith.constant 0.000000e+00 : f32
      %12 = vector.broadcast %cst_10 : f32 to vector<128x256xf32>
      %c0_11 = arith.constant 0 : index
      %c0_12 = arith.constant 0 : index
      %13 = vector.load %arg6[%c0_11, %c0_12] : memref<128x256xf32, #tpu.memory_space<vmem>>, vector<128x256xf32>
      tpu.vector_store %arg6[%c0_11, %c0_12], %12 {strides = array<i32>} : memref<128x256xf32, #tpu.memory_space<vmem>>, vector<128x256xf32>,
    } else {
    }
    %c0 = arith.constant 0 : index
    %c0_1 = arith.constant 0 : index
    %3 = vector.load %arg6[%c0, %c0_1] : memref<128x256xf32, #tpu.memory_space<vmem>>, vector<128x256xf32>
    %c0_2 = arith.constant 0 : index
    %c0_3 = arith.constant 0 : index
    %4 = vector.load %arg2[%c0_2, %c0_3] : memref<128x128xbf16, #tpu.memory_space<vmem>>, vector<128x128xbf16>
    %c0_4 = arith.constant 0 : index
    %c0_5 = arith.constant 0 : index
    %5 = vector.load %arg3[%c0_4, %c0_5] : memref<128x256xbf16, #tpu.memory_space<vmem>>, vector<128x256xbf16>
    %cst = arith.constant dense<0.000000e+00> : vector<128x256xf32>
    %6 = tpu.matmul %4, %5, %cst {dimension_numbers = #tpu.dot_dimension_numbers<[1], [0], [0], [1], [0, 0, 1, 1], [], []>} : vector<128x128xbf16>, vector<128x256xbf16>, vector<128x256xf32> -> vector<128x256xf32>
    %7 = arith.addf %3, %6 : vector<128x256xf32>
    %c0_6 = arith.constant 0 : index
    %c0_7 = arith.constant 0 : index
    %8 = vector.load %arg6[%c0_6, %c0_7] : memref<128x256xf32, #tpu.memory_space<vmem>>, vector<128x256xf32>
    tpu.vector_store %arg6[%c0_6, %c0_7], %7 {strides = array<i32>} : memref<128x256xf32, #tpu.memory_space<vmem>>, vector<128x256xf32>,
    %c0_i32_8 = arith.constant 0 : i32
    %9 = arith.cmpi eq, %arg1, %c0_i32_8 : i32
    %10 = arith.extui %9 : i1 to i32
    %c0_i32_9 = arith.constant 0 : i32
    %11 = arith.cmpi ne, %10, %c0_i32_9 : i32
    scf.if %11 {
      %c0_10 = arith.constant 0 : index
      %c0_11 = arith.constant 0 : index
      %12 = vector.load %arg6[%c0_10, %c0_11] : memref<128x256xf32, #tpu.memory_space<vmem>>, vector<128x256xf32>
      %c0_12 = arith.constant 0 : index
      %c0_13 = arith.constant 0 : index
      %13 = vector.load %arg4[%c0_12, %c0_13] : memref<1x256xf32, #tpu.memory_space<vmem>>, vector<1x256xf32>
      %14 = vector.broadcast %13 : vector<1x256xf32> to vector<128x256xf32>
      %15 = arith.addf %12, %14 : vector<128x256xf32>
      %cst_14 = arith.constant 0.000000e+00 : f32
      %16 = vector.broadcast %cst_14 : f32 to vector<128x256xf32>
      %17 = arith.maximumf %15, %16 : vector<128x256xf32>
      %18 = arith.truncf %17 : vector<128x256xf32> to vector<128x256xbf16>
      %c0_15 = arith.constant 0 : index
      %c0_16 = arith.constant 0 : index
      %19 = vector.load %arg5[%c0_15, %c0_16] : memref<128x256xbf16, #tpu.memory_space<vmem>>, vector<128x256xbf16>
      tpu.vector_store %arg5[%c0_15, %c0_16], %18 {strides = array<i32>} : memref<128x256xbf16, #tpu.memory_space<vmem>>, vector<128x256xbf16>,
    } else {
    }
    return
  }
  func.func @transform_0(%arg0: i32, %arg1: i32) -> (i32, i32) {
    %c0_i32 = arith.constant 0 : i32
    return %arg0, %arg1 : i32, i32
  }
  func.func @transform_1(%arg0: i32, %arg1: i32) -> (i32, i32) {
    %c0_i32 = arith.constant 0 : i32
    %c0_i32_0 = arith.constant 0 : i32
    return %arg1, %c0_i32 : i32, i32
  }
  func.func @transform_2(%arg0: i32, %arg1: i32) -> (i32, i32) {
    %c0_i32 = arith.constant 0 : i32
    %c0_i32_0 = arith.constant 0 : i32
    %c0_i32_1 = arith.constant 0 : i32
    return %c0_i32, %c0_i32_0 : i32, i32
  }
  func.func @transform_3(%arg0: i32, %arg1: i32) -> (i32, i32) {
    %c0_i32 = arith.constant 0 : i32
    %c0_i32_0 = arith.constant 0 : i32
    return %arg0, %c0_i32 : i32, i32
  }
}

module attributes {stable_mosaic.version = 11 : i64} {
  func.func @_proj_kernel(%arg0: i32, %arg1: i32, %arg2: memref<128x256xbf16, #tpu.memory_space<vmem>>, %arg3: memref<256x128xbf16, #tpu.memory_space<vmem>>, %arg4: memref<128x128xbf16, #tpu.memory_space<vmem>>, %arg5: memref<128x128xf32, #tpu.memory_space<vmem>>) attributes {dimension_semantics = [#tpu.dimension_semantics<parallel>, #tpu.dimension_semantics<arbitrary>], iteration_bounds = array<i64: 1, 1>, scalar_prefetch = 0 : i64, scratch_operands = 1 : i64, tpu.core_type = #tpu.core_type<tc>, window_params = [{transform_indices = @transform_0, window_bounds = array<i64: 128, 256>}, {transform_indices = @transform_1, window_bounds = array<i64: 256, 128>}, {transform_indices = @transform_2, window_bounds = array<i64: 128, 128>}]} {
    %c0_i32 = arith.constant 0 : i32
    %0 = arith.cmpi eq, %arg1, %c0_i32 : i32
    %1 = arith.extui %0 : i1 to i32
    %c0_i32_0 = arith.constant 0 : i32
    %2 = arith.cmpi ne, %1, %c0_i32_0 : i32
    scf.if %2 {
      %cst_10 = arith.constant 0.000000e+00 : f32
      %12 = vector.broadcast %cst_10 : f32 to vector<128x128xf32>
      %c0_11 = arith.constant 0 : index
      %c0_12 = arith.constant 0 : index
      %13 = vector.load %arg5[%c0_11, %c0_12] : memref<128x128xf32, #tpu.memory_space<vmem>>, vector<128x128xf32>
      tpu.vector_store %arg5[%c0_11, %c0_12], %12 {strides = array<i32>} : memref<128x128xf32, #tpu.memory_space<vmem>>, vector<128x128xf32>,
    } else {
    }
    %c0 = arith.constant 0 : index
    %c0_1 = arith.constant 0 : index
    %3 = vector.load %arg5[%c0, %c0_1] : memref<128x128xf32, #tpu.memory_space<vmem>>, vector<128x128xf32>
    %c0_2 = arith.constant 0 : index
    %c0_3 = arith.constant 0 : index
    %4 = vector.load %arg2[%c0_2, %c0_3] : memref<128x256xbf16, #tpu.memory_space<vmem>>, vector<128x256xbf16>
    %c0_4 = arith.constant 0 : index
    %c0_5 = arith.constant 0 : index
    %5 = vector.load %arg3[%c0_4, %c0_5] : memref<256x128xbf16, #tpu.memory_space<vmem>>, vector<256x128xbf16>
    %cst = arith.constant dense<0.000000e+00> : vector<128x128xf32>
    %6 = tpu.matmul %4, %5, %cst {dimension_numbers = #tpu.dot_dimension_numbers<[1], [0], [0], [1], [0, 0, 1, 1], [], []>} : vector<128x256xbf16>, vector<256x128xbf16>, vector<128x128xf32> -> vector<128x128xf32>
    %7 = arith.addf %3, %6 : vector<128x128xf32>
    %c0_6 = arith.constant 0 : index
    %c0_7 = arith.constant 0 : index
    %8 = vector.load %arg5[%c0_6, %c0_7] : memref<128x128xf32, #tpu.memory_space<vmem>>, vector<128x128xf32>
    tpu.vector_store %arg5[%c0_6, %c0_7], %7 {strides = array<i32>} : memref<128x128xf32, #tpu.memory_space<vmem>>, vector<128x128xf32>,
    %c0_i32_8 = arith.constant 0 : i32
    %9 = arith.cmpi eq, %arg1, %c0_i32_8 : i32
    %10 = arith.extui %9 : i1 to i32
    %c0_i32_9 = arith.constant 0 : i32
    %11 = arith.cmpi ne, %10, %c0_i32_9 : i32
    scf.if %11 {
      %c0_10 = arith.constant 0 : index
      %c0_11 = arith.constant 0 : index
      %12 = vector.load %arg5[%c0_10, %c0_11] : memref<128x128xf32, #tpu.memory_space<vmem>>, vector<128x128xf32>
      %13 = arith.truncf %12 : vector<128x128xf32> to vector<128x128xbf16>
      %c0_12 = arith.constant 0 : index
      %c0_13 = arith.constant 0 : index
      %14 = vector.load %arg4[%c0_12, %c0_13] : memref<128x128xbf16, #tpu.memory_space<vmem>>, vector<128x128xbf16>
      tpu.vector_store %arg4[%c0_12, %c0_13], %13 {strides = array<i32>} : memref<128x128xbf16, #tpu.memory_space<vmem>>, vector<128x128xbf16>,
    } else {
    }
    return
  }
  func.func @transform_0(%arg0: i32, %arg1: i32) -> (i32, i32) {
    %c0_i32 = arith.constant 0 : i32
    return %arg0, %arg1 : i32, i32
  }
  func.func @transform_1(%arg0: i32, %arg1: i32) -> (i32, i32) {
    %c0_i32 = arith.constant 0 : i32
    %c0_i32_0 = arith.constant 0 : i32
    return %arg1, %c0_i32 : i32, i32
  }
  func.func @transform_2(%arg0: i32, %arg1: i32) -> (i32, i32) {
    %c0_i32 = arith.constant 0 : i32
    %c0_i32_0 = arith.constant 0 : i32
    return %arg0, %c0_i32 : i32, i32
  }
}

module attributes {stable_mosaic.version = 11 : i64} {
  func.func @_prop_head_kernel(%arg0: i32, %arg1: i32, %arg2: memref<128x128xbf16, #tpu.memory_space<vmem>>, %arg3: memref<128x128xbf16, #tpu.memory_space<vmem>>, %arg4: memref<1x128xf32, #tpu.memory_space<vmem>>, %arg5: memref<128x128xbf16, #tpu.memory_space<vmem>>, %arg6: memref<1x128xf32, #tpu.memory_space<vmem>>, %arg7: memref<128x128xf32, #tpu.memory_space<vmem>>, %arg8: memref<128x128xf32, #tpu.memory_space<vmem>>) attributes {dimension_semantics = [#tpu.dimension_semantics<parallel>, #tpu.dimension_semantics<arbitrary>], iteration_bounds = array<i64: 1, 1>, scalar_prefetch = 0 : i64, scratch_operands = 1 : i64, tpu.core_type = #tpu.core_type<tc>, window_params = [{transform_indices = @transform_0, window_bounds = array<i64: 128, 128>}, {transform_indices = @transform_1, window_bounds = array<i64: 128, 128>}, {pipeline_mode = #tpu.pipeline_mode<synchronous>, transform_indices = @transform_2, window_bounds = array<i64: 1, 128>}, {pipeline_mode = #tpu.pipeline_mode<synchronous>, transform_indices = @transform_3, window_bounds = array<i64: 128, 128>}, {pipeline_mode = #tpu.pipeline_mode<synchronous>, transform_indices = @transform_4, window_bounds = array<i64: 1, 128>}, {transform_indices = @transform_5, window_bounds = array<i64: 128, 128>}]} {
    %c0_i32 = arith.constant 0 : i32
    %0 = arith.cmpi eq, %arg1, %c0_i32 : i32
    %1 = arith.extui %0 : i1 to i32
    %c0_i32_0 = arith.constant 0 : i32
    %2 = arith.cmpi ne, %1, %c0_i32_0 : i32
    scf.if %2 {
      %cst_10 = arith.constant 0.000000e+00 : f32
      %12 = vector.broadcast %cst_10 : f32 to vector<128x128xf32>
      %c0_11 = arith.constant 0 : index
      %c0_12 = arith.constant 0 : index
      %13 = vector.load %arg8[%c0_11, %c0_12] : memref<128x128xf32, #tpu.memory_space<vmem>>, vector<128x128xf32>
      tpu.vector_store %arg8[%c0_11, %c0_12], %12 {strides = array<i32>} : memref<128x128xf32, #tpu.memory_space<vmem>>, vector<128x128xf32>,
    } else {
    }
    %c0 = arith.constant 0 : index
    %c0_1 = arith.constant 0 : index
    %3 = vector.load %arg8[%c0, %c0_1] : memref<128x128xf32, #tpu.memory_space<vmem>>, vector<128x128xf32>
    %c0_2 = arith.constant 0 : index
    %c0_3 = arith.constant 0 : index
    %4 = vector.load %arg2[%c0_2, %c0_3] : memref<128x128xbf16, #tpu.memory_space<vmem>>, vector<128x128xbf16>
    %c0_4 = arith.constant 0 : index
    %c0_5 = arith.constant 0 : index
    %5 = vector.load %arg3[%c0_4, %c0_5] : memref<128x128xbf16, #tpu.memory_space<vmem>>, vector<128x128xbf16>
    %cst = arith.constant dense<0.000000e+00> : vector<128x128xf32>
    %6 = tpu.matmul %4, %5, %cst {dimension_numbers = #tpu.dot_dimension_numbers<[1], [0], [0], [1], [0, 0, 1, 1], [], []>} : vector<128x128xbf16>, vector<128x128xbf16>, vector<128x128xf32> -> vector<128x128xf32>
    %7 = arith.addf %3, %6 : vector<128x128xf32>
    %c0_6 = arith.constant 0 : index
    %c0_7 = arith.constant 0 : index
    %8 = vector.load %arg8[%c0_6, %c0_7] : memref<128x128xf32, #tpu.memory_space<vmem>>, vector<128x128xf32>
    tpu.vector_store %arg8[%c0_6, %c0_7], %7 {strides = array<i32>} : memref<128x128xf32, #tpu.memory_space<vmem>>, vector<128x128xf32>,
    %c0_i32_8 = arith.constant 0 : i32
    %9 = arith.cmpi eq, %arg1, %c0_i32_8 : i32
    %10 = arith.extui %9 : i1 to i32
    %c0_i32_9 = arith.constant 0 : i32
    %11 = arith.cmpi ne, %10, %c0_i32_9 : i32
    scf.if %11 {
      %c0_10 = arith.constant 0 : index
      %c0_11 = arith.constant 0 : index
      %12 = vector.load %arg8[%c0_10, %c0_11] : memref<128x128xf32, #tpu.memory_space<vmem>>, vector<128x128xf32>
      %c0_12 = arith.constant 0 : index
      %c0_13 = arith.constant 0 : index
      %13 = vector.load %arg4[%c0_12, %c0_13] : memref<1x128xf32, #tpu.memory_space<vmem>>, vector<1x128xf32>
      %14 = vector.broadcast %13 : vector<1x128xf32> to vector<128x128xf32>
      %15 = arith.addf %12, %14 : vector<128x128xf32>
      %cst_14 = arith.constant 0.000000e+00 : f32
      %16 = vector.broadcast %cst_14 : f32 to vector<128x128xf32>
      %17 = arith.maximumf %15, %16 : vector<128x128xf32>
      %18 = arith.truncf %17 : vector<128x128xf32> to vector<128x128xbf16>
      %c0_15 = arith.constant 0 : index
      %c0_16 = arith.constant 0 : index
      %19 = vector.load %arg5[%c0_15, %c0_16] : memref<128x128xbf16, #tpu.memory_space<vmem>>, vector<128x128xbf16>
      %cst_17 = arith.constant dense<0.000000e+00> : vector<128x128xf32>
      %20 = tpu.matmul %18, %19, %cst_17 {dimension_numbers = #tpu.dot_dimension_numbers<[1], [0], [0], [1], [0, 0, 1, 1], [], []>} : vector<128x128xbf16>, vector<128x128xbf16>, vector<128x128xf32> -> vector<128x128xf32>
      %c0_18 = arith.constant 0 : index
      %c0_19 = arith.constant 0 : index
      %21 = vector.load %arg6[%c0_18, %c0_19] : memref<1x128xf32, #tpu.memory_space<vmem>>, vector<1x128xf32>
      %22 = vector.broadcast %21 : vector<1x128xf32> to vector<128x128xf32>
      %23 = arith.addf %20, %22 : vector<128x128xf32>
      %c0_20 = arith.constant 0 : index
      %c0_21 = arith.constant 0 : index
      %24 = vector.load %arg7[%c0_20, %c0_21] : memref<128x128xf32, #tpu.memory_space<vmem>>, vector<128x128xf32>
      tpu.vector_store %arg7[%c0_20, %c0_21], %23 {strides = array<i32>} : memref<128x128xf32, #tpu.memory_space<vmem>>, vector<128x128xf32>,
    } else {
    }
    return
  }
  func.func @transform_0(%arg0: i32, %arg1: i32) -> (i32, i32) {
    %c0_i32 = arith.constant 0 : i32
    return %arg0, %arg1 : i32, i32
  }
  func.func @transform_1(%arg0: i32, %arg1: i32) -> (i32, i32) {
    %c0_i32 = arith.constant 0 : i32
    %c0_i32_0 = arith.constant 0 : i32
    return %arg1, %c0_i32 : i32, i32
  }
  func.func @transform_2(%arg0: i32, %arg1: i32) -> (i32, i32) {
    %c0_i32 = arith.constant 0 : i32
    %c0_i32_0 = arith.constant 0 : i32
    %c0_i32_1 = arith.constant 0 : i32
    return %c0_i32, %c0_i32_0 : i32, i32
  }
  func.func @transform_3(%arg0: i32, %arg1: i32) -> (i32, i32) {
    %c0_i32 = arith.constant 0 : i32
    %c0_i32_0 = arith.constant 0 : i32
    %c0_i32_1 = arith.constant 0 : i32
    return %c0_i32, %c0_i32_0 : i32, i32
  }
  func.func @transform_4(%arg0: i32, %arg1: i32) -> (i32, i32) {
    %c0_i32 = arith.constant 0 : i32
    %c0_i32_0 = arith.constant 0 : i32
    %c0_i32_1 = arith.constant 0 : i32
    return %c0_i32, %c0_i32_0 : i32, i32
  }
  func.func @transform_5(%arg0: i32, %arg1: i32) -> (i32, i32) {
    %c0_i32 = arith.constant 0 : i32
    %c0_i32_0 = arith.constant 0 : i32
    return %arg0, %c0_i32 : i32, i32
  }
}

</mosaic_0001>

<bundles_post_ra>
// kernel: gcn_forward.9
= control target key start
LH: loop header
LB: loop body
LE: loop exit
PB: predicated region body
PF: predicated region fallthrough
CT: control target
= control target key end

     0   :  { %s908_s1 = inlined_call_operand.vmem [shape: bf16[128,256], index: 1, kind: input, shape index: {}]   ;;  %s909_s0 = inlined_call_operand.vmem [shape: bf16[128,128], index: 0, kind: input, shape index: {}]   ;;  %s910_s2 = inlined_call_operand.vmem [shape: f32[1,256], index: 2, kind: input, shape index: {}]   ;;  %s911_s3 = inlined_call_operand.vmem [shape: bf16[128,256], index: 3, kind: output, shape index: {}]  }
   0x1   :  { %v635_v0 = vld [vmem:[%s908_s1 + $0x70] sm:$0xf]  ;;  %v664_v1 = vld [vmem:[%s908_s1 + $0x74] sm:$0xf0]  ;;  %v663_v2 = vld [vmem:[%s908_s1 + $0x74] sm:$0xf] }
   0x2   :  { %v636_v3 = vor.u32 %v664_v1, %v635_v0  ;;  %v637_v4 = vld [vmem:[%s908_s1 + $0x78] sm:$0xf0]  ;;  %v627_v5 = vld [vmem:[%s908_s1 + $0x60] sm:$0xf]  ;;  %v662_v6 = vld [vmem:[%s908_s1 + $0x64] sm:$0xf0] }
   0x3   :  { %v640_v7 = vor.u32 %v663_v2, %v637_v4  ;;  %v661_v8 = vld [vmem:[%s908_s1 + $0x64] sm:$0xf]  ;;  %v629_v9 = vld [vmem:[%s908_s1 + $0x68] sm:$0xf0]  ;;  %v628_v10 = vor.u32 %v662_v6, %v627_v5  ;;  %v619_v12 = vld [vmem:[%s908_s1 + $0x50] sm:$0xf] }
   0x4   :  { %242 = vmatpush.bf16.msra.mxu0 %v636_v3  ;;  %665 = vmatpush.bf16.msra.mxu2 %v636_v3  ;;  %v632_v11 = vor.u32 %v661_v8, %v629_v9  ;;  %v660_v13 = vld [vmem:[%s908_s1 + $0x54] sm:$0xf0]  ;;  %v659_v14 = vld [vmem:[%s908_s1 + $0x54] sm:$0xf]  ;;  %v621_v15 = vld [vmem:[%s908_s1 + $0x58] sm:$0xf0] }
   0x5   :  { %291 = vmatpush.bf16.msra.mxu1 %v640_v7  ;;  %673 = vmatpush.bf16.msra.mxu3 %v640_v7  ;;  %v620_v16 = vor.u32 %v660_v13, %v619_v12  ;;  %v624_v17 = vor.u32 %v659_v14, %v621_v15  ;;  %v611_v18 = vld [vmem:[%s908_s1 + $0x40] sm:$0xf]  ;;  %v658_v19 = vld [vmem:[%s908_s1 + $0x44] sm:$0xf0]  ;;  %v657_v20 = vld [vmem:[%s908_s1 + $0x44] sm:$0xf] }
   0x6   :  { %v613_v21 = vld [vmem:[%s908_s1 + $0x48] sm:$0xf0]  ;;  %v612_v22 = vor.u32 %v658_v19, %v611_v18  ;;  %v603_v24 = vld [vmem:[%s908_s1 + $0x30] sm:$0xf]  ;;  %v656_v25 = vld [vmem:[%s908_s1 + $0x34] sm:$0xf0] }
   0x7   :  { %v616_v23 = vor.u32 %v657_v20, %v613_v21  ;;  %v655_v26 = vld [vmem:[%s908_s1 + $0x34] sm:$0xf]  ;;  %v605_v27 = vld [vmem:[%s908_s1 + $0x38] sm:$0xf0]  ;;  %v604_v28 = vor.u32 %v656_v25, %v603_v24  ;;  %v595_v30 = vld [vmem:[%s908_s1 + $0x20] sm:$0xf] }
   0x8   :  { %243 = vmatpush.bf16.msra.mxu0 %v628_v10  ;;  %666 = vmatpush.bf16.msra.mxu2 %v628_v10  ;;  %v608_v29 = vor.u32 %v655_v26, %v605_v27  ;;  %v654_v31 = vld [vmem:[%s908_s1 + $0x24] sm:$0xf0]  ;;  %v653_v32 = vld [vmem:[%s908_s1 + $0x24] sm:$0xf]  ;;  %v597_v33 = vld [vmem:[%s908_s1 + $0x28] sm:$0xf0] }
   0x9   :  { %292 = vmatpush.bf16.msra.mxu1 %v632_v11  ;;  %674 = vmatpush.bf16.msra.mxu3 %v632_v11  ;;  %v596_v34 = vor.u32 %v654_v31, %v595_v30  ;;  %v600_v35 = vor.u32 %v653_v32, %v597_v33  ;;  %v587_v36 = vld [vmem:[%s908_s1 + $0x10] sm:$0xf]  ;;  %v652_v37 = vld [vmem:[%s908_s1 + $0x14] sm:$0xf0]  ;;  %v651_v38 = vld [vmem:[%s908_s1 + $0x14] sm:$0xf] }
   0xa   :  { %v589_v39 = vld [vmem:[%s908_s1 + $0x18] sm:$0xf0]  ;;  %v588_v40 = vor.u32 %v652_v37, %v587_v36  ;;  %v579_v42 = vld [vmem:[%s908_s1] sm:$0xf]  ;;  %v650_v43 = vld [vmem:[%s908_s1 + $0x4] sm:$0xf0] }
   0xb   :  { %v592_v41 = vor.u32 %v651_v38, %v589_v39  ;;  %v649_v44 = vld [vmem:[%s908_s1 + $0x4] sm:$0xf]  ;;  %v581_v45 = vld [vmem:[%s908_s1 + $0x8] sm:$0xf0]  ;;  %v580_v46 = vor.u32 %v650_v43, %v579_v42  ;;  %v643_v52 = vld [vmem:[%s909_s0 + $0x10] sm:$0xff] }
   0xc   :  { %244 = vmatpush.bf16.msra.mxu0 %v620_v16  ;;  %667 = vmatpush.bf16.msra.mxu2 %v620_v16  ;;  %v584_v47 = vor.u32 %v649_v44, %v581_v45  ;;  %v641_v48 = vld [vmem:[%s909_s0] sm:$0xff]  ;;  %v642_v50 = vld [vmem:[%s909_s0 + $0x8] sm:$0xff]  ;;  %v647_v53 = vld [vmem:[%s909_s0 + $0x30] sm:$0xff] }
   0xd   :  { %293 = vmatpush.bf16.msra.mxu1 %v624_v17  ;;  %675 = vmatpush.bf16.msra.mxu3 %v624_v17  ;;  %v645_v49 = vld [vmem:[%s909_s0 + $0x20] sm:$0xff]  ;;  %v646_v51 = vld [vmem:[%s909_s0 + $0x28] sm:$0xff]  ;;  %v644_v54 = vld [vmem:[%s909_s0 + $0x18] sm:$0xff] }
   0xe   :  { %v648_v55 = vld [vmem:[%s909_s0 + $0x38] sm:$0xff]  ;;  %v439_v56 = vld [vmem:[%s910_s2] sm:$0x3] }
   0xf   :  { %v824_v57 = vperm.slane %v439_v56, 0  ;;  %v826_v58 = vperm.slane %v439_v56, 1 }
  0x10   :  { %245 = vmatpush.bf16.msra.mxu0 %v612_v22  ;;  %668 = vmatpush.bf16.msra.mxu2 %v612_v22 }
  0x11   :  { %294 = vmatpush.bf16.msra.mxu1 %v616_v23  ;;  %676 = vmatpush.bf16.msra.mxu3 %v616_v23 }
  0x14   :  { %246 = vmatpush.bf16.msra.mxu0 %v604_v28  ;;  %669 = vmatpush.bf16.msra.mxu2 %v604_v28 }
  0x15   :  { %295 = vmatpush.bf16.msra.mxu1 %v608_v29  ;;  %677 = vmatpush.bf16.msra.mxu3 %v608_v29 }
  0x18   :  { %247 = vmatpush.bf16.msra.mxu0 %v596_v34  ;;  %670 = vmatpush.bf16.msra.mxu2 %v596_v34 }
  0x19   :  { %296 = vmatpush.bf16.msra.mxu1 %v600_v35  ;;  %678 = vmatpush.bf16.msra.mxu3 %v600_v35 }
  0x1c   :  { %248 = vmatpush.bf16.msra.mxu0 %v588_v40  ;;  %671 = vmatpush.bf16.msra.mxu2 %v588_v40 }
  0x1d   :  { %297 = vmatpush.bf16.msra.mxu1 %v592_v41  ;;  %679 = vmatpush.bf16.msra.mxu3 %v592_v41 }
  0x20   :  { %249 = vmatpush.bf16.msra.mxu0 %v580_v46  ;;  %672 = vmatpush.bf16.msra.mxu2 %v580_v46 }
  0x21   :  { %298 = vmatpush.bf16.msra.mxu1 %v584_v47  ;;  %680 = vmatpush.bf16.msra.mxu3 %v584_v47 }
  0x23   :  { %250 = vmatmul.bf16.vlgmr.msra.gmra.mxu0 %v641_v48  ;;  %270 = vmatmul.bf16.vlgmr.msra.gmra.mxu2 %v645_v49 }
  0x24   :  { %299 = vmatmul.bf16.vlgmr.msra.gmra.mxu1 %v641_v48  ;;  %319 = vmatmul.bf16.vlgmr.msra.gmra.mxu3 %v645_v49 }
  0x33   :  { %255 = vmatmul.bf16.gmra.mxu0 %v642_v50  ;;  %275 = vmatmul.bf16.gmra.mxu2 %v646_v51 }
  0x34   :  { %304 = vmatmul.bf16.gmra.mxu1 %v642_v50  ;;  %324 = vmatmul.bf16.gmra.mxu3 %v646_v51 }
  0x43   :  { %260 = vmatmul.bf16.gmra.mxu0 %v643_v52  ;;  %280 = vmatmul.bf16.gmra.mxu2 %v647_v53 }
  0x44   :  { %309 = vmatmul.bf16.gmra.mxu1 %v643_v52  ;;  %329 = vmatmul.bf16.gmra.mxu3 %v647_v53 }
  0x53   :  { %265 = vmatmul.bf16.gmra.mxu0 %v644_v54  ;;  %285 = vmatmul.bf16.gmra.mxu2 %v648_v55 }
  0x54   :  { %314 = vmatmul.bf16.gmra.mxu1 %v644_v54  ;;  %334 = vmatmul.bf16.gmra.mxu3 %v648_v55 }
  0xa0   :  { %v251_v59 = vpop.f32.mrf.mxu0 }
  0xa1   :  { %v445_v60 = vadd.f32 %v824_v57, %v251_v59  ;;  %v300_v61 = vpop.f32.mrf.mxu1 }
  0xa2   :  { %v446_v62 = vadd.f32 %v826_v58, %v300_v61 }
  0xa3   :  { %v477_v63 = vmax.f32 %v445_v60, 0.0 }
  0xa4   :  { %v478_v0 = vmax.f32 %v446_v62, 0.0 }
  0xa6   :  { %v509_v1 = vpack.c.bf16 %v478_v0, %v477_v63  ;;  %v271_v2 = vpop.f32.mrf.mxu2 }
  0xa7   :  { %v461_v3 = vadd.f32 %v824_v57, %v271_v2  ;;  %v320_v4 = vpop.f32.mrf.mxu3 }
  0xa8   :  { %525 = vst [vmem:[%s911_s3] sm:$0xff] %v509_v1  ;;  %v462_v5 = vadd.f32 %v826_v58, %v320_v4  ;;  %v253_v6 = vpop.f32.mrf.mxu0 }
  0xa9   :  { %v493_v7 = vmax.f32 %v461_v3, 0.0  ;;  %v447_v8 = vadd.f32 %v824_v57, %v253_v6  ;;  %v302_v9 = vpop.f32.mrf.mxu1 }
  0xaa   :  { %v494_v10 = vmax.f32 %v462_v5, 0.0  ;;  %v448_v11 = vadd.f32 %v826_v58, %v302_v9 }
  0xab   :  { %v479_v12 = vmax.f32 %v447_v8, 0.0 }
  0xac   :  { %v517_v13 = vpack.c.bf16 %v494_v10, %v493_v7  ;;  %v480_v14 = vmax.f32 %v448_v11, 0.0 }
  0xae   :  { %533 = vst [vmem:[%s911_s3 + $0x40] sm:$0xff] %v517_v13  ;;  %v510_v15 = vpack.c.bf16 %v480_v14, %v479_v12  ;;  %v273_v16 = vpop.f32.mrf.mxu2 }
  0xaf   :  { %v463_v17 = vadd.f32 %v824_v57, %v273_v16  ;;  %v322_v18 = vpop.f32.mrf.mxu3 }
  0xb0   :  { %526 = vst [vmem:[%s911_s3 + $0x8] sm:$0xff] %v510_v15  ;;  %v464_v19 = vadd.f32 %v826_v58, %v322_v18  ;;  %v256_v20 = vpop.f32.mrf.mxu0 }
  0xb1   :  { %v495_v21 = vmax.f32 %v463_v17, 0.0  ;;  %v449_v22 = vadd.f32 %v824_v57, %v256_v20  ;;  %v305_v23 = vpop.f32.mrf.mxu1 }
  0xb2   :  { %v496_v24 = vmax.f32 %v464_v19, 0.0  ;;  %v450_v25 = vadd.f32 %v826_v58, %v305_v23 }
  0xb3   :  { %v481_v26 = vmax.f32 %v449_v22, 0.0 }
  0xb4   :  { %v518_v27 = vpack.c.bf16 %v496_v24, %v495_v21  ;;  %v482_v28 = vmax.f32 %v450_v25, 0.0 }
  0xb6   :  { %534 = vst [vmem:[%s911_s3 + $0x48] sm:$0xff] %v518_v27  ;;  %v511_v29 = vpack.c.bf16 %v482_v28, %v481_v26  ;;  %v276_v30 = vpop.f32.mrf.mxu2 }
  0xb7   :  { %v465_v31 = vadd.f32 %v824_v57, %v276_v30  ;;  %v325_v32 = vpop.f32.mrf.mxu3 }
  0xb8   :  { %527 = vst [vmem:[%s911_s3 + $0x10] sm:$0xff] %v511_v29  ;;  %v466_v33 = vadd.f32 %v826_v58, %v325_v32  ;;  %v258_v34 = vpop.f32.mrf.mxu0 }
  0xb9   :  { %v497_v35 = vmax.f32 %v465_v31, 0.0  ;;  %v451_v36 = vadd.f32 %v824_v57, %v258_v34  ;;  %v307_v37 = vpop.f32.mrf.mxu1 }
  0xba   :  { %v498_v38 = vmax.f32 %v466_v33, 0.0  ;;  %v452_v39 = vadd.f32 %v826_v58, %v307_v37 }
  0xbb   :  { %v483_v40 = vmax.f32 %v451_v36, 0.0 }
  0xbc   :  { %v519_v41 = vpack.c.bf16 %v498_v38, %v497_v35  ;;  %v484_v42 = vmax.f32 %v452_v39, 0.0 }
  0xbe   :  { %535 = vst [vmem:[%s911_s3 + $0x50] sm:$0xff] %v519_v41  ;;  %v512_v43 = vpack.c.bf16 %v484_v42, %v483_v40  ;;  %v278_v44 = vpop.f32.mrf.mxu2 }
  0xbf   :  { %v467_v45 = vadd.f32 %v824_v57, %v278_v44  ;;  %v327_v46 = vpop.f32.mrf.mxu3 }
  0xc0   :  { %528 = vst [vmem:[%s911_s3 + $0x18] sm:$0xff] %v512_v43  ;;  %v468_v47 = vadd.f32 %v826_v58, %v327_v46  ;;  %v261_v48 = vpop.f32.mrf.mxu0 }
  0xc1   :  { %v499_v49 = vmax.f32 %v467_v45, 0.0  ;;  %v453_v50 = vadd.f32 %v824_v57, %v261_v48  ;;  %v310_v51 = vpop.f32.mrf.mxu1 }
  0xc2   :  { %v500_v52 = vmax.f32 %v468_v47, 0.0  ;;  %v454_v53 = vadd.f32 %v826_v58, %v310_v51 }
  0xc3   :  { %v485_v54 = vmax.f32 %v453_v50, 0.0 }
  0xc4   :  { %v520_v55 = vpack.c.bf16 %v500_v52, %v499_v49  ;;  %v486_v56 = vmax.f32 %v454_v53, 0.0 }
  0xc6   :  { %536 = vst [vmem:[%s911_s3 + $0x58] sm:$0xff] %v520_v55  ;;  %v513_v59 = vpack.c.bf16 %v486_v56, %v485_v54  ;;  %v281_v60 = vpop.f32.mrf.mxu2 }
  0xc7   :  { %v469_v61 = vadd.f32 %v824_v57, %v281_v60  ;;  %v330_v62 = vpop.f32.mrf.mxu3 }
  0xc8   :  { %529 = vst [vmem:[%s911_s3 + $0x20] sm:$0xff] %v513_v59  ;;  %v470_v63 = vadd.f32 %v826_v58, %v330_v62  ;;  %v263_v0 = vpop.f32.mrf.mxu0 }
  0xc9   :  { %v501_v1 = vmax.f32 %v469_v61, 0.0  ;;  %v455_v2 = vadd.f32 %v824_v57, %v263_v0  ;;  %v312_v3 = vpop.f32.mrf.mxu1 }
  0xca   :  { %v502_v4 = vmax.f32 %v470_v63, 0.0  ;;  %v456_v5 = vadd.f32 %v826_v58, %v312_v3 }
  0xcb   :  { %v487_v6 = vmax.f32 %v455_v2, 0.0 }
  0xcc   :  { %v521_v7 = vpack.c.bf16 %v502_v4, %v501_v1  ;;  %v488_v8 = vmax.f32 %v456_v5, 0.0 }
  0xce   :  { %537 = vst [vmem:[%s911_s3 + $0x60] sm:$0xff] %v521_v7  ;;  %v514_v9 = vpack.c.bf16 %v488_v8, %v487_v6  ;;  %v283_v10 = vpop.f32.mrf.mxu2 }
  0xcf   :  { %v471_v11 = vadd.f32 %v824_v57, %v283_v10  ;;  %v332_v12 = vpop.f32.mrf.mxu3 }
  0xd0   :  { %530 = vst [vmem:[%s911_s3 + $0x28] sm:$0xff] %v514_v9  ;;  %v472_v13 = vadd.f32 %v826_v58, %v332_v12  ;;  %v266_v14 = vpop.f32.mrf.mxu0 }
  0xd1   :  { %v503_v15 = vmax.f32 %v471_v11, 0.0  ;;  %v457_v16 = vadd.f32 %v824_v57, %v266_v14  ;;  %v315_v17 = vpop.f32.mrf.mxu1 }
  0xd2   :  { %v504_v18 = vmax.f32 %v472_v13, 0.0  ;;  %v458_v19 = vadd.f32 %v826_v58, %v315_v17 }
  0xd3   :  { %v489_v20 = vmax.f32 %v457_v16, 0.0 }
  0xd4   :  { %v522_v21 = vpack.c.bf16 %v504_v18, %v503_v15  ;;  %v490_v22 = vmax.f32 %v458_v19, 0.0 }
  0xd6   :  { %538 = vst [vmem:[%s911_s3 + $0x68] sm:$0xff] %v522_v21  ;;  %v515_v23 = vpack.c.bf16 %v490_v22, %v489_v20  ;;  %v286_v24 = vpop.f32.mrf.mxu2 }
  0xd7   :  { %v473_v25 = vadd.f32 %v824_v57, %v286_v24  ;;  %v335_v26 = vpop.f32.mrf.mxu3 }
  0xd8   :  { %531 = vst [vmem:[%s911_s3 + $0x30] sm:$0xff] %v515_v23  ;;  %v474_v27 = vadd.f32 %v826_v58, %v335_v26  ;;  %v268_v28 = vpop.f32.mrf.mxu0 }
  0xd9   :  { %v505_v29 = vmax.f32 %v473_v25, 0.0  ;;  %v459_v30 = vadd.f32 %v824_v57, %v268_v28  ;;  %v317_v31 = vpop.f32.mrf.mxu1 }
  0xda   :  { %v506_v32 = vmax.f32 %v474_v27, 0.0  ;;  %v460_v33 = vadd.f32 %v826_v58, %v317_v31 }
  0xdb   :  { %v491_v34 = vmax.f32 %v459_v30, 0.0 }
  0xdc   :  { %v523_v35 = vpack.c.bf16 %v506_v32, %v505_v29  ;;  %v492_v36 = vmax.f32 %v460_v33, 0.0 }
  0xde   :  { %539 = vst [vmem:[%s911_s3 + $0x70] sm:$0xff] %v523_v35  ;;  %v516_v37 = vpack.c.bf16 %v492_v36, %v491_v34  ;;  %v288_v38 = vpop.f32.mrf.mxu2 }
  0xdf   :  { %v475_v39 = vadd.f32 %v824_v57, %v288_v38  ;;  %v337_v40 = vpop.f32.mrf.mxu3 }
  0xe0   :  { %532 = vst [vmem:[%s911_s3 + $0x38] sm:$0xff] %v516_v37  ;;  %v476_v41 = vadd.f32 %v826_v58, %v337_v40 }
  0xe1   :  { %v507_v42 = vmax.f32 %v475_v39, 0.0 }
  0xe2   :  { %v508_v43 = vmax.f32 %v476_v41, 0.0 }
  0xe4   :  { %v524_v44 = vpack.c.bf16 %v508_v43, %v507_v42 }
  0xe6   :  { %540 = vst [vmem:[%s911_s3 + $0x78] sm:$0xff] %v524_v44 }

// kernel: gcn_forward.8
= control target key start
LH: loop header
LB: loop body
LE: loop exit
PB: predicated region body
PF: predicated region fallthrough
CT: control target
= control target key end

     0   :  { %s2477_s1 = inlined_call_operand.vmem [shape: bf16[512,256], index: 1, kind: input, shape index: {}]   ;;  %s2478_s0 = inlined_call_operand.vmem [shape: bf16[128,512], index: 0, kind: input, shape index: {}]   ;;  %s2479_s2 = inlined_call_operand.vmem [shape: bf16[128,256], index: 2, kind: output, shape index: {}]  }
   0x1   :  { %v1368_v0 = vld [vmem:[%s2477_s1 + $0x70] sm:$0xf]  ;;  %v1613_v1 = vld [vmem:[%s2477_s1 + $0x74] sm:$0xf0]  ;;  %v1360_v11 = vld [vmem:[%s2477_s1 + $0x60] sm:$0xf] }
   0x2   :  { %v1432_v2 = vld [vmem:[%s2477_s1 + $0xf0] sm:$0xf]  ;;  %v1369_v3 = vor.u32 %v1613_v1, %v1368_v0  ;;  %v1629_v4 = vld [vmem:[%s2477_s1 + $0xf4] sm:$0xf0]  ;;  %v1611_v13 = vld [vmem:[%s2477_s1 + $0x64] sm:$0xf0] }
   0x3   :  { %v1496_v5 = vld [vmem:[%s2477_s1 + $0x170] sm:$0xf]  ;;  %v1645_v6 = vld [vmem:[%s2477_s1 + $0x174] sm:$0xf0]  ;;  %v1433_v7 = vor.u32 %v1629_v4, %v1432_v2  ;;  %v1424_v14 = vld [vmem:[%s2477_s1 + $0xe0] sm:$0xf]  ;;  %v1361_v16 = vor.u32 %v1611_v13, %v1360_v11 }
   0x4   :  { %v1497_v8 = vor.u32 %v1645_v6, %v1496_v5  ;;  %v1560_v9 = vld [vmem:[%s2477_s1 + $0x1f0] sm:$0xf]  ;;  %v1661_v10 = vld [vmem:[%s2477_s1 + $0x1f4] sm:$0xf0]  ;;  %655 = vmatpush.bf16.msra.mxu0 %v1369_v3  ;;  %v1627_v15 = vld [vmem:[%s2477_s1 + $0xe4] sm:$0xf0] }
   0x5   :  { %v1561_v12 = vor.u32 %v1661_v10, %v1560_v9  ;;  %704 = vmatpush.bf16.msra.mxu1 %v1433_v7  ;;  %v1425_v17 = vor.u32 %v1627_v15, %v1424_v14  ;;  %v1488_v18 = vld [vmem:[%s2477_s1 + $0x160] sm:$0xf]  ;;  %v1643_v19 = vld [vmem:[%s2477_s1 + $0x164] sm:$0xf0]  ;;  %v1352_v23 = vld [vmem:[%s2477_s1 + $0x50] sm:$0xf] }
   0x6   :  { %753 = vmatpush.bf16.msra.mxu2 %v1497_v8  ;;  %v1552_v20 = vld [vmem:[%s2477_s1 + $0x1e0] sm:$0xf]  ;;  %v1489_v21 = vor.u32 %v1643_v19, %v1488_v18  ;;  %v1659_v22 = vld [vmem:[%s2477_s1 + $0x1e4] sm:$0xf0]  ;;  %v1609_v24 = vld [vmem:[%s2477_s1 + $0x54] sm:$0xf0] }
   0x7   :  { %802 = vmatpush.bf16.msra.mxu3 %v1561_v12  ;;  %v1553_v25 = vor.u32 %v1659_v22, %v1552_v20  ;;  %v1416_v26 = vld [vmem:[%s2477_s1 + $0xd0] sm:$0xf]  ;;  %v1625_v27 = vld [vmem:[%s2477_s1 + $0xd4] sm:$0xf0]  ;;  %v1353_v29 = vor.u32 %v1609_v24, %v1352_v23  ;;  %v1344_v35 = vld [vmem:[%s2477_s1 + $0x40] sm:$0xf] }
   0x8   :  { %v1480_v28 = vld [vmem:[%s2477_s1 + $0x150] sm:$0xf]  ;;  %656 = vmatpush.bf16.msra.mxu0 %v1361_v16  ;;  %v1641_v30 = vld [vmem:[%s2477_s1 + $0x154] sm:$0xf0]  ;;  %v1417_v33 = vor.u32 %v1625_v27, %v1416_v26  ;;  %v1607_v36 = vld [vmem:[%s2477_s1 + $0x44] sm:$0xf0] }
   0x9   :  { %v1544_v31 = vld [vmem:[%s2477_s1 + $0x1d0] sm:$0xf]  ;;  %v1657_v32 = vld [vmem:[%s2477_s1 + $0x1d4] sm:$0xf0]  ;;  %705 = vmatpush.bf16.msra.mxu1 %v1425_v17  ;;  %v1481_v34 = vor.u32 %v1641_v30, %v1480_v28  ;;  %v1408_v37 = vld [vmem:[%s2477_s1 + $0xc0] sm:$0xf]  ;;  %v1345_v44 = vor.u32 %v1607_v36, %v1344_v35 }
   0xa   :  { %754 = vmatpush.bf16.msra.mxu2 %v1489_v21  ;;  %v1545_v38 = vor.u32 %v1657_v32, %v1544_v31  ;;  %v1623_v39 = vld [vmem:[%s2477_s1 + $0xc4] sm:$0xf0]  ;;  %v1472_v40 = vld [vmem:[%s2477_s1 + $0x140] sm:$0xf]  ;;  %v1336_v47 = vld [vmem:[%s2477_s1 + $0x30] sm:$0xf] }
   0xb   :  { %803 = vmatpush.bf16.msra.mxu3 %v1553_v25  ;;  %v1639_v41 = vld [vmem:[%s2477_s1 + $0x144] sm:$0xf0]  ;;  %v1536_v42 = vld [vmem:[%s2477_s1 + $0x1c0] sm:$0xf]  ;;  %v1409_v45 = vor.u32 %v1623_v39, %v1408_v37  ;;  %v1605_v48 = vld [vmem:[%s2477_s1 + $0x34] sm:$0xf0] }
   0xc   :  { %v1655_v43 = vld [vmem:[%s2477_s1 + $0x1c4] sm:$0xf0]  ;;  %657 = vmatpush.bf16.msra.mxu0 %v1353_v29  ;;  %v1473_v46 = vor.u32 %v1639_v41, %v1472_v40  ;;  %v1400_v49 = vld [vmem:[%s2477_s1 + $0xb0] sm:$0xf]  ;;  %v1621_v51 = vld [vmem:[%s2477_s1 + $0xb4] sm:$0xf0]  ;;  %v1337_v56 = vor.u32 %v1605_v48, %v1336_v47 }
   0xd   :  { %706 = vmatpush.bf16.msra.mxu1 %v1417_v33  ;;  %v1537_v50 = vor.u32 %v1655_v43, %v1536_v42  ;;  %v1464_v52 = vld [vmem:[%s2477_s1 + $0x130] sm:$0xf]  ;;  %v1637_v53 = vld [vmem:[%s2477_s1 + $0x134] sm:$0xf0]  ;;  %v1401_v57 = vor.u32 %v1621_v51, %v1400_v49  ;;  %v1328_v59 = vld [vmem:[%s2477_s1 + $0x20] sm:$0xf] }
   0xe   :  { %755 = vmatpush.bf16.msra.mxu2 %v1481_v34  ;;  %v1528_v54 = vld [vmem:[%s2477_s1 + $0x1b0] sm:$0xf]  ;;  %v1653_v55 = vld [vmem:[%s2477_s1 + $0x1b4] sm:$0xf0]  ;;  %v1465_v58 = vor.u32 %v1637_v53, %v1464_v52  ;;  %v1603_v60 = vld [vmem:[%s2477_s1 + $0x24] sm:$0xf0] }
   0xf   :  { %804 = vmatpush.bf16.msra.mxu3 %v1545_v38  ;;  %v1392_v61 = vld [vmem:[%s2477_s1 + $0xa0] sm:$0xf]  ;;  %v1529_v62 = vor.u32 %v1653_v55, %v1528_v54  ;;  %v1619_v63 = vld [vmem:[%s2477_s1 + $0xa4] sm:$0xf0]  ;;  %v1329_v4 = vor.u32 %v1603_v60, %v1328_v59  ;;  %v1320_v7 = vld [vmem:[%s2477_s1 + $0x10] sm:$0xf] }
  0x10   :  { %658 = vmatpush.bf16.msra.mxu0 %v1345_v44  ;;  %v1456_v0 = vld [vmem:[%s2477_s1 + $0x120] sm:$0xf]  ;;  %v1635_v1 = vld [vmem:[%s2477_s1 + $0x124] sm:$0xf0]  ;;  %v1393_v5 = vor.u32 %v1619_v63, %v1392_v61  ;;  %v1601_v8 = vld [vmem:[%s2477_s1 + $0x14] sm:$0xf0] }
  0x11   :  { %707 = vmatpush.bf16.msra.mxu1 %v1409_v45  ;;  %v1520_v2 = vld [vmem:[%s2477_s1 + $0x1a0] sm:$0xf]  ;;  %v1651_v3 = vld [vmem:[%s2477_s1 + $0x1a4] sm:$0xf0]  ;;  %v1457_v6 = vor.u32 %v1635_v1, %v1456_v0  ;;  %v1384_v9 = vld [vmem:[%s2477_s1 + $0x90] sm:$0xf]  ;;  %v1321_v17 = vor.u32 %v1601_v8, %v1320_v7 }
  0x12   :  { %756 = vmatpush.bf16.msra.mxu2 %v1473_v46  ;;  %v1521_v10 = vor.u32 %v1651_v3, %v1520_v2  ;;  %v1617_v11 = vld [vmem:[%s2477_s1 + $0x94] sm:$0xf0]  ;;  %v1448_v12 = vld [vmem:[%s2477_s1 + $0x110] sm:$0xf]  ;;  %v1312_v16 = vld [vmem:[%s2477_s1] sm:$0xf] }
  0x13   :  { %805 = vmatpush.bf16.msra.mxu3 %v1537_v50  ;;  %v1633_v13 = vld [vmem:[%s2477_s1 + $0x114] sm:$0xf0]  ;;  %v1512_v14 = vld [vmem:[%s2477_s1 + $0x190] sm:$0xf]  ;;  %v1599_v18 = vld [vmem:[%s2477_s1 + $0x4] sm:$0xf0]  ;;  %v1385_v21 = vor.u32 %v1617_v11, %v1384_v9 }
  0x14   :  { %659 = vmatpush.bf16.msra.mxu0 %v1337_v56  ;;  %v1649_v15 = vld [vmem:[%s2477_s1 + $0x194] sm:$0xf0]  ;;  %v1376_v19 = vld [vmem:[%s2477_s1 + $0x80] sm:$0xf]  ;;  %v1615_v20 = vld [vmem:[%s2477_s1 + $0x84] sm:$0xf0]  ;;  %v1449_v22 = vor.u32 %v1633_v13, %v1448_v12  ;;  %v1313_v34 = vor.u32 %v1599_v18, %v1312_v16 }
  0x15   :  { %708 = vmatpush.bf16.msra.mxu1 %v1401_v57  ;;  %v1440_v23 = vld [vmem:[%s2477_s1 + $0x100] sm:$0xf]  ;;  %v1631_v24 = vld [vmem:[%s2477_s1 + $0x104] sm:$0xf0]  ;;  %v1513_v26 = vor.u32 %v1649_v15, %v1512_v14  ;;  %v1568_v29 = vld [vmem:[%s2478_s0 + $0xc] sm:$0xf0]  ;;  %v1377_v38 = vor.u32 %v1615_v20, %v1376_v19 }
  0x16   :  { %757 = vmatpush.bf16.msra.mxu2 %v1465_v58  ;;  %v1504_v25 = vld [vmem:[%s2477_s1 + $0x180] sm:$0xf]  ;;  %v1647_v27 = vld [vmem:[%s2477_s1 + $0x184] sm:$0xf0]  ;;  %v1566_v30 = vld [vmem:[%s2478_s0 + $0x4] sm:$0xf]  ;;  %v1441_v39 = vor.u32 %v1631_v24, %v1440_v23 }
  0x17   :  { %806 = vmatpush.bf16.msra.mxu3 %v1529_v62  ;;  %v1184_v28 = vld [vmem:[%s2478_s0] sm:$0xf]  ;;  %v1186_v31 = vld [vmem:[%s2478_s0 + $0x10] sm:$0xf0]  ;;  %v1498_v33 = vld [vmem:[%s2477_s1 + $0x178] sm:$0xf0]  ;;  %v1505_v43 = vor.u32 %v1647_v27, %v1504_v25 }
  0x18   :  { %660 = vmatpush.bf16.msra.mxu0 %v1329_v4  ;;  %v1644_v32 = vld [vmem:[%s2477_s1 + $0x174] sm:$0xf]  ;;  %v1192_v35 = vld [vmem:[%s2478_s0 + $0x8] sm:$0xf]  ;;  %v1562_v37 = vld [vmem:[%s2477_s1 + $0x1f8] sm:$0xf0]  ;;  %v1914_v48 = vor.u32 %v1568_v29, %v1184_v28  ;;  %v1925_v53 = vor.u32 %v1566_v30, %v1186_v31 }
  0x19   :  { %709 = vmatpush.bf16.msra.mxu1 %v1393_v5  ;;  %v1660_v36 = vld [vmem:[%s2477_s1 + $0x1f4] sm:$0xf]  ;;  %v1569_v40 = vld [vmem:[%s2478_s0 + $0x14] sm:$0xf0]  ;;  %v1567_v41 = vld [vmem:[%s2478_s0 + $0xc] sm:$0xf]  ;;  %v1501_v44 = vor.u32 %v1644_v32, %v1498_v33 }
  0x1a   :  { %758 = vmatpush.bf16.msra.mxu2 %v1457_v6  ;;  %v1194_v42 = vld [vmem:[%s2478_s0 + $0x18] sm:$0xf0]  ;;  %v1612_v45 = vld [vmem:[%s2477_s1 + $0x74] sm:$0xf]  ;;  %v1565_v49 = vor.u32 %v1660_v36, %v1562_v37  ;;  %v1642_v51 = vld [vmem:[%s2477_s1 + $0x164] sm:$0xf]  ;;  %v1927_v54 = vor.u32 %v1569_v40, %v1192_v35 }
  0x1b   :  { %807 = vmatpush.bf16.msra.mxu3 %v1521_v10  ;;  %v1370_v46 = vld [vmem:[%s2477_s1 + $0x78] sm:$0xf0]  ;;  %v1628_v47 = vld [vmem:[%s2477_s1 + $0xf4] sm:$0xf]  ;;  %v1490_v52 = vld [vmem:[%s2477_s1 + $0x168] sm:$0xf0]  ;;  %v1935_v57 = vor.u32 %v1567_v41, %v1194_v42 }
  0x1c   :  { %661 = vmatpush.bf16.msra.mxu0 %v1321_v17  ;;  %v1434_v50 = vld [vmem:[%s2477_s1 + $0xf8] sm:$0xf0]  ;;  %v1658_v55 = vld [vmem:[%s2477_s1 + $0x1e4] sm:$0xf]  ;;  %v1554_v56 = vld [vmem:[%s2477_s1 + $0x1e8] sm:$0xf0]  ;;  %v1373_v58 = vor.u32 %v1612_v45, %v1370_v46  ;;  %v1493_v60 = vor.u32 %v1642_v51, %v1490_v52 }
  0x1d   :  { %710 = vmatpush.bf16.msra.mxu1 %v1385_v21  ;;  %v1437_v59 = vor.u32 %v1628_v47, %v1434_v50  ;;  %v1610_v61 = vld [vmem:[%s2477_s1 + $0x64] sm:$0xf]  ;;  %v1362_v62 = vld [vmem:[%s2477_s1 + $0x68] sm:$0xf0]  ;;  %v1557_v63 = vor.u32 %v1658_v55, %v1554_v56  ;;  %v1640_v3 = vld [vmem:[%s2477_s1 + $0x154] sm:$0xf] }
  0x1e   :  { %759 = vmatpush.bf16.msra.mxu2 %v1449_v22  ;;  %v1626_v0 = vld [vmem:[%s2477_s1 + $0xe4] sm:$0xf]  ;;  %v1426_v1 = vld [vmem:[%s2477_s1 + $0xe8] sm:$0xf0]  ;;  %v1365_v2 = vor.u32 %v1610_v61, %v1362_v62  ;;  %v1482_v4 = vld [vmem:[%s2477_s1 + $0x158] sm:$0xf0] }
  0x1f   :  { %808 = vmatpush.bf16.msra.mxu3 %v1513_v26  ;;  %v1656_v5 = vld [vmem:[%s2477_s1 + $0x1d4] sm:$0xf]  ;;  %v1429_v6 = vor.u32 %v1626_v0, %v1426_v1  ;;  %v1485_v7 = vor.u32 %v1640_v3, %v1482_v4  ;;  %v1546_v8 = vld [vmem:[%s2477_s1 + $0x1d8] sm:$0xf0]  ;;  %v1200_v16 = vld [vmem:[%s2478_s0 + $0x20] sm:$0xf] }
  0x20   :  { %662 = vmatpush.bf16.msra.mxu0 %v1313_v34  ;;  %v1608_v9 = vld [vmem:[%s2477_s1 + $0x54] sm:$0xf]  ;;  %v1354_v10 = vld [vmem:[%s2477_s1 + $0x58] sm:$0xf0]  ;;  %v1549_v11 = vor.u32 %v1656_v5, %v1546_v8  ;;  %v1572_v17 = vld [vmem:[%s2478_s0 + $0x2c] sm:$0xf0] }
  0x21   :  { %711 = vmatpush.bf16.msra.mxu1 %v1377_v38  ;;  %v1624_v12 = vld [vmem:[%s2477_s1 + $0xd4] sm:$0xf]  ;;  %v1418_v13 = vld [vmem:[%s2477_s1 + $0xd8] sm:$0xf0]  ;;  %v1357_v14 = vor.u32 %v1608_v9, %v1354_v10  ;;  %v1570_v18 = vld [vmem:[%s2478_s0 + $0x24] sm:$0xf]  ;;  %v2001_v24 = vor.u32 %v1572_v17, %v1200_v16 }
  0x22   :  { %760 = vmatpush.bf16.msra.mxu2 %v1441_v39  ;;  %v1421_v15 = vor.u32 %v1624_v12, %v1418_v13  ;;  %v1202_v19 = vld [vmem:[%s2478_s0 + $0x30] sm:$0xf0]  ;;  %v1208_v20 = vld [vmem:[%s2478_s0 + $0x28] sm:$0xf]  ;;  %v1573_v21 = vld [vmem:[%s2478_s0 + $0x34] sm:$0xf0] }
  0x23   :  { %809 = vmatpush.bf16.msra.mxu3 %v1505_v43  ;;  %663 = vmatmul.bf16.vlgmr.msra.gmra.mxu0 %v1914_v48  ;;  %v1571_v22 = vld [vmem:[%s2478_s0 + $0x2c] sm:$0xf]  ;;  %v1210_v23 = vld [vmem:[%s2478_s0 + $0x38] sm:$0xf0]  ;;  %v2003_v25 = vor.u32 %v1570_v18, %v1202_v19  ;;  %v2005_v26 = vor.u32 %v1573_v21, %v1208_v20  ;;  %v1638_v28 = vld [vmem:[%s2477_s1 + $0x144] sm:$0xf] }
  0x24   :  { %712 = vmatmul.bf16.vlgmr.msra.gmra.mxu1 %v1925_v53  ;;  %851 = vmatpush.bf16.msrb.mxu0 %v1373_v58  ;;  %v2007_v27 = vor.u32 %v1571_v22, %v1210_v23  ;;  %v1474_v29 = vld [vmem:[%s2477_s1 + $0x148] sm:$0xf0]  ;;  %v1654_v30 = vld [vmem:[%s2477_s1 + $0x1c4] sm:$0xf]  ;;  %v1216_v40 = vld [vmem:[%s2478_s0 + $0x40] sm:$0xf] }
  0x25   :  { %761 = vmatmul.bf16.vlgmr.msra.gmra.mxu2 %v1927_v54  ;;  %900 = vmatpush.bf16.msrb.mxu1 %v1437_v59  ;;  %v1477_v31 = vor.u32 %v1638_v28, %v1474_v29  ;;  %v1538_v32 = vld [vmem:[%s2477_s1 + $0x1c8] sm:$0xf0]  ;;  %v1606_v33 = vld [vmem:[%s2477_s1 + $0x44] sm:$0xf]  ;;  %v1576_v41 = vld [vmem:[%s2478_s0 + $0x4c] sm:$0xf0] }
  0x26   :  { %949 = vmatpush.bf16.msrb.mxu2 %v1501_v44  ;;  %810 = vmatmul.bf16.vlgmr.msra.gmra.mxu3 %v1935_v57  ;;  %v1346_v34 = vld [vmem:[%s2477_s1 + $0x48] sm:$0xf0]  ;;  %v1541_v35 = vor.u32 %v1654_v30, %v1538_v32  ;;  %v1622_v37 = vld [vmem:[%s2477_s1 + $0xc4] sm:$0xf]  ;;  %v1218_v43 = vld [vmem:[%s2478_s0 + $0x50] sm:$0xf0] }
  0x27   :  { %998 = vmatpush.bf16.msrb.mxu3 %v1565_v49  ;;  %v1349_v36 = vor.u32 %v1606_v33, %v1346_v34  ;;  %v1410_v38 = vld [vmem:[%s2477_s1 + $0xc8] sm:$0xf0]  ;;  %v1574_v42 = vld [vmem:[%s2478_s0 + $0x44] sm:$0xf]  ;;  %v1224_v44 = vld [vmem:[%s2478_s0 + $0x48] sm:$0xf]  ;;  %v2061_v49 = vor.u32 %v1576_v41, %v1216_v40 }
  0x28   :  { %852 = vmatpush.bf16.msrb.mxu0 %v1365_v2  ;;  %v1413_v39 = vor.u32 %v1622_v37, %v1410_v38  ;;  %v1577_v45 = vld [vmem:[%s2478_s0 + $0x54] sm:$0xf0]  ;;  %v1575_v46 = vld [vmem:[%s2478_s0 + $0x4c] sm:$0xf]  ;;  %v1226_v47 = vld [vmem:[%s2478_s0 + $0x58] sm:$0xf0]  ;;  %v2063_v50 = vor.u32 %v1574_v42, %v1218_v43 }
  0x29   :  { %901 = vmatpush.bf16.msrb.mxu1 %v1429_v6  ;;  %v2065_v51 = vor.u32 %v1577_v45, %v1224_v44  ;;  %v2067_v52 = vor.u32 %v1575_v46, %v1226_v47  ;;  %v1636_v55 = vld [vmem:[%s2477_s1 + $0x134] sm:$0xf]  ;;  %v1466_v56 = vld [vmem:[%s2477_s1 + $0x138] sm:$0xf0]  ;;  %v1232_v4 = vld [vmem:[%s2478_s0 + $0x60] sm:$0xf] }
  0x2a   :  { %950 = vmatpush.bf16.msrb.mxu2 %v1493_v60  ;;  %v1652_v58 = vld [vmem:[%s2477_s1 + $0x1b4] sm:$0xf]  ;;  %v1469_v59 = vor.u32 %v1636_v55, %v1466_v56  ;;  %v1530_v60 = vld [vmem:[%s2477_s1 + $0x1b8] sm:$0xf0]  ;;  %v1580_v5 = vld [vmem:[%s2478_s0 + $0x6c] sm:$0xf0] }
  0x2b   :  { %999 = vmatpush.bf16.msrb.mxu3 %v1557_v63  ;;  %v1604_v61 = vld [vmem:[%s2477_s1 + $0x34] sm:$0xf]  ;;  %v1338_v62 = vld [vmem:[%s2477_s1 + $0x38] sm:$0xf0]  ;;  %v1533_v63 = vor.u32 %v1652_v58, %v1530_v60  ;;  %v1578_v6 = vld [vmem:[%s2478_s0 + $0x64] sm:$0xf]  ;;  %v2121_v12 = vor.u32 %v1580_v5, %v1232_v4 }
  0x2c   :  { %853 = vmatpush.bf16.msrb.mxu0 %v1357_v14  ;;  %v1341_v0 = vor.u32 %v1604_v61, %v1338_v62  ;;  %v1620_v1 = vld [vmem:[%s2477_s1 + $0xb4] sm:$0xf]  ;;  %v1402_v2 = vld [vmem:[%s2477_s1 + $0xb8] sm:$0xf0]  ;;  %v1240_v8 = vld [vmem:[%s2478_s0 + $0x68] sm:$0xf] }
  0x2d   :  { %902 = vmatpush.bf16.msrb.mxu1 %v1421_v15  ;;  %v1405_v3 = vor.u32 %v1620_v1, %v1402_v2  ;;  %v1581_v9 = vld [vmem:[%s2478_s0 + $0x74] sm:$0xf0]  ;;  %v1579_v10 = vld [vmem:[%s2478_s0 + $0x6c] sm:$0xf]  ;;  %v1634_v16 = vld [vmem:[%s2477_s1 + $0x124] sm:$0xf] }
  0x2e   :  { %951 = vmatpush.bf16.msrb.mxu2 %v1485_v7  ;;  %v1234_v7 = vld [vmem:[%s2478_s0 + $0x70] sm:$0xf0]  ;;  %v2125_v14 = vor.u32 %v1581_v9, %v1240_v8  ;;  %v1458_v17 = vld [vmem:[%s2477_s1 + $0x128] sm:$0xf0]  ;;  %v1650_v18 = vld [vmem:[%s2477_s1 + $0x1a4] sm:$0xf] }
  0x2f   :  { %1000 = vmatpush.bf16.msrb.mxu3 %v1549_v11  ;;  %v1242_v11 = vld [vmem:[%s2478_s0 + $0x78] sm:$0xf0]  ;;  %v2123_v13 = vor.u32 %v1578_v6, %v1234_v7  ;;  %v1461_v19 = vor.u32 %v1634_v16, %v1458_v17  ;;  %v1522_v20 = vld [vmem:[%s2477_s1 + $0x1a8] sm:$0xf0]  ;;  %v1602_v21 = vld [vmem:[%s2477_s1 + $0x24] sm:$0xf] }
  0x30   :  { %854 = vmatpush.bf16.msrb.mxu0 %v1349_v36  ;;  %v2127_v15 = vor.u32 %v1579_v10, %v1242_v11  ;;  %v1330_v22 = vld [vmem:[%s2477_s1 + $0x28] sm:$0xf0]  ;;  %v1525_v23 = vor.u32 %v1650_v18, %v1522_v20  ;;  %v1618_v29 = vld [vmem:[%s2477_s1 + $0xa4] sm:$0xf]  ;;  %v1248_v32 = vld [vmem:[%s2478_s0 + $0x80] sm:$0xf] }
  0x31   :  { %903 = vmatpush.bf16.msrb.mxu1 %v1413_v39  ;;  %v1333_v28 = vor.u32 %v1602_v21, %v1330_v22  ;;  %v1394_v30 = vld [vmem:[%s2477_s1 + $0xa8] sm:$0xf0]  ;;  %v1584_v33 = vld [vmem:[%s2478_s0 + $0x8c] sm:$0xf0]  ;;  %v1582_v34 = vld [vmem:[%s2478_s0 + $0x84] sm:$0xf] }
  0x32   :  { %952 = vmatpush.bf16.msrb.mxu2 %v1477_v31  ;;  %v1397_v31 = vor.u32 %v1618_v29, %v1394_v30  ;;  %v1256_v36 = vld [vmem:[%s2478_s0 + $0x88] sm:$0xf]  ;;  %v1585_v37 = vld [vmem:[%s2478_s0 + $0x94] sm:$0xf0]  ;;  %v1583_v38 = vld [vmem:[%s2478_s0 + $0x8c] sm:$0xf]  ;;  %v2181_v40 = vor.u32 %v1584_v33, %v1248_v32 }
  0x33   :  { %668 = vmatmul.bf16.gmra.mxu0 %v2001_v24  ;;  %1001 = vmatpush.bf16.msrb.mxu3 %v1541_v35  ;;  %v1250_v35 = vld [vmem:[%s2478_s0 + $0x90] sm:$0xf0]  ;;  %v1258_v39 = vld [vmem:[%s2478_s0 + $0x98] sm:$0xf0]  ;;  %v2185_v42 = vor.u32 %v1585_v37, %v1256_v36  ;;  %v1588_v1 = vld [vmem:[%s2478_s0 + $0xac] sm:$0xf0] }
  0x34   :  { %717 = vmatmul.bf16.gmra.mxu1 %v2003_v25  ;;  %855 = vmatpush.bf16.msrb.mxu0 %v1341_v0  ;;  %v2183_v41 = vor.u32 %v1582_v34, %v1250_v35  ;;  %v2187_v43 = vor.u32 %v1583_v38, %v1258_v39  ;;  %v1632_v44 = vld [vmem:[%s2477_s1 + $0x114] sm:$0xf]  ;;  %v1450_v45 = vld [vmem:[%s2477_s1 + $0x118] sm:$0xf0]  ;;  %v1264_v0 = vld [vmem:[%s2478_s0 + $0xa0] sm:$0xf] }
  0x35   :  { %766 = vmatmul.bf16.gmra.mxu2 %v2005_v26  ;;  %904 = vmatpush.bf16.msrb.mxu1 %v1405_v3  ;;  %v1648_v46 = vld [vmem:[%s2477_s1 + $0x194] sm:$0xf]  ;;  %v1453_v47 = vor.u32 %v1632_v44, %v1450_v45  ;;  %v1514_v55 = vld [vmem:[%s2477_s1 + $0x198] sm:$0xf0]  ;;  %v1586_v2 = vld [vmem:[%s2478_s0 + $0xa4] sm:$0xf]  ;;  %v2241_v8 = vor.u32 %v1588_v1, %v1264_v0 }
  0x36   :  { %815 = vmatmul.bf16.gmra.mxu3 %v2007_v27  ;;  %953 = vmatpush.bf16.msrb.mxu2 %v1469_v59  ;;  %v1600_v56 = vld [vmem:[%s2477_s1 + $0x14] sm:$0xf]  ;;  %v1322_v58 = vld [vmem:[%s2477_s1 + $0x18] sm:$0xf0]  ;;  %v1517_v59 = vor.u32 %v1648_v46, %v1514_v55  ;;  %v1272_v4 = vld [vmem:[%s2478_s0 + $0xa8] sm:$0xf] }
  0x37   :  { %1002 = vmatpush.bf16.msrb.mxu3 %v1533_v63  ;;  %v1325_v60 = vor.u32 %v1600_v56, %v1322_v58  ;;  %v1616_v61 = vld [vmem:[%s2477_s1 + $0x94] sm:$0xf]  ;;  %v1386_v62 = vld [vmem:[%s2477_s1 + $0x98] sm:$0xf0]  ;;  %v1589_v5 = vld [vmem:[%s2478_s0 + $0xb4] sm:$0xf0] }
  0x38   :  { %856 = vmatpush.bf16.msrb.mxu0 %v1333_v28  ;;  %v1389_v63 = vor.u32 %v1616_v61, %v1386_v62  ;;  %v1266_v3 = vld [vmem:[%s2478_s0 + $0xb0] sm:$0xf0]  ;;  %v1587_v6 = vld [vmem:[%s2478_s0 + $0xac] sm:$0xf]  ;;  %v1274_v7 = vld [vmem:[%s2478_s0 + $0xb8] sm:$0xf0]  ;;  %v2245_v10 = vor.u32 %v1589_v5, %v1272_v4 }
  0x39   :  { %905 = vmatpush.bf16.msrb.mxu1 %v1397_v31  ;;  %v2243_v9 = vor.u32 %v1586_v2, %v1266_v3  ;;  %v2247_v11 = vor.u32 %v1587_v6, %v1274_v7  ;;  %v1630_v16 = vld [vmem:[%s2477_s1 + $0x104] sm:$0xf]  ;;  %v1442_v17 = vld [vmem:[%s2477_s1 + $0x108] sm:$0xf0]  ;;  %v1280_v32 = vld [vmem:[%s2478_s0 + $0xc0] sm:$0xf] }
  0x3a   :  { %954 = vmatpush.bf16.msrb.mxu2 %v1461_v19  ;;  %v1646_v18 = vld [vmem:[%s2477_s1 + $0x184] sm:$0xf]  ;;  %v1445_v19 = vor.u32 %v1630_v16, %v1442_v17  ;;  %v1506_v20 = vld [vmem:[%s2477_s1 + $0x188] sm:$0xf0]  ;;  %v1592_v33 = vld [vmem:[%s2478_s0 + $0xcc] sm:$0xf0] }
  0x3b   :  { %1003 = vmatpush.bf16.msrb.mxu3 %v1525_v23  ;;  %v1598_v21 = vld [vmem:[%s2477_s1 + $0x4] sm:$0xf]  ;;  %v1314_v22 = vld [vmem:[%s2477_s1 + $0x8] sm:$0xf0]  ;;  %v1509_v23 = vor.u32 %v1646_v18, %v1506_v20  ;;  %v1282_v35 = vld [vmem:[%s2478_s0 + $0xd0] sm:$0xf0]  ;;  %v2301_v44 = vor.u32 %v1592_v33, %v1280_v32 }
  0x3c   :  { %857 = vmatpush.bf16.msrb.mxu0 %v1325_v60  ;;  %v1317_v28 = vor.u32 %v1598_v21, %v1314_v22  ;;  %v1614_v29 = vld [vmem:[%s2477_s1 + $0x84] sm:$0xf]  ;;  %v1378_v30 = vld [vmem:[%s2477_s1 + $0x88] sm:$0xf0]  ;;  %v1288_v36 = vld [vmem:[%s2478_s0 + $0xc8] sm:$0xf] }
  0x3d   :  { %906 = vmatpush.bf16.msrb.mxu1 %v1389_v63  ;;  %v1381_v31 = vor.u32 %v1614_v29, %v1378_v30  ;;  %v1590_v34 = vld [vmem:[%s2478_s0 + $0xc4] sm:$0xf]  ;;  %v1593_v37 = vld [vmem:[%s2478_s0 + $0xd4] sm:$0xf0]  ;;  %v1591_v38 = vld [vmem:[%s2478_s0 + $0xcc] sm:$0xf] }
  0x3e   :  { %955 = vmatpush.bf16.msrb.mxu2 %v1453_v47  ;;  %v1290_v39 = vld [vmem:[%s2478_s0 + $0xd8] sm:$0xf0]  ;;  %v2303_v45 = vor.u32 %v1590_v34, %v1282_v35  ;;  %v2305_v46 = vor.u32 %v1593_v37, %v1288_v36  ;;  %v1296_v55 = vld [vmem:[%s2478_s0 + $0xe0] sm:$0xf]  ;;  %v1596_v56 = vld [vmem:[%s2478_s0 + $0xec] sm:$0xf0] }
  0x3f   :  { %1004 = vmatpush.bf16.msrb.mxu3 %v1517_v59  ;;  %v2307_v47 = vor.u32 %v1591_v38, %v1290_v39  ;;  %v1594_v58 = vld [vmem:[%s2478_s0 + $0xe4] sm:$0xf]  ;;  %v1298_v59 = vld [vmem:[%s2478_s0 + $0xf0] sm:$0xf0]  ;;  %v1304_v60 = vld [vmem:[%s2478_s0 + $0xe8] sm:$0xf]  ;;  %v2337_v0 = vor.u32 %v1596_v56, %v1296_v55 }
  0x40   :  { %858 = vmatpush.bf16.msrb.mxu0 %v1317_v28  ;;  %v1597_v61 = vld [vmem:[%s2478_s0 + $0xf4] sm:$0xf0]  ;;  %v1595_v62 = vld [vmem:[%s2478_s0 + $0xec] sm:$0xf]  ;;  %v1306_v63 = vld [vmem:[%s2478_s0 + $0xf8] sm:$0xf0]  ;;  %v2339_v1 = vor.u32 %v1594_v58, %v1298_v59 }
  0x41   :  { %907 = vmatpush.bf16.msrb.mxu1 %v1381_v31  ;;  %v2341_v2 = vor.u32 %v1597_v61, %v1304_v60  ;;  %v2343_v3 = vor.u32 %v1595_v62, %v1306_v63 }
  0x42   :  { %956 = vmatpush.bf16.msrb.mxu2 %v1445_v19 }
  0x43   :  { %673 = vmatmul.bf16.gmra.mxu0 %v2061_v49  ;;  %1005 = vmatpush.bf16.msrb.mxu3 %v1509_v23 }
  0x44   :  { %722 = vmatmul.bf16.gmra.mxu1 %v2063_v50 }
  0x45   :  { %771 = vmatmul.bf16.gmra.mxu2 %v2065_v51 }
  0x46   :  { %820 = vmatmul.bf16.gmra.mxu3 %v2067_v52 }
  0x53   :  { %678 = vmatmul.bf16.gmra.mxu0 %v2121_v12 }
  0x54   :  { %727 = vmatmul.bf16.gmra.mxu1 %v2123_v13 }
  0x55   :  { %776 = vmatmul.bf16.gmra.mxu2 %v2125_v14 }
  0x56   :  { %825 = vmatmul.bf16.gmra.mxu3 %v2127_v15 }
  0x63   :  { %683 = vmatmul.bf16.gmra.mxu0 %v2181_v40 }
  0x64   :  { %732 = vmatmul.bf16.gmra.mxu1 %v2183_v41 }
  0x65   :  { %781 = vmatmul.bf16.gmra.mxu2 %v2185_v42 }
  0x66   :  { %830 = vmatmul.bf16.gmra.mxu3 %v2187_v43 }
  0x73   :  { %688 = vmatmul.bf16.gmra.mxu0 %v2241_v8 }
  0x74   :  { %737 = vmatmul.bf16.gmra.mxu1 %v2243_v9 }
  0x75   :  { %786 = vmatmul.bf16.gmra.mxu2 %v2245_v10 }
  0x76   :  { %835 = vmatmul.bf16.gmra.mxu3 %v2247_v11 }
  0x83   :  { %693 = vmatmul.bf16.gmra.mxu0 %v2301_v44 }
  0x84   :  { %742 = vmatmul.bf16.gmra.mxu1 %v2303_v45 }
  0x85   :  { %791 = vmatmul.bf16.gmra.mxu2 %v2305_v46 }
  0x86   :  { %840 = vmatmul.bf16.gmra.mxu3 %v2307_v47 }
  0x93   :  { %698 = vmatmul.bf16.gmra.mxu0 %v2337_v0 }
  0x94   :  { %747 = vmatmul.bf16.gmra.mxu1 %v2339_v1 }
  0x95   :  { %796 = vmatmul.bf16.gmra.mxu2 %v2341_v2 }
  0x96   :  { %845 = vmatmul.bf16.gmra.mxu3 %v2343_v3 }
  0xa0   :  { %v664_v4 = vpop.f32.mrf.mxu0 }
  0xa1   :  { %v713_v5 = vpop.f32.mrf.mxu1 }
  0xa2   :  { %v714_v6 = vadd.f32 %v713_v5, %v664_v4 }
  0xa3   :  { %859 = vmatmul.bf16.vlgmr.msrb.gmra.mxu0 %v1914_v48 }
  0xa4   :  { %908 = vmatmul.bf16.vlgmr.msrb.gmra.mxu1 %v1925_v53 }
  0xa5   :  { %957 = vmatmul.bf16.vlgmr.msrb.gmra.mxu2 %v1927_v54 }
  0xa6   :  { %1006 = vmatmul.bf16.vlgmr.msrb.gmra.mxu3 %v1935_v57 }
  0xa8   :  { %v762_v7 = vpop.f32.mrf.mxu2  ;;  %v666_v18 = vpop.f32.mrf.mxu0 }
  0xa9   :  { %v763_v16 = vadd.f32 %v762_v7, %v714_v6  ;;  %v811_v17 = vpop.f32.mrf.mxu3  ;;  %v715_v19 = vpop.f32.mrf.mxu1 }
  0xaa   :  { %v716_v21 = vadd.f32 %v715_v19, %v666_v18 }
  0xab   :  { %v2353_v20 = vadd.f32 %v811_v17, %v763_v16 }
  0xb0   :  { %v764_v22 = vpop.f32.mrf.mxu2  ;;  %v669_v29 = vpop.f32.mrf.mxu0 }
  0xb1   :  { %v765_v23 = vadd.f32 %v764_v22, %v716_v21  ;;  %v813_v28 = vpop.f32.mrf.mxu3  ;;  %v718_v30 = vpop.f32.mrf.mxu1 }
  0xb2   :  { %v719_v53 = vadd.f32 %v718_v30, %v669_v29 }
  0xb3   :  { %v2355_v48 = vadd.f32 %v813_v28, %v765_v23  ;;  %864 = vmatmul.bf16.gmra.mxu0 %v2001_v24 }
  0xb4   :  { %913 = vmatmul.bf16.gmra.mxu1 %v2003_v25 }
  0xb5   :  { %962 = vmatmul.bf16.gmra.mxu2 %v2005_v26 }
  0xb6   :  { %1011 = vmatmul.bf16.gmra.mxu3 %v2007_v27 }
  0xb8   :  { %v767_v54 = vpop.f32.mrf.mxu2  ;;  %v671_v32 = vpop.f32.mrf.mxu0 }
  0xb9   :  { %v768_v57 = vadd.f32 %v767_v54, %v719_v53  ;;  %v816_v31 = vpop.f32.mrf.mxu3  ;;  %v720_v33 = vpop.f32.mrf.mxu1 }
  0xba   :  { %v721_v35 = vadd.f32 %v720_v33, %v671_v32 }
  0xbb   :  { %v2361_v34 = vadd.f32 %v816_v31, %v768_v57 }
  0xc0   :  { %v769_v36 = vpop.f32.mrf.mxu2  ;;  %v674_v39 = vpop.f32.mrf.mxu0 }
  0xc1   :  { %v770_v37 = vadd.f32 %v769_v36, %v721_v35  ;;  %v818_v38 = vpop.f32.mrf.mxu3  ;;  %v723_v55 = vpop.f32.mrf.mxu1 }
  0xc2   :  { %v724_v25 = vadd.f32 %v723_v55, %v674_v39 }
  0xc3   :  { %v2363_v24 = vadd.f32 %v818_v38, %v770_v37  ;;  %869 = vmatmul.bf16.gmra.mxu0 %v2061_v49 }
  0xc4   :  { %918 = vmatmul.bf16.gmra.mxu1 %v2063_v50 }
  0xc5   :  { %967 = vmatmul.bf16.gmra.mxu2 %v2065_v51 }
  0xc6   :  { %1016 = vmatmul.bf16.gmra.mxu3 %v2067_v52 }
  0xc8   :  { %v772_v26 = vpop.f32.mrf.mxu2  ;;  %v676_v58 = vpop.f32.mrf.mxu0 }
  0xc9   :  { %v773_v27 = vadd.f32 %v772_v26, %v724_v25  ;;  %v821_v56 = vpop.f32.mrf.mxu3  ;;  %v725_v59 = vpop.f32.mrf.mxu1 }
  0xca   :  { %v726_v61 = vadd.f32 %v725_v59, %v676_v58 }
  0xcb   :  { %v2369_v60 = vadd.f32 %v821_v56, %v773_v27 }
  0xd0   :  { %v774_v62 = vpop.f32.mrf.mxu2  ;;  %v679_v5 = vpop.f32.mrf.mxu0 }
  0xd1   :  { %v775_v63 = vadd.f32 %v774_v62, %v726_v61  ;;  %v823_v4 = vpop.f32.mrf.mxu3  ;;  %v728_v6 = vpop.f32.mrf.mxu1 }
  0xd2   :  { %v729_v50 = vadd.f32 %v728_v6, %v679_v5 }
  0xd3   :  { %v2371_v49 = vadd.f32 %v823_v4, %v775_v63  ;;  %874 = vmatmul.bf16.gmra.mxu0 %v2121_v12 }
  0xd4   :  { %923 = vmatmul.bf16.gmra.mxu1 %v2123_v13 }
  0xd5   :  { %972 = vmatmul.bf16.gmra.mxu2 %v2125_v14 }
  0xd6   :  { %1021 = vmatmul.bf16.gmra.mxu3 %v2127_v15 }
  0xd8   :  { %v777_v51 = vpop.f32.mrf.mxu2  ;;  %v681_v16 = vpop.f32.mrf.mxu0 }
  0xd9   :  { %v778_v52 = vadd.f32 %v777_v51, %v729_v50  ;;  %v826_v7 = vpop.f32.mrf.mxu3  ;;  %v730_v17 = vpop.f32.mrf.mxu1 }
  0xda   :  { %v731_v19 = vadd.f32 %v730_v17, %v681_v16 }
  0xdb   :  { %v2377_v18 = vadd.f32 %v826_v7, %v778_v52 }
  0xe0   :  { %v779_v21 = vpop.f32.mrf.mxu2  ;;  %v684_v28 = vpop.f32.mrf.mxu0 }
  0xe1   :  { %v780_v22 = vadd.f32 %v779_v21, %v731_v19  ;;  %v828_v23 = vpop.f32.mrf.mxu3  ;;  %v733_v29 = vpop.f32.mrf.mxu1 }
  0xe2   :  { %v734_v13 = vadd.f32 %v733_v29, %v684_v28 }
  0xe3   :  { %v2379_v12 = vadd.f32 %v828_v23, %v780_v22  ;;  %879 = vmatmul.bf16.gmra.mxu0 %v2181_v40 }
  0xe4   :  { %928 = vmatmul.bf16.gmra.mxu1 %v2183_v41 }
  0xe5   :  { %977 = vmatmul.bf16.gmra.mxu2 %v2185_v42 }
  0xe6   :  { %1026 = vmatmul.bf16.gmra.mxu3 %v2187_v43 }
  0xe8   :  { %v782_v14 = vpop.f32.mrf.mxu2  ;;  %v686_v53 = vpop.f32.mrf.mxu0 }
  0xe9   :  { %v783_v15 = vadd.f32 %v782_v14, %v734_v13  ;;  %v831_v30 = vpop.f32.mrf.mxu3  ;;  %v735_v54 = vpop.f32.mrf.mxu1 }
  0xea   :  { %v736_v31 = vadd.f32 %v735_v54, %v686_v53 }
  0xeb   :  { %v2385_v57 = vadd.f32 %v831_v30, %v783_v15 }
  0xf0   :  { %v784_v32 = vpop.f32.mrf.mxu2  ;;  %v689_v36 = vpop.f32.mrf.mxu0 }
  0xf1   :  { %v785_v33 = vadd.f32 %v784_v32, %v736_v31  ;;  %v833_v35 = vpop.f32.mrf.mxu3  ;;  %v738_v37 = vpop.f32.mrf.mxu1 }
  0xf2   :  { %v739_v41 = vadd.f32 %v738_v37, %v689_v36 }
  0xf3   :  { %v2387_v40 = vadd.f32 %v833_v35, %v785_v33  ;;  %884 = vmatmul.bf16.gmra.mxu0 %v2241_v8 }
  0xf4   :  { %933 = vmatmul.bf16.gmra.mxu1 %v2243_v9 }
  0xf5   :  { %982 = vmatmul.bf16.gmra.mxu2 %v2245_v10 }
  0xf6   :  { %1031 = vmatmul.bf16.gmra.mxu3 %v2247_v11 }
  0xf8   :  { %v787_v42 = vpop.f32.mrf.mxu2  ;;  %v691_v39 = vpop.f32.mrf.mxu0 }
  0xf9   :  { %v788_v43 = vadd.f32 %v787_v42, %v739_v41  ;;  %v836_v38 = vpop.f32.mrf.mxu3  ;;  %v740_v55 = vpop.f32.mrf.mxu1 }
  0xfa   :  { %v741_v26 = vadd.f32 %v740_v55, %v691_v39 }
  0xfb   :  { %v2393_v25 = vadd.f32 %v836_v38, %v788_v43 }
 0x100   :  { %v789_v27 = vpop.f32.mrf.mxu2  ;;  %v694_v59 = vpop.f32.mrf.mxu0 }
 0x101   :  { %v790_v56 = vadd.f32 %v789_v27, %v741_v26  ;;  %v838_v58 = vpop.f32.mrf.mxu3  ;;  %v743_v61 = vpop.f32.mrf.mxu1 }
 0x102   :  { %v744_v9 = vadd.f32 %v743_v61, %v694_v59 }
 0x103   :  { %v2395_v8 = vadd.f32 %v838_v58, %v790_v56  ;;  %889 = vmatmul.bf16.gmra.mxu0 %v2301_v44 }
 0x104   :  { %938 = vmatmul.bf16.gmra.mxu1 %v2303_v45 }
 0x105   :  { %987 = vmatmul.bf16.gmra.mxu2 %v2305_v46 }
 0x106   :  { %1036 = vmatmul.bf16.gmra.mxu3 %v2307_v47 }
 0x108   :  { %v792_v10 = vpop.f32.mrf.mxu2  ;;  %v696_v63 = vpop.f32.mrf.mxu0 }
 0x109   :  { %v793_v11 = vadd.f32 %v792_v10, %v744_v9  ;;  %v841_v62 = vpop.f32.mrf.mxu3  ;;  %v745_v4 = vpop.f32.mrf.mxu1 }
 0x10a   :  { %v746_v6 = vadd.f32 %v745_v4, %v696_v63 }
 0x10b   :  { %v2401_v5 = vadd.f32 %v841_v62, %v793_v11 }
 0x110   :  { %v794_v50 = vpop.f32.mrf.mxu2  ;;  %v699_v7 = vpop.f32.mrf.mxu0 }
 0x111   :  { %v795_v51 = vadd.f32 %v794_v50, %v746_v6  ;;  %v843_v52 = vpop.f32.mrf.mxu3  ;;  %v748_v16 = vpop.f32.mrf.mxu1 }
 0x112   :  { %v749_v45 = vadd.f32 %v748_v16, %v699_v7 }
 0x113   :  { %v2403_v44 = vadd.f32 %v843_v52, %v795_v51  ;;  %894 = vmatmul.bf16.gmra.mxu0 %v2337_v0 }
 0x114   :  { %943 = vmatmul.bf16.gmra.mxu1 %v2339_v1 }
 0x115   :  { %992 = vmatmul.bf16.gmra.mxu2 %v2341_v2 }
 0x116   :  { %1041 = vmatmul.bf16.gmra.mxu3 %v2343_v3 }
 0x118   :  { %v797_v46 = vpop.f32.mrf.mxu2  ;;  %v701_v19 = vpop.f32.mrf.mxu0 }
 0x119   :  { %v798_v47 = vadd.f32 %v797_v46, %v749_v45  ;;  %v846_v17 = vpop.f32.mrf.mxu3  ;;  %v750_v21 = vpop.f32.mrf.mxu1 }
 0x11a   :  { %v751_v23 = vadd.f32 %v750_v21, %v701_v19 }
 0x11b   :  { %v2409_v22 = vadd.f32 %v846_v17, %v798_v47 }
 0x120   :  { %v799_v28 = vpop.f32.mrf.mxu2  ;;  %v860_v14 = vpop.f32.mrf.mxu0 }
 0x121   :  { %v800_v29 = vadd.f32 %v799_v28, %v751_v23  ;;  %v848_v13 = vpop.f32.mrf.mxu3  ;;  %v909_v15 = vpop.f32.mrf.mxu1 }
 0x122   :  { %v910_v1 = vadd.f32 %v909_v15, %v860_v14 }
 0x123   :  { %v2411_v0 = vadd.f32 %v848_v13, %v800_v29 }
 0x128   :  { %v958_v30 = vpop.f32.mrf.mxu2  ;;  %v862_v3 = vpop.f32.mrf.mxu0 }
 0x129   :  { %v959_v2 = vadd.f32 %v958_v30, %v910_v1  ;;  %v1007_v53 = vpop.f32.mrf.mxu3  ;;  %v911_v54 = vpop.f32.mrf.mxu1 }
 0x12a   :  { %v912_v33 = vadd.f32 %v911_v54, %v862_v3 }
 0x12b   :  { %v1008_v31 = vadd.f32 %v1007_v53, %v959_v2 }
 0x12d   :  { %v1146_v32 = vpack.c.bf16 %v1008_v31, %v2353_v20 }
 0x12f   :  { %1162 = vst [vmem:[%s2479_s2] sm:$0xff] %v1146_v32 }
 0x130   :  { %v960_v35 = vpop.f32.mrf.mxu2  ;;  %v865_v41 = vpop.f32.mrf.mxu0 }
 0x131   :  { %v961_v36 = vadd.f32 %v960_v35, %v912_v33  ;;  %v1009_v37 = vpop.f32.mrf.mxu3  ;;  %v914_v42 = vpop.f32.mrf.mxu1 }
 0x132   :  { %v915_v39 = vadd.f32 %v914_v42, %v865_v41 }
 0x133   :  { %v1010_v43 = vadd.f32 %v1009_v37, %v961_v36 }
 0x135   :  { %v1147_v38 = vpack.c.bf16 %v1010_v43, %v2355_v48 }
 0x137   :  { %1163 = vst [vmem:[%s2479_s2 + $0x8] sm:$0xff] %v1147_v38 }
 0x138   :  { %v963_v55 = vpop.f32.mrf.mxu2  ;;  %v867_v27 = vpop.f32.mrf.mxu0 }
 0x139   :  { %v964_v20 = vadd.f32 %v963_v55, %v915_v39  ;;  %v1012_v26 = vpop.f32.mrf.mxu3  ;;  %v916_v56 = vpop.f32.mrf.mxu1 }
 0x13a   :  { %v917_v61 = vadd.f32 %v916_v56, %v867_v27 }
 0x13b   :  { %v1013_v58 = vadd.f32 %v1012_v26, %v964_v20 }
 0x13d   :  { %v1148_v59 = vpack.c.bf16 %v1013_v58, %v2361_v34 }
 0x13f   :  { %1164 = vst [vmem:[%s2479_s2 + $0x10] sm:$0xff] %v1148_v59 }
 0x140   :  { %v965_v9 = vpop.f32.mrf.mxu2  ;;  %v870_v11 = vpop.f32.mrf.mxu0 }
 0x141   :  { %v966_v48 = vadd.f32 %v965_v9, %v917_v61  ;;  %v1014_v10 = vpop.f32.mrf.mxu3  ;;  %v919_v62 = vpop.f32.mrf.mxu1 }
 0x142   :  { %v920_v6 = vadd.f32 %v919_v62, %v870_v11 }
 0x143   :  { %v1015_v63 = vadd.f32 %v1014_v10, %v966_v48 }
 0x145   :  { %v1149_v4 = vpack.c.bf16 %v1015_v63, %v2363_v24 }
 0x147   :  { %1165 = vst [vmem:[%s2479_s2 + $0x18] sm:$0xff] %v1149_v4 }
 0x148   :  { %v968_v50 = vpop.f32.mrf.mxu2  ;;  %v872_v52 = vpop.f32.mrf.mxu0 }
 0x149   :  { %v969_v34 = vadd.f32 %v968_v50, %v920_v6  ;;  %v1017_v51 = vpop.f32.mrf.mxu3  ;;  %v921_v7 = vpop.f32.mrf.mxu1 }
 0x14a   :  { %v922_v46 = vadd.f32 %v921_v7, %v872_v52 }
 0x14b   :  { %v1018_v16 = vadd.f32 %v1017_v51, %v969_v34 }
 0x14d   :  { %v1150_v45 = vpack.c.bf16 %v1018_v16, %v2369_v60 }
 0x14f   :  { %1166 = vst [vmem:[%s2479_s2 + $0x20] sm:$0xff] %v1150_v45 }
 0x150   :  { %v970_v47 = vpop.f32.mrf.mxu2  ;;  %v875_v19 = vpop.f32.mrf.mxu0 }
 0x151   :  { %v971_v24 = vadd.f32 %v970_v47, %v922_v46  ;;  %v1019_v17 = vpop.f32.mrf.mxu3  ;;  %v924_v21 = vpop.f32.mrf.mxu1 }
 0x152   :  { %v925_v29 = vadd.f32 %v924_v21, %v875_v19 }
 0x153   :  { %v1020_v23 = vadd.f32 %v1019_v17, %v971_v24 }
 0x155   :  { %v1151_v28 = vpack.c.bf16 %v1020_v23, %v2371_v49 }
 0x157   :  { %1167 = vst [vmem:[%s2479_s2 + $0x28] sm:$0xff] %v1151_v28 }
 0x158   :  { %v973_v13 = vpop.f32.mrf.mxu2  ;;  %v877_v15 = vpop.f32.mrf.mxu0 }
 0x159   :  { %v974_v60 = vadd.f32 %v973_v13, %v925_v29  ;;  %v1022_v14 = vpop.f32.mrf.mxu3  ;;  %v926_v1 = vpop.f32.mrf.mxu1 }
 0x15a   :  { %v927_v53 = vadd.f32 %v926_v1, %v877_v15 }
 0x15b   :  { %v1023_v30 = vadd.f32 %v1022_v14, %v974_v60 }
 0x15d   :  { %v1152_v2 = vpack.c.bf16 %v1023_v30, %v2377_v18 }
 0x15f   :  { %1168 = vst [vmem:[%s2479_s2 + $0x30] sm:$0xff] %v1152_v2 }
 0x160   :  { %v975_v3 = vpop.f32.mrf.mxu2  ;;  %v880_v31 = vpop.f32.mrf.mxu0 }
 0x161   :  { %v976_v49 = vadd.f32 %v975_v3, %v927_v53  ;;  %v1024_v54 = vpop.f32.mrf.mxu3  ;;  %v929_v32 = vpop.f32.mrf.mxu1 }
 0x162   :  { %v930_v36 = vadd.f32 %v929_v32, %v880_v31 }
 0x163   :  { %v1025_v33 = vadd.f32 %v1024_v54, %v976_v49 }
 0x165   :  { %v1153_v35 = vpack.c.bf16 %v1025_v33, %v2379_v12 }
 0x167   :  { %1169 = vst [vmem:[%s2479_s2 + $0x38] sm:$0xff] %v1153_v35 }
 0x168   :  { %v978_v37 = vpop.f32.mrf.mxu2  ;;  %v882_v42 = vpop.f32.mrf.mxu0 }
 0x169   :  { %v979_v18 = vadd.f32 %v978_v37, %v930_v36  ;;  %v1027_v41 = vpop.f32.mrf.mxu3  ;;  %v931_v43 = vpop.f32.mrf.mxu1 }
 0x16a   :  { %v932_v55 = vadd.f32 %v931_v43, %v882_v42 }
 0x16b   :  { %v1028_v38 = vadd.f32 %v1027_v41, %v979_v18 }
 0x16d   :  { %v1154_v39 = vpack.c.bf16 %v1028_v38, %v2385_v57 }
 0x16f   :  { %1170 = vst [vmem:[%s2479_s2 + $0x40] sm:$0xff] %v1154_v39 }
 0x170   :  { %v980_v20 = vpop.f32.mrf.mxu2  ;;  %v885_v27 = vpop.f32.mrf.mxu0 }
 0x171   :  { %v981_v12 = vadd.f32 %v980_v20, %v932_v55  ;;  %v1029_v26 = vpop.f32.mrf.mxu3  ;;  %v934_v56 = vpop.f32.mrf.mxu1 }
 0x172   :  { %v935_v61 = vadd.f32 %v934_v56, %v885_v27 }
 0x173   :  { %v1030_v58 = vadd.f32 %v1029_v26, %v981_v12 }
 0x175   :  { %v1155_v59 = vpack.c.bf16 %v1030_v58, %v2387_v40 }
 0x177   :  { %1171 = vst [vmem:[%s2479_s2 + $0x48] sm:$0xff] %v1155_v59 }
 0x178   :  { %v983_v9 = vpop.f32.mrf.mxu2  ;;  %v887_v10 = vpop.f32.mrf.mxu0 }
 0x179   :  { %v984_v57 = vadd.f32 %v983_v9, %v935_v61  ;;  %v1032_v48 = vpop.f32.mrf.mxu3  ;;  %v936_v11 = vpop.f32.mrf.mxu1 }
 0x17a   :  { %v937_v4 = vadd.f32 %v936_v11, %v887_v10 }
 0x17b   :  { %v1033_v62 = vadd.f32 %v1032_v48, %v984_v57 }
 0x17d   :  { %v1156_v63 = vpack.c.bf16 %v1033_v62, %v2393_v25 }
 0x17f   :  { %1172 = vst [vmem:[%s2479_s2 + $0x50] sm:$0xff] %v1156_v63 }
 0x180   :  { %v985_v6 = vpop.f32.mrf.mxu2  ;;  %v890_v34 = vpop.f32.mrf.mxu0 }
 0x181   :  { %v986_v40 = vadd.f32 %v985_v6, %v937_v4  ;;  %v1034_v50 = vpop.f32.mrf.mxu3  ;;  %v939_v51 = vpop.f32.mrf.mxu1 }
 0x182   :  { %v940_v16 = vadd.f32 %v939_v51, %v890_v34 }
 0x183   :  { %v1035_v52 = vadd.f32 %v1034_v50, %v986_v40 }
 0x185   :  { %v1157_v7 = vpack.c.bf16 %v1035_v52, %v2395_v8 }
 0x187   :  { %1173 = vst [vmem:[%s2479_s2 + $0x58] sm:$0xff] %v1157_v7 }
 0x188   :  { %v988_v45 = vpop.f32.mrf.mxu2  ;;  %v892_v47 = vpop.f32.mrf.mxu0 }
 0x189   :  { %v989_v25 = vadd.f32 %v988_v45, %v940_v16  ;;  %v1037_v46 = vpop.f32.mrf.mxu3  ;;  %v941_v24 = vpop.f32.mrf.mxu1 }
 0x18a   :  { %v942_v21 = vadd.f32 %v941_v24, %v892_v47 }
 0x18b   :  { %v1038_v17 = vadd.f32 %v1037_v46, %v989_v25 }
 0x18d   :  { %v1158_v19 = vpack.c.bf16 %v1038_v17, %v2401_v5 }
 0x18f   :  { %1174 = vst [vmem:[%s2479_s2 + $0x60] sm:$0xff] %v1158_v19 }
 0x190   :  { %v990_v23 = vpop.f32.mrf.mxu2  ;;  %v895_v29 = vpop.f32.mrf.mxu0 }
 0x191   :  { %v991_v8 = vadd.f32 %v990_v23, %v942_v21  ;;  %v1039_v28 = vpop.f32.mrf.mxu3  ;;  %v944_v13 = vpop.f32.mrf.mxu1 }
 0x192   :  { %v945_v15 = vadd.f32 %v944_v13, %v895_v29 }
 0x193   :  { %v1040_v60 = vadd.f32 %v1039_v28, %v991_v8 }
 0x195   :  { %v1159_v14 = vpack.c.bf16 %v1040_v60, %v2403_v44 }
 0x197   :  { %1175 = vst [vmem:[%s2479_s2 + $0x68] sm:$0xff] %v1159_v14 }
 0x198   :  { %v993_v1 = vpop.f32.mrf.mxu2  ;;  %v897_v53 = vpop.f32.mrf.mxu0 }
 0x199   :  { %v994_v5 = vadd.f32 %v993_v1, %v945_v15  ;;  %v1042_v30 = vpop.f32.mrf.mxu3  ;;  %v946_v3 = vpop.f32.mrf.mxu1 }
 0x19a   :  { %v947_v54 = vadd.f32 %v946_v3, %v897_v53 }
 0x19b   :  { %v1043_v2 = vadd.f32 %v1042_v30, %v994_v5 }
 0x19d   :  { %v1160_v49 = vpack.c.bf16 %v1043_v2, %v2409_v22 }
 0x19f   :  { %1176 = vst [vmem:[%s2479_s2 + $0x70] sm:$0xff] %v1160_v49 }
 0x1a0   :  { %v995_v31 = vpop.f32.mrf.mxu2 }
 0x1a1   :  { %v996_v44 = vadd.f32 %v995_v31, %v947_v54  ;;  %v1044_v32 = vpop.f32.mrf.mxu3 }
 0x1a3   :  { %v1045_v33 = vadd.f32 %v1044_v32, %v996_v44 }
 0x1a5   :  { %v1161_v35 = vpack.c.bf16 %v1045_v33, %v2411_v0 }
 0x1a7   :  { %1177 = vst [vmem:[%s2479_s2 + $0x78] sm:$0xff] %v1161_v35 }

// kernel: gcn_forward.7
= control target key start
LH: loop header
LB: loop body
LE: loop exit
PB: predicated region body
PF: predicated region fallthrough
CT: control target
= control target key end

     0   :  { %s1606_s1 = inlined_call_operand.vmem [shape: bf16[128,512], index: 1, kind: input, shape index: {}]   ;;  %s1607_s0 = inlined_call_operand.vmem [shape: bf16[128,128], index: 0, kind: input, shape index: {}]   ;;  %s1608_s2 = inlined_call_operand.vmem [shape: f32[1,512], index: 2, kind: input, shape index: {}]   ;;  %s1609_s3 = inlined_call_operand.vmem [shape: bf16[128,512], index: 3, kind: output, shape index: {}]  }
   0x1   :  { %v1145_v0 = vld [vmem:[%s1606_s1 + $0xe0] sm:$0xf]  ;;  %v1197_v1 = vld [vmem:[%s1606_s1 + $0xec] sm:$0xf0]  ;;  %v1195_v2 = vld [vmem:[%s1606_s1 + $0xe4] sm:$0xf] }
   0x2   :  { %v1146_v3 = vor.u32 %v1197_v1, %v1145_v0  ;;  %v1147_v4 = vld [vmem:[%s1606_s1 + $0xf0] sm:$0xf0]  ;;  %v1153_v5 = vld [vmem:[%s1606_s1 + $0xe8] sm:$0xf]  ;;  %v1198_v6 = vld [vmem:[%s1606_s1 + $0xf4] sm:$0xf0] }
   0x3   :  { %v1150_v7 = vor.u32 %v1195_v2, %v1147_v4  ;;  %v1154_v8 = vor.u32 %v1198_v6, %v1153_v5  ;;  %v1196_v9 = vld [vmem:[%s1606_s1 + $0xec] sm:$0xf]  ;;  %v1155_v10 = vld [vmem:[%s1606_s1 + $0xf8] sm:$0xf0]  ;;  %v1129_v11 = vld [vmem:[%s1606_s1 + $0xc0] sm:$0xf] }
   0x4   :  { %402 = vmatpush.bf16.msra.mxu0 %v1146_v3  ;;  %v1158_v12 = vor.u32 %v1196_v9, %v1155_v10  ;;  %v1193_v13 = vld [vmem:[%s1606_s1 + $0xcc] sm:$0xf0]  ;;  %v1191_v14 = vld [vmem:[%s1606_s1 + $0xc4] sm:$0xf]  ;;  %v1131_v15 = vld [vmem:[%s1606_s1 + $0xd0] sm:$0xf0] }
   0x5   :  { %451 = vmatpush.bf16.msra.mxu1 %v1150_v7  ;;  %500 = vmatpush.bf16.msra.mxu2 %v1154_v8  ;;  %v1130_v16 = vor.u32 %v1193_v13, %v1129_v11  ;;  %v1134_v17 = vor.u32 %v1191_v14, %v1131_v15  ;;  %v1137_v18 = vld [vmem:[%s1606_s1 + $0xc8] sm:$0xf]  ;;  %v1194_v19 = vld [vmem:[%s1606_s1 + $0xd4] sm:$0xf0]  ;;  %v1192_v20 = vld [vmem:[%s1606_s1 + $0xcc] sm:$0xf] }
   0x6   :  { %549 = vmatpush.bf16.msra.mxu3 %v1158_v12  ;;  %v1138_v21 = vor.u32 %v1194_v19, %v1137_v18  ;;  %v1139_v22 = vld [vmem:[%s1606_s1 + $0xd8] sm:$0xf0]  ;;  %v1113_v23 = vld [vmem:[%s1606_s1 + $0xa0] sm:$0xf]  ;;  %v1189_v24 = vld [vmem:[%s1606_s1 + $0xac] sm:$0xf0] }
   0x7   :  { %v1142_v25 = vor.u32 %v1192_v20, %v1139_v22  ;;  %v1187_v26 = vld [vmem:[%s1606_s1 + $0xa4] sm:$0xf]  ;;  %v1115_v27 = vld [vmem:[%s1606_s1 + $0xb0] sm:$0xf0]  ;;  %v1121_v28 = vld [vmem:[%s1606_s1 + $0xa8] sm:$0xf]  ;;  %v1114_v29 = vor.u32 %v1189_v24, %v1113_v23 }
   0x8   :  { %403 = vmatpush.bf16.msra.mxu0 %v1130_v16  ;;  %v1190_v30 = vld [vmem:[%s1606_s1 + $0xb4] sm:$0xf0]  ;;  %v1188_v31 = vld [vmem:[%s1606_s1 + $0xac] sm:$0xf]  ;;  %v1123_v32 = vld [vmem:[%s1606_s1 + $0xb8] sm:$0xf0]  ;;  %v1118_v33 = vor.u32 %v1187_v26, %v1115_v27 }
   0x9   :  { %452 = vmatpush.bf16.msra.mxu1 %v1134_v17  ;;  %501 = vmatpush.bf16.msra.mxu2 %v1138_v21  ;;  %v1122_v34 = vor.u32 %v1190_v30, %v1121_v28  ;;  %v1097_v35 = vld [vmem:[%s1606_s1 + $0x80] sm:$0xf]  ;;  %v1185_v36 = vld [vmem:[%s1606_s1 + $0x8c] sm:$0xf0]  ;;  %v1183_v37 = vld [vmem:[%s1606_s1 + $0x84] sm:$0xf]  ;;  %v1126_v38 = vor.u32 %v1188_v31, %v1123_v32 }
   0xa   :  { %550 = vmatpush.bf16.msra.mxu3 %v1142_v25  ;;  %v1099_v39 = vld [vmem:[%s1606_s1 + $0x90] sm:$0xf0]  ;;  %v1105_v40 = vld [vmem:[%s1606_s1 + $0x88] sm:$0xf]  ;;  %v1186_v41 = vld [vmem:[%s1606_s1 + $0x94] sm:$0xf0]  ;;  %v1098_v44 = vor.u32 %v1185_v36, %v1097_v35 }
   0xb   :  { %v1184_v42 = vld [vmem:[%s1606_s1 + $0x8c] sm:$0xf]  ;;  %v1107_v43 = vld [vmem:[%s1606_s1 + $0x98] sm:$0xf0]  ;;  %v1102_v45 = vor.u32 %v1183_v37, %v1099_v39  ;;  %v1106_v46 = vor.u32 %v1186_v41, %v1105_v40  ;;  %v1081_v47 = vld [vmem:[%s1606_s1 + $0x60] sm:$0xf] }
   0xc   :  { %404 = vmatpush.bf16.msra.mxu0 %v1114_v29  ;;  %v1181_v48 = vld [vmem:[%s1606_s1 + $0x6c] sm:$0xf0]  ;;  %v1179_v49 = vld [vmem:[%s1606_s1 + $0x64] sm:$0xf]  ;;  %v1110_v50 = vor.u32 %v1184_v42, %v1107_v43  ;;  %v1083_v51 = vld [vmem:[%s1606_s1 + $0x70] sm:$0xf0] }
   0xd   :  { %453 = vmatpush.bf16.msra.mxu1 %v1118_v33  ;;  %502 = vmatpush.bf16.msra.mxu2 %v1122_v34  ;;  %v1089_v52 = vld [vmem:[%s1606_s1 + $0x68] sm:$0xf]  ;;  %v1182_v53 = vld [vmem:[%s1606_s1 + $0x74] sm:$0xf0]  ;;  %v1180_v54 = vld [vmem:[%s1606_s1 + $0x6c] sm:$0xf]  ;;  %v1082_v56 = vor.u32 %v1181_v48, %v1081_v47  ;;  %v1086_v57 = vor.u32 %v1179_v49, %v1083_v51 }
   0xe   :  { %551 = vmatpush.bf16.msra.mxu3 %v1126_v38  ;;  %v1091_v55 = vld [vmem:[%s1606_s1 + $0x78] sm:$0xf0]  ;;  %v1090_v58 = vor.u32 %v1182_v53, %v1089_v52  ;;  %v1065_v59 = vld [vmem:[%s1606_s1 + $0x40] sm:$0xf]  ;;  %v1177_v60 = vld [vmem:[%s1606_s1 + $0x4c] sm:$0xf0] }
   0xf   :  { %v1175_v61 = vld [vmem:[%s1606_s1 + $0x44] sm:$0xf]  ;;  %v1094_v62 = vor.u32 %v1180_v54, %v1091_v55  ;;  %v1067_v63 = vld [vmem:[%s1606_s1 + $0x50] sm:$0xf0]  ;;  %v1073_v0 = vld [vmem:[%s1606_s1 + $0x48] sm:$0xf]  ;;  %v1066_v4 = vor.u32 %v1177_v60, %v1065_v59 }
  0x10   :  { %405 = vmatpush.bf16.msra.mxu0 %v1098_v44  ;;  %v1178_v1 = vld [vmem:[%s1606_s1 + $0x54] sm:$0xf0]  ;;  %v1176_v2 = vld [vmem:[%s1606_s1 + $0x4c] sm:$0xf]  ;;  %v1075_v3 = vld [vmem:[%s1606_s1 + $0x58] sm:$0xf0]  ;;  %v1070_v5 = vor.u32 %v1175_v61, %v1067_v63 }
  0x11   :  { %454 = vmatpush.bf16.msra.mxu1 %v1102_v45  ;;  %503 = vmatpush.bf16.msra.mxu2 %v1106_v46  ;;  %v1074_v6 = vor.u32 %v1178_v1, %v1073_v0  ;;  %v1049_v7 = vld [vmem:[%s1606_s1 + $0x20] sm:$0xf]  ;;  %v1173_v8 = vld [vmem:[%s1606_s1 + $0x2c] sm:$0xf0]  ;;  %v1171_v9 = vld [vmem:[%s1606_s1 + $0x24] sm:$0xf]  ;;  %v1078_v10 = vor.u32 %v1176_v2, %v1075_v3 }
  0x12   :  { %552 = vmatpush.bf16.msra.mxu3 %v1110_v50  ;;  %v1051_v11 = vld [vmem:[%s1606_s1 + $0x30] sm:$0xf0]  ;;  %v1057_v12 = vld [vmem:[%s1606_s1 + $0x28] sm:$0xf]  ;;  %v1174_v13 = vld [vmem:[%s1606_s1 + $0x34] sm:$0xf0]  ;;  %v1050_v16 = vor.u32 %v1173_v8, %v1049_v7 }
  0x13   :  { %v1172_v14 = vld [vmem:[%s1606_s1 + $0x2c] sm:$0xf]  ;;  %v1059_v15 = vld [vmem:[%s1606_s1 + $0x38] sm:$0xf0]  ;;  %v1054_v17 = vor.u32 %v1171_v9, %v1051_v11  ;;  %v1058_v18 = vor.u32 %v1174_v13, %v1057_v12  ;;  %v1033_v19 = vld [vmem:[%s1606_s1] sm:$0xf] }
  0x14   :  { %406 = vmatpush.bf16.msra.mxu0 %v1082_v56  ;;  %v1169_v20 = vld [vmem:[%s1606_s1 + $0xc] sm:$0xf0]  ;;  %v1167_v21 = vld [vmem:[%s1606_s1 + $0x4] sm:$0xf]  ;;  %v1062_v22 = vor.u32 %v1172_v14, %v1059_v15  ;;  %v1035_v23 = vld [vmem:[%s1606_s1 + $0x10] sm:$0xf0] }
  0x15   :  { %455 = vmatpush.bf16.msra.mxu1 %v1086_v57  ;;  %504 = vmatpush.bf16.msra.mxu2 %v1090_v58  ;;  %v1041_v24 = vld [vmem:[%s1606_s1 + $0x8] sm:$0xf]  ;;  %v1170_v25 = vld [vmem:[%s1606_s1 + $0x14] sm:$0xf0]  ;;  %v1168_v26 = vld [vmem:[%s1606_s1 + $0xc] sm:$0xf]  ;;  %v1034_v28 = vor.u32 %v1169_v20, %v1033_v19  ;;  %v1038_v29 = vor.u32 %v1167_v21, %v1035_v23 }
  0x16   :  { %553 = vmatpush.bf16.msra.mxu3 %v1094_v62  ;;  %v1043_v27 = vld [vmem:[%s1606_s1 + $0x18] sm:$0xf0]  ;;  %v1042_v30 = vor.u32 %v1170_v25, %v1041_v24  ;;  %v1159_v32 = vld [vmem:[%s1607_s0] sm:$0xff]  ;;  %v1160_v33 = vld [vmem:[%s1607_s0 + $0x8] sm:$0xff] }
  0x17   :  { %v1046_v31 = vor.u32 %v1168_v26, %v1043_v27  ;;  %v1161_v34 = vld [vmem:[%s1607_s0 + $0x10] sm:$0xff]  ;;  %v1162_v35 = vld [vmem:[%s1607_s0 + $0x18] sm:$0xff]  ;;  %v1163_v36 = vld [vmem:[%s1607_s0 + $0x20] sm:$0xff] }
  0x18   :  { %407 = vmatpush.bf16.msra.mxu0 %v1066_v4  ;;  %v1164_v37 = vld [vmem:[%s1607_s0 + $0x28] sm:$0xff]  ;;  %v1165_v38 = vld [vmem:[%s1607_s0 + $0x30] sm:$0xff]  ;;  %v1166_v39 = vld [vmem:[%s1607_s0 + $0x38] sm:$0xff] }
  0x19   :  { %456 = vmatpush.bf16.msra.mxu1 %v1070_v5  ;;  %505 = vmatpush.bf16.msra.mxu2 %v1074_v6  ;;  %v793_v40 = vld [vmem:[%s1608_s2] sm:$0xf] }
  0x1a   :  { %554 = vmatpush.bf16.msra.mxu3 %v1078_v10  ;;  %v1438_v41 = vperm.slane %v793_v40, 0  ;;  %v1440_v42 = vperm.slane %v793_v40, 1  ;;  %v1444_v49 = vperm.slane %v793_v40, 2  ;;  %v1446_v50 = vperm.slane %v793_v40, 3 }
  0x1c   :  { %408 = vmatpush.bf16.msra.mxu0 %v1050_v16 }
  0x1d   :  { %457 = vmatpush.bf16.msra.mxu1 %v1054_v17  ;;  %506 = vmatpush.bf16.msra.mxu2 %v1058_v18 }
  0x1e   :  { %555 = vmatpush.bf16.msra.mxu3 %v1062_v22 }
  0x20   :  { %409 = vmatpush.bf16.msra.mxu0 %v1034_v28 }
  0x21   :  { %458 = vmatpush.bf16.msra.mxu1 %v1038_v29  ;;  %507 = vmatpush.bf16.msra.mxu2 %v1042_v30 }
  0x22   :  { %556 = vmatpush.bf16.msra.mxu3 %v1046_v31 }
  0x23   :  { %410 = vmatmul.bf16.vlgmr.msra.gmra.mxu0 %v1159_v32 }
  0x24   :  { %459 = vmatmul.bf16.vlgmr.msra.gmra.mxu1 %v1159_v32  ;;  %508 = vmatmul.bf16.vlgmr.msra.gmra.mxu2 %v1159_v32 }
  0x25   :  { %557 = vmatmul.bf16.vlgmr.msra.gmra.mxu3 %v1159_v32 }
  0x33   :  { %415 = vmatmul.bf16.gmra.mxu0 %v1160_v33 }
  0x34   :  { %464 = vmatmul.bf16.gmra.mxu1 %v1160_v33  ;;  %513 = vmatmul.bf16.gmra.mxu2 %v1160_v33 }
  0x35   :  { %562 = vmatmul.bf16.gmra.mxu3 %v1160_v33 }
  0x43   :  { %420 = vmatmul.bf16.gmra.mxu0 %v1161_v34 }
  0x44   :  { %469 = vmatmul.bf16.gmra.mxu1 %v1161_v34  ;;  %518 = vmatmul.bf16.gmra.mxu2 %v1161_v34 }
  0x45   :  { %567 = vmatmul.bf16.gmra.mxu3 %v1161_v34 }
  0x53   :  { %425 = vmatmul.bf16.gmra.mxu0 %v1162_v35 }
  0x54   :  { %474 = vmatmul.bf16.gmra.mxu1 %v1162_v35  ;;  %523 = vmatmul.bf16.gmra.mxu2 %v1162_v35 }
  0x55   :  { %572 = vmatmul.bf16.gmra.mxu3 %v1162_v35 }
  0x63   :  { %430 = vmatmul.bf16.gmra.mxu0 %v1163_v36 }
  0x64   :  { %479 = vmatmul.bf16.gmra.mxu1 %v1163_v36  ;;  %528 = vmatmul.bf16.gmra.mxu2 %v1163_v36 }
  0x65   :  { %577 = vmatmul.bf16.gmra.mxu3 %v1163_v36 }
  0x73   :  { %435 = vmatmul.bf16.gmra.mxu0 %v1164_v37 }
  0x74   :  { %484 = vmatmul.bf16.gmra.mxu1 %v1164_v37  ;;  %533 = vmatmul.bf16.gmra.mxu2 %v1164_v37 }
  0x75   :  { %582 = vmatmul.bf16.gmra.mxu3 %v1164_v37 }
  0x83   :  { %440 = vmatmul.bf16.gmra.mxu0 %v1165_v38 }
  0x84   :  { %489 = vmatmul.bf16.gmra.mxu1 %v1165_v38  ;;  %538 = vmatmul.bf16.gmra.mxu2 %v1165_v38 }
  0x85   :  { %587 = vmatmul.bf16.gmra.mxu3 %v1165_v38 }
  0x93   :  { %445 = vmatmul.bf16.gmra.mxu0 %v1166_v39 }
  0x94   :  { %494 = vmatmul.bf16.gmra.mxu1 %v1166_v39  ;;  %543 = vmatmul.bf16.gmra.mxu2 %v1166_v39 }
  0x95   :  { %592 = vmatmul.bf16.gmra.mxu3 %v1166_v39 }
  0xa0   :  { %v411_v43 = vpop.f32.mrf.mxu0 }
  0xa1   :  { %v803_v44 = vadd.f32 %v1438_v41, %v411_v43  ;;  %v460_v45 = vpop.f32.mrf.mxu1 }
  0xa2   :  { %v804_v46 = vadd.f32 %v1440_v42, %v460_v45 }
  0xa3   :  { %v867_v47 = vmax.f32 %v803_v44, 0.0 }
  0xa4   :  { %v868_v48 = vmax.f32 %v804_v46, 0.0 }
  0xa6   :  { %v931_v51 = vpack.c.bf16 %v868_v48, %v867_v47 }
  0xa7   :  { %v509_v52 = vpop.f32.mrf.mxu2 }
  0xa8   :  { %963 = vst [vmem:[%s1609_s3] sm:$0xff] %v931_v51  ;;  %v805_v53 = vadd.f32 %v1444_v49, %v509_v52  ;;  %v558_v54 = vpop.f32.mrf.mxu3  ;;  %v413_v55 = vpop.f32.mrf.mxu0 }
  0xa9   :  { %v806_v56 = vadd.f32 %v1446_v50, %v558_v54  ;;  %v807_v57 = vadd.f32 %v1438_v41, %v413_v55  ;;  %v462_v58 = vpop.f32.mrf.mxu1 }
  0xaa   :  { %v869_v59 = vmax.f32 %v805_v53, 0.0  ;;  %v808_v60 = vadd.f32 %v1440_v42, %v462_v58 }
  0xab   :  { %v870_v61 = vmax.f32 %v806_v56, 0.0  ;;  %v871_v62 = vmax.f32 %v807_v57, 0.0 }
  0xac   :  { %v872_v63 = vmax.f32 %v808_v60, 0.0 }
  0xad   :  { %v932_v0 = vpack.c.bf16 %v870_v61, %v869_v59 }
  0xae   :  { %v933_v1 = vpack.c.bf16 %v872_v63, %v871_v62 }
  0xaf   :  { %964 = vst [vmem:[%s1609_s3 + $0x8] sm:$0xff] %v932_v0  ;;  %v511_v2 = vpop.f32.mrf.mxu2 }
  0xb0   :  { %965 = vst [vmem:[%s1609_s3 + $0x10] sm:$0xff] %v933_v1  ;;  %v809_v3 = vadd.f32 %v1444_v49, %v511_v2  ;;  %v560_v4 = vpop.f32.mrf.mxu3  ;;  %v416_v5 = vpop.f32.mrf.mxu0 }
  0xb1   :  { %v810_v6 = vadd.f32 %v1446_v50, %v560_v4  ;;  %v811_v7 = vadd.f32 %v1438_v41, %v416_v5  ;;  %v465_v8 = vpop.f32.mrf.mxu1 }
  0xb2   :  { %v873_v9 = vmax.f32 %v809_v3, 0.0  ;;  %v812_v10 = vadd.f32 %v1440_v42, %v465_v8 }
  0xb3   :  { %v874_v11 = vmax.f32 %v810_v6, 0.0  ;;  %v875_v12 = vmax.f32 %v811_v7, 0.0 }
  0xb4   :  { %v876_v13 = vmax.f32 %v812_v10, 0.0 }
  0xb5   :  { %v934_v14 = vpack.c.bf16 %v874_v11, %v873_v9 }
  0xb6   :  { %v935_v15 = vpack.c.bf16 %v876_v13, %v875_v12 }
  0xb7   :  { %966 = vst [vmem:[%s1609_s3 + $0x18] sm:$0xff] %v934_v14  ;;  %v514_v16 = vpop.f32.mrf.mxu2 }
  0xb8   :  { %967 = vst [vmem:[%s1609_s3 + $0x20] sm:$0xff] %v935_v15  ;;  %v813_v17 = vadd.f32 %v1444_v49, %v514_v16  ;;  %v563_v18 = vpop.f32.mrf.mxu3  ;;  %v418_v19 = vpop.f32.mrf.mxu0 }
  0xb9   :  { %v814_v20 = vadd.f32 %v1446_v50, %v563_v18  ;;  %v815_v21 = vadd.f32 %v1438_v41, %v418_v19  ;;  %v467_v22 = vpop.f32.mrf.mxu1 }
  0xba   :  { %v877_v23 = vmax.f32 %v813_v17, 0.0  ;;  %v816_v24 = vadd.f32 %v1440_v42, %v467_v22 }
  0xbb   :  { %v878_v25 = vmax.f32 %v814_v20, 0.0  ;;  %v879_v26 = vmax.f32 %v815_v21, 0.0 }
  0xbc   :  { %v880_v27 = vmax.f32 %v816_v24, 0.0 }
  0xbd   :  { %v936_v28 = vpack.c.bf16 %v878_v25, %v877_v23 }
  0xbe   :  { %v937_v29 = vpack.c.bf16 %v880_v27, %v879_v26 }
  0xbf   :  { %968 = vst [vmem:[%s1609_s3 + $0x28] sm:$0xff] %v936_v28  ;;  %v516_v30 = vpop.f32.mrf.mxu2 }
  0xc0   :  { %969 = vst [vmem:[%s1609_s3 + $0x30] sm:$0xff] %v937_v29  ;;  %v817_v31 = vadd.f32 %v1444_v49, %v516_v30  ;;  %v565_v32 = vpop.f32.mrf.mxu3  ;;  %v421_v33 = vpop.f32.mrf.mxu0 }
  0xc1   :  { %v818_v34 = vadd.f32 %v1446_v50, %v565_v32  ;;  %v819_v35 = vadd.f32 %v1438_v41, %v421_v33  ;;  %v470_v36 = vpop.f32.mrf.mxu1 }
  0xc2   :  { %v881_v37 = vmax.f32 %v817_v31, 0.0  ;;  %v820_v38 = vadd.f32 %v1440_v42, %v470_v36 }
  0xc3   :  { %v882_v39 = vmax.f32 %v818_v34, 0.0  ;;  %v883_v40 = vmax.f32 %v819_v35, 0.0 }
  0xc4   :  { %v884_v43 = vmax.f32 %v820_v38, 0.0 }
  0xc5   :  { %v938_v44 = vpack.c.bf16 %v882_v39, %v881_v37 }
  0xc6   :  { %v939_v45 = vpack.c.bf16 %v884_v43, %v883_v40 }
  0xc7   :  { %970 = vst [vmem:[%s1609_s3 + $0x38] sm:$0xff] %v938_v44  ;;  %v519_v46 = vpop.f32.mrf.mxu2 }
  0xc8   :  { %971 = vst [vmem:[%s1609_s3 + $0x40] sm:$0xff] %v939_v45  ;;  %v821_v47 = vadd.f32 %v1444_v49, %v519_v46  ;;  %v568_v48 = vpop.f32.mrf.mxu3  ;;  %v423_v51 = vpop.f32.mrf.mxu0 }
  0xc9   :  { %v822_v52 = vadd.f32 %v1446_v50, %v568_v48  ;;  %v823_v53 = vadd.f32 %v1438_v41, %v423_v51  ;;  %v472_v54 = vpop.f32.mrf.mxu1 }
  0xca   :  { %v885_v55 = vmax.f32 %v821_v47, 0.0  ;;  %v824_v56 = vadd.f32 %v1440_v42, %v472_v54 }
  0xcb   :  { %v886_v57 = vmax.f32 %v822_v52, 0.0  ;;  %v887_v58 = vmax.f32 %v823_v53, 0.0 }
  0xcc   :  { %v888_v59 = vmax.f32 %v824_v56, 0.0 }
  0xcd   :  { %v940_v60 = vpack.c.bf16 %v886_v57, %v885_v55 }
  0xce   :  { %v941_v61 = vpack.c.bf16 %v888_v59, %v887_v58 }
  0xcf   :  { %972 = vst [vmem:[%s1609_s3 + $0x48] sm:$0xff] %v940_v60  ;;  %v521_v62 = vpop.f32.mrf.mxu2 }
  0xd0   :  { %973 = vst [vmem:[%s1609_s3 + $0x50] sm:$0xff] %v941_v61  ;;  %v825_v63 = vadd.f32 %v1444_v49, %v521_v62  ;;  %v570_v0 = vpop.f32.mrf.mxu3  ;;  %v426_v1 = vpop.f32.mrf.mxu0 }
  0xd1   :  { %v826_v2 = vadd.f32 %v1446_v50, %v570_v0  ;;  %v827_v3 = vadd.f32 %v1438_v41, %v426_v1  ;;  %v475_v4 = vpop.f32.mrf.mxu1 }
  0xd2   :  { %v889_v5 = vmax.f32 %v825_v63, 0.0  ;;  %v828_v6 = vadd.f32 %v1440_v42, %v475_v4 }
  0xd3   :  { %v890_v7 = vmax.f32 %v826_v2, 0.0  ;;  %v891_v8 = vmax.f32 %v827_v3, 0.0 }
  0xd4   :  { %v892_v9 = vmax.f32 %v828_v6, 0.0 }
  0xd5   :  { %v942_v10 = vpack.c.bf16 %v890_v7, %v889_v5 }
  0xd6   :  { %v943_v11 = vpack.c.bf16 %v892_v9, %v891_v8 }
  0xd7   :  { %974 = vst [vmem:[%s1609_s3 + $0x58] sm:$0xff] %v942_v10  ;;  %v524_v12 = vpop.f32.mrf.mxu2 }
  0xd8   :  { %975 = vst [vmem:[%s1609_s3 + $0x60] sm:$0xff] %v943_v11  ;;  %v829_v13 = vadd.f32 %v1444_v49, %v524_v12  ;;  %v573_v14 = vpop.f32.mrf.mxu3  ;;  %v428_v15 = vpop.f32.mrf.mxu0 }
  0xd9   :  { %v830_v16 = vadd.f32 %v1446_v50, %v573_v14  ;;  %v831_v17 = vadd.f32 %v1438_v41, %v428_v15  ;;  %v477_v18 = vpop.f32.mrf.mxu1 }
  0xda   :  { %v893_v19 = vmax.f32 %v829_v13, 0.0  ;;  %v832_v20 = vadd.f32 %v1440_v42, %v477_v18 }
  0xdb   :  { %v894_v21 = vmax.f32 %v830_v16, 0.0  ;;  %v895_v22 = vmax.f32 %v831_v17, 0.0 }
  0xdc   :  { %v896_v23 = vmax.f32 %v832_v20, 0.0 }
  0xdd   :  { %v944_v24 = vpack.c.bf16 %v894_v21, %v893_v19 }
  0xde   :  { %v945_v25 = vpack.c.bf16 %v896_v23, %v895_v22 }
  0xdf   :  { %976 = vst [vmem:[%s1609_s3 + $0x68] sm:$0xff] %v944_v24  ;;  %v526_v26 = vpop.f32.mrf.mxu2 }
  0xe0   :  { %977 = vst [vmem:[%s1609_s3 + $0x70] sm:$0xff] %v945_v25  ;;  %v833_v27 = vadd.f32 %v1444_v49, %v526_v26  ;;  %v575_v28 = vpop.f32.mrf.mxu3  ;;  %v431_v29 = vpop.f32.mrf.mxu0 }
  0xe1   :  { %v834_v30 = vadd.f32 %v1446_v50, %v575_v28  ;;  %v835_v31 = vadd.f32 %v1438_v41, %v431_v29  ;;  %v480_v32 = vpop.f32.mrf.mxu1 }
  0xe2   :  { %v897_v33 = vmax.f32 %v833_v27, 0.0  ;;  %v836_v34 = vadd.f32 %v1440_v42, %v480_v32 }
  0xe3   :  { %v898_v35 = vmax.f32 %v834_v30, 0.0  ;;  %v899_v36 = vmax.f32 %v835_v31, 0.0 }
  0xe4   :  { %v900_v37 = vmax.f32 %v836_v34, 0.0 }
  0xe5   :  { %v946_v38 = vpack.c.bf16 %v898_v35, %v897_v33 }
  0xe6   :  { %v947_v39 = vpack.c.bf16 %v900_v37, %v899_v36 }
  0xe7   :  { %978 = vst [vmem:[%s1609_s3 + $0x78] sm:$0xff] %v946_v38  ;;  %v529_v40 = vpop.f32.mrf.mxu2 }
  0xe8   :  { %979 = vst [vmem:[%s1609_s3 + $0x80] sm:$0xff] %v947_v39  ;;  %v837_v43 = vadd.f32 %v1444_v49, %v529_v40  ;;  %v578_v44 = vpop.f32.mrf.mxu3  ;;  %v433_v45 = vpop.f32.mrf.mxu0 }
  0xe9   :  { %v838_v46 = vadd.f32 %v1446_v50, %v578_v44  ;;  %v839_v47 = vadd.f32 %v1438_v41, %v433_v45  ;;  %v482_v48 = vpop.f32.mrf.mxu1 }
  0xea   :  { %v901_v51 = vmax.f32 %v837_v43, 0.0  ;;  %v840_v52 = vadd.f32 %v1440_v42, %v482_v48 }
  0xeb   :  { %v902_v53 = vmax.f32 %v838_v46, 0.0  ;;  %v903_v54 = vmax.f32 %v839_v47, 0.0 }
  0xec   :  { %v904_v55 = vmax.f32 %v840_v52, 0.0 }
  0xed   :  { %v948_v56 = vpack.c.bf16 %v902_v53, %v901_v51 }
  0xee   :  { %v949_v57 = vpack.c.bf16 %v904_v55, %v903_v54 }
  0xef   :  { %980 = vst [vmem:[%s1609_s3 + $0x88] sm:$0xff] %v948_v56  ;;  %v531_v58 = vpop.f32.mrf.mxu2 }
  0xf0   :  { %981 = vst [vmem:[%s1609_s3 + $0x90] sm:$0xff] %v949_v57  ;;  %v841_v59 = vadd.f32 %v1444_v49, %v531_v58  ;;  %v580_v60 = vpop.f32.mrf.mxu3  ;;  %v436_v61 = vpop.f32.mrf.mxu0 }
  0xf1   :  { %v842_v62 = vadd.f32 %v1446_v50, %v580_v60  ;;  %v843_v63 = vadd.f32 %v1438_v41, %v436_v61  ;;  %v485_v0 = vpop.f32.mrf.mxu1 }
  0xf2   :  { %v905_v1 = vmax.f32 %v841_v59, 0.0  ;;  %v844_v2 = vadd.f32 %v1440_v42, %v485_v0 }
  0xf3   :  { %v906_v3 = vmax.f32 %v842_v62, 0.0  ;;  %v907_v4 = vmax.f32 %v843_v63, 0.0 }
  0xf4   :  { %v908_v5 = vmax.f32 %v844_v2, 0.0 }
  0xf5   :  { %v950_v6 = vpack.c.bf16 %v906_v3, %v905_v1 }
  0xf6   :  { %v951_v7 = vpack.c.bf16 %v908_v5, %v907_v4 }
  0xf7   :  { %982 = vst [vmem:[%s1609_s3 + $0x98] sm:$0xff] %v950_v6  ;;  %v534_v8 = vpop.f32.mrf.mxu2 }
  0xf8   :  { %983 = vst [vmem:[%s1609_s3 + $0xa0] sm:$0xff] %v951_v7  ;;  %v845_v9 = vadd.f32 %v1444_v49, %v534_v8  ;;  %v583_v10 = vpop.f32.mrf.mxu3  ;;  %v438_v11 = vpop.f32.mrf.mxu0 }
  0xf9   :  { %v846_v12 = vadd.f32 %v1446_v50, %v583_v10  ;;  %v847_v13 = vadd.f32 %v1438_v41, %v438_v11  ;;  %v487_v14 = vpop.f32.mrf.mxu1 }
  0xfa   :  { %v909_v15 = vmax.f32 %v845_v9, 0.0  ;;  %v848_v16 = vadd.f32 %v1440_v42, %v487_v14 }
  0xfb   :  { %v910_v17 = vmax.f32 %v846_v12, 0.0  ;;  %v911_v18 = vmax.f32 %v847_v13, 0.0 }
  0xfc   :  { %v912_v19 = vmax.f32 %v848_v16, 0.0 }
  0xfd   :  { %v952_v20 = vpack.c.bf16 %v910_v17, %v909_v15 }
  0xfe   :  { %v953_v21 = vpack.c.bf16 %v912_v19, %v911_v18 }
  0xff   :  { %984 = vst [vmem:[%s1609_s3 + $0xa8] sm:$0xff] %v952_v20  ;;  %v536_v22 = vpop.f32.mrf.mxu2 }
 0x100   :  { %985 = vst [vmem:[%s1609_s3 + $0xb0] sm:$0xff] %v953_v21  ;;  %v849_v23 = vadd.f32 %v1444_v49, %v536_v22  ;;  %v585_v24 = vpop.f32.mrf.mxu3  ;;  %v441_v25 = vpop.f32.mrf.mxu0 }
 0x101   :  { %v850_v26 = vadd.f32 %v1446_v50, %v585_v24  ;;  %v851_v27 = vadd.f32 %v1438_v41, %v441_v25  ;;  %v490_v28 = vpop.f32.mrf.mxu1 }
 0x102   :  { %v913_v29 = vmax.f32 %v849_v23, 0.0  ;;  %v852_v30 = vadd.f32 %v1440_v42, %v490_v28 }
 0x103   :  { %v914_v31 = vmax.f32 %v850_v26, 0.0  ;;  %v915_v32 = vmax.f32 %v851_v27, 0.0 }
 0x104   :  { %v916_v33 = vmax.f32 %v852_v30, 0.0 }
 0x105   :  { %v954_v34 = vpack.c.bf16 %v914_v31, %v913_v29 }
 0x106   :  { %v955_v35 = vpack.c.bf16 %v916_v33, %v915_v32 }
 0x107   :  { %986 = vst [vmem:[%s1609_s3 + $0xb8] sm:$0xff] %v954_v34  ;;  %v539_v36 = vpop.f32.mrf.mxu2 }
 0x108   :  { %987 = vst [vmem:[%s1609_s3 + $0xc0] sm:$0xff] %v955_v35  ;;  %v853_v37 = vadd.f32 %v1444_v49, %v539_v36  ;;  %v588_v38 = vpop.f32.mrf.mxu3  ;;  %v443_v39 = vpop.f32.mrf.mxu0 }
 0x109   :  { %v854_v40 = vadd.f32 %v1446_v50, %v588_v38  ;;  %v855_v43 = vadd.f32 %v1438_v41, %v443_v39  ;;  %v492_v44 = vpop.f32.mrf.mxu1 }
 0x10a   :  { %v917_v45 = vmax.f32 %v853_v37, 0.0  ;;  %v856_v46 = vadd.f32 %v1440_v42, %v492_v44 }
 0x10b   :  { %v918_v47 = vmax.f32 %v854_v40, 0.0  ;;  %v919_v48 = vmax.f32 %v855_v43, 0.0 }
 0x10c   :  { %v920_v51 = vmax.f32 %v856_v46, 0.0 }
 0x10d   :  { %v956_v52 = vpack.c.bf16 %v918_v47, %v917_v45 }
 0x10e   :  { %v957_v53 = vpack.c.bf16 %v920_v51, %v919_v48 }
 0x10f   :  { %988 = vst [vmem:[%s1609_s3 + $0xc8] sm:$0xff] %v956_v52  ;;  %v541_v54 = vpop.f32.mrf.mxu2 }
 0x110   :  { %989 = vst [vmem:[%s1609_s3 + $0xd0] sm:$0xff] %v957_v53  ;;  %v857_v55 = vadd.f32 %v1444_v49, %v541_v54  ;;  %v590_v56 = vpop.f32.mrf.mxu3  ;;  %v446_v57 = vpop.f32.mrf.mxu0 }
 0x111   :  { %v858_v58 = vadd.f32 %v1446_v50, %v590_v56  ;;  %v859_v59 = vadd.f32 %v1438_v41, %v446_v57  ;;  %v495_v60 = vpop.f32.mrf.mxu1 }
 0x112   :  { %v921_v61 = vmax.f32 %v857_v55, 0.0  ;;  %v860_v62 = vadd.f32 %v1440_v42, %v495_v60 }
 0x113   :  { %v922_v63 = vmax.f32 %v858_v58, 0.0  ;;  %v923_v0 = vmax.f32 %v859_v59, 0.0 }
 0x114   :  { %v924_v1 = vmax.f32 %v860_v62, 0.0 }
 0x115   :  { %v958_v2 = vpack.c.bf16 %v922_v63, %v921_v61 }
 0x116   :  { %v959_v3 = vpack.c.bf16 %v924_v1, %v923_v0 }
 0x117   :  { %990 = vst [vmem:[%s1609_s3 + $0xd8] sm:$0xff] %v958_v2  ;;  %v544_v4 = vpop.f32.mrf.mxu2 }
 0x118   :  { %991 = vst [vmem:[%s1609_s3 + $0xe0] sm:$0xff] %v959_v3  ;;  %v861_v5 = vadd.f32 %v1444_v49, %v544_v4  ;;  %v593_v6 = vpop.f32.mrf.mxu3  ;;  %v448_v7 = vpop.f32.mrf.mxu0 }
 0x119   :  { %v862_v8 = vadd.f32 %v1446_v50, %v593_v6  ;;  %v863_v9 = vadd.f32 %v1438_v41, %v448_v7  ;;  %v497_v10 = vpop.f32.mrf.mxu1 }
 0x11a   :  { %v925_v11 = vmax.f32 %v861_v5, 0.0  ;;  %v864_v12 = vadd.f32 %v1440_v42, %v497_v10 }
 0x11b   :  { %v926_v13 = vmax.f32 %v862_v8, 0.0  ;;  %v927_v14 = vmax.f32 %v863_v9, 0.0 }
 0x11c   :  { %v928_v15 = vmax.f32 %v864_v12, 0.0 }
 0x11d   :  { %v960_v16 = vpack.c.bf16 %v926_v13, %v925_v11 }
 0x11e   :  { %v961_v17 = vpack.c.bf16 %v928_v15, %v927_v14 }
 0x11f   :  { %992 = vst [vmem:[%s1609_s3 + $0xe8] sm:$0xff] %v960_v16  ;;  %v546_v18 = vpop.f32.mrf.mxu2 }
 0x120   :  { %993 = vst [vmem:[%s1609_s3 + $0xf0] sm:$0xff] %v961_v17  ;;  %v865_v41 = vadd.f32 %v1444_v49, %v546_v18  ;;  %v595_v19 = vpop.f32.mrf.mxu3 }
 0x121   :  { %v866_v20 = vadd.f32 %v1446_v50, %v595_v19 }
 0x122   :  { %v929_v42 = vmax.f32 %v865_v41, 0.0 }
 0x123   :  { %v930_v21 = vmax.f32 %v866_v20, 0.0 }
 0x125   :  { %v962_v22 = vpack.c.bf16 %v930_v21, %v929_v42 }
 0x127   :  { %994 = vst [vmem:[%s1609_s3 + $0xf8] sm:$0xff] %v962_v22 }

// kernel: gcn_forward.6
= control target key start
LH: loop header
LB: loop body
LE: loop exit
PB: predicated region body
PF: predicated region fallthrough
CT: control target
= control target key end

     0   :  { %s1385_s1 = inlined_call_operand.vmem [shape: bf16[128,512], index: 1, kind: input, shape index: {}]   ;;  %s1386_s0 = inlined_call_operand.vmem [shape: bf16[128,128], index: 0, kind: input, shape index: {}]   ;;  %s1387_s2 = inlined_call_operand.vmem [shape: bf16[128,512], index: 2, kind: output, shape index: {}]  }
   0x1   :  { %v1004_v0 = vld [vmem:[%s1385_s1 + $0xe0] sm:$0xf]  ;;  %v1056_v1 = vld [vmem:[%s1385_s1 + $0xec] sm:$0xf0]  ;;  %v1054_v2 = vld [vmem:[%s1385_s1 + $0xe4] sm:$0xf] }
   0x2   :  { %v1005_v3 = vor.u32 %v1056_v1, %v1004_v0  ;;  %v1006_v4 = vld [vmem:[%s1385_s1 + $0xf0] sm:$0xf0]  ;;  %v1012_v5 = vld [vmem:[%s1385_s1 + $0xe8] sm:$0xf]  ;;  %v1057_v6 = vld [vmem:[%s1385_s1 + $0xf4] sm:$0xf0] }
   0x3   :  { %v1009_v7 = vor.u32 %v1054_v2, %v1006_v4  ;;  %v1013_v8 = vor.u32 %v1057_v6, %v1012_v5  ;;  %v1055_v9 = vld [vmem:[%s1385_s1 + $0xec] sm:$0xf]  ;;  %v1014_v10 = vld [vmem:[%s1385_s1 + $0xf8] sm:$0xf0]  ;;  %v988_v11 = vld [vmem:[%s1385_s1 + $0xc0] sm:$0xf] }
   0x4   :  { %399 = vmatpush.bf16.msra.mxu0 %v1005_v3  ;;  %v1017_v12 = vor.u32 %v1055_v9, %v1014_v10  ;;  %v1052_v13 = vld [vmem:[%s1385_s1 + $0xcc] sm:$0xf0]  ;;  %v1050_v14 = vld [vmem:[%s1385_s1 + $0xc4] sm:$0xf]  ;;  %v990_v15 = vld [vmem:[%s1385_s1 + $0xd0] sm:$0xf0] }
   0x5   :  { %448 = vmatpush.bf16.msra.mxu1 %v1009_v7  ;;  %497 = vmatpush.bf16.msra.mxu2 %v1013_v8  ;;  %v989_v16 = vor.u32 %v1052_v13, %v988_v11  ;;  %v993_v17 = vor.u32 %v1050_v14, %v990_v15  ;;  %v996_v18 = vld [vmem:[%s1385_s1 + $0xc8] sm:$0xf]  ;;  %v1053_v19 = vld [vmem:[%s1385_s1 + $0xd4] sm:$0xf0]  ;;  %v1051_v20 = vld [vmem:[%s1385_s1 + $0xcc] sm:$0xf] }
   0x6   :  { %546 = vmatpush.bf16.msra.mxu3 %v1017_v12  ;;  %v997_v21 = vor.u32 %v1053_v19, %v996_v18  ;;  %v998_v22 = vld [vmem:[%s1385_s1 + $0xd8] sm:$0xf0]  ;;  %v972_v23 = vld [vmem:[%s1385_s1 + $0xa0] sm:$0xf]  ;;  %v1048_v24 = vld [vmem:[%s1385_s1 + $0xac] sm:$0xf0] }
   0x7   :  { %v1001_v25 = vor.u32 %v1051_v20, %v998_v22  ;;  %v1046_v26 = vld [vmem:[%s1385_s1 + $0xa4] sm:$0xf]  ;;  %v974_v27 = vld [vmem:[%s1385_s1 + $0xb0] sm:$0xf0]  ;;  %v980_v28 = vld [vmem:[%s1385_s1 + $0xa8] sm:$0xf]  ;;  %v973_v29 = vor.u32 %v1048_v24, %v972_v23 }
   0x8   :  { %400 = vmatpush.bf16.msra.mxu0 %v989_v16  ;;  %v1049_v30 = vld [vmem:[%s1385_s1 + $0xb4] sm:$0xf0]  ;;  %v1047_v31 = vld [vmem:[%s1385_s1 + $0xac] sm:$0xf]  ;;  %v982_v32 = vld [vmem:[%s1385_s1 + $0xb8] sm:$0xf0]  ;;  %v977_v33 = vor.u32 %v1046_v26, %v974_v27 }
   0x9   :  { %449 = vmatpush.bf16.msra.mxu1 %v993_v17  ;;  %498 = vmatpush.bf16.msra.mxu2 %v997_v21  ;;  %v981_v34 = vor.u32 %v1049_v30, %v980_v28  ;;  %v956_v35 = vld [vmem:[%s1385_s1 + $0x80] sm:$0xf]  ;;  %v1044_v36 = vld [vmem:[%s1385_s1 + $0x8c] sm:$0xf0]  ;;  %v1042_v37 = vld [vmem:[%s1385_s1 + $0x84] sm:$0xf]  ;;  %v985_v38 = vor.u32 %v1047_v31, %v982_v32 }
   0xa   :  { %547 = vmatpush.bf16.msra.mxu3 %v1001_v25  ;;  %v958_v39 = vld [vmem:[%s1385_s1 + $0x90] sm:$0xf0]  ;;  %v964_v40 = vld [vmem:[%s1385_s1 + $0x88] sm:$0xf]  ;;  %v1045_v41 = vld [vmem:[%s1385_s1 + $0x94] sm:$0xf0]  ;;  %v957_v44 = vor.u32 %v1044_v36, %v956_v35 }
   0xb   :  { %v1043_v42 = vld [vmem:[%s1385_s1 + $0x8c] sm:$0xf]  ;;  %v966_v43 = vld [vmem:[%s1385_s1 + $0x98] sm:$0xf0]  ;;  %v961_v45 = vor.u32 %v1042_v37, %v958_v39  ;;  %v965_v46 = vor.u32 %v1045_v41, %v964_v40  ;;  %v940_v47 = vld [vmem:[%s1385_s1 + $0x60] sm:$0xf] }
   0xc   :  { %401 = vmatpush.bf16.msra.mxu0 %v973_v29  ;;  %v1040_v48 = vld [vmem:[%s1385_s1 + $0x6c] sm:$0xf0]  ;;  %v1038_v49 = vld [vmem:[%s1385_s1 + $0x64] sm:$0xf]  ;;  %v969_v50 = vor.u32 %v1043_v42, %v966_v43  ;;  %v942_v51 = vld [vmem:[%s1385_s1 + $0x70] sm:$0xf0] }
   0xd   :  { %450 = vmatpush.bf16.msra.mxu1 %v977_v33  ;;  %499 = vmatpush.bf16.msra.mxu2 %v981_v34  ;;  %v948_v52 = vld [vmem:[%s1385_s1 + $0x68] sm:$0xf]  ;;  %v1041_v53 = vld [vmem:[%s1385_s1 + $0x74] sm:$0xf0]  ;;  %v1039_v54 = vld [vmem:[%s1385_s1 + $0x6c] sm:$0xf]  ;;  %v941_v56 = vor.u32 %v1040_v48, %v940_v47  ;;  %v945_v57 = vor.u32 %v1038_v49, %v942_v51 }
   0xe   :  { %548 = vmatpush.bf16.msra.mxu3 %v985_v38  ;;  %v950_v55 = vld [vmem:[%s1385_s1 + $0x78] sm:$0xf0]  ;;  %v949_v58 = vor.u32 %v1041_v53, %v948_v52  ;;  %v924_v59 = vld [vmem:[%s1385_s1 + $0x40] sm:$0xf]  ;;  %v1036_v60 = vld [vmem:[%s1385_s1 + $0x4c] sm:$0xf0] }
   0xf   :  { %v1034_v61 = vld [vmem:[%s1385_s1 + $0x44] sm:$0xf]  ;;  %v953_v62 = vor.u32 %v1039_v54, %v950_v55  ;;  %v926_v63 = vld [vmem:[%s1385_s1 + $0x50] sm:$0xf0]  ;;  %v932_v0 = vld [vmem:[%s1385_s1 + $0x48] sm:$0xf]  ;;  %v925_v4 = vor.u32 %v1036_v60, %v924_v59 }
  0x10   :  { %402 = vmatpush.bf16.msra.mxu0 %v957_v44  ;;  %v1037_v1 = vld [vmem:[%s1385_s1 + $0x54] sm:$0xf0]  ;;  %v1035_v2 = vld [vmem:[%s1385_s1 + $0x4c] sm:$0xf]  ;;  %v934_v3 = vld [vmem:[%s1385_s1 + $0x58] sm:$0xf0]  ;;  %v929_v5 = vor.u32 %v1034_v61, %v926_v63 }
  0x11   :  { %451 = vmatpush.bf16.msra.mxu1 %v961_v45  ;;  %500 = vmatpush.bf16.msra.mxu2 %v965_v46  ;;  %v933_v6 = vor.u32 %v1037_v1, %v932_v0  ;;  %v908_v7 = vld [vmem:[%s1385_s1 + $0x20] sm:$0xf]  ;;  %v1032_v8 = vld [vmem:[%s1385_s1 + $0x2c] sm:$0xf0]  ;;  %v1030_v9 = vld [vmem:[%s1385_s1 + $0x24] sm:$0xf]  ;;  %v937_v10 = vor.u32 %v1035_v2, %v934_v3 }
  0x12   :  { %549 = vmatpush.bf16.msra.mxu3 %v969_v50  ;;  %v910_v11 = vld [vmem:[%s1385_s1 + $0x30] sm:$0xf0]  ;;  %v916_v12 = vld [vmem:[%s1385_s1 + $0x28] sm:$0xf]  ;;  %v1033_v13 = vld [vmem:[%s1385_s1 + $0x34] sm:$0xf0]  ;;  %v909_v16 = vor.u32 %v1032_v8, %v908_v7 }
  0x13   :  { %v1031_v14 = vld [vmem:[%s1385_s1 + $0x2c] sm:$0xf]  ;;  %v918_v15 = vld [vmem:[%s1385_s1 + $0x38] sm:$0xf0]  ;;  %v913_v17 = vor.u32 %v1030_v9, %v910_v11  ;;  %v917_v18 = vor.u32 %v1033_v13, %v916_v12  ;;  %v892_v19 = vld [vmem:[%s1385_s1] sm:$0xf] }
  0x14   :  { %403 = vmatpush.bf16.msra.mxu0 %v941_v56  ;;  %v1028_v20 = vld [vmem:[%s1385_s1 + $0xc] sm:$0xf0]  ;;  %v1026_v21 = vld [vmem:[%s1385_s1 + $0x4] sm:$0xf]  ;;  %v921_v22 = vor.u32 %v1031_v14, %v918_v15  ;;  %v894_v23 = vld [vmem:[%s1385_s1 + $0x10] sm:$0xf0] }
  0x15   :  { %452 = vmatpush.bf16.msra.mxu1 %v945_v57  ;;  %501 = vmatpush.bf16.msra.mxu2 %v949_v58  ;;  %v900_v24 = vld [vmem:[%s1385_s1 + $0x8] sm:$0xf]  ;;  %v1029_v25 = vld [vmem:[%s1385_s1 + $0x14] sm:$0xf0]  ;;  %v1027_v26 = vld [vmem:[%s1385_s1 + $0xc] sm:$0xf]  ;;  %v893_v28 = vor.u32 %v1028_v20, %v892_v19  ;;  %v897_v29 = vor.u32 %v1026_v21, %v894_v23 }
  0x16   :  { %550 = vmatpush.bf16.msra.mxu3 %v953_v62  ;;  %v902_v27 = vld [vmem:[%s1385_s1 + $0x18] sm:$0xf0]  ;;  %v901_v30 = vor.u32 %v1029_v25, %v900_v24  ;;  %v1018_v32 = vld [vmem:[%s1386_s0] sm:$0xff]  ;;  %v1019_v33 = vld [vmem:[%s1386_s0 + $0x8] sm:$0xff] }
  0x17   :  { %v905_v31 = vor.u32 %v1027_v26, %v902_v27  ;;  %v1020_v34 = vld [vmem:[%s1386_s0 + $0x10] sm:$0xff]  ;;  %v1021_v35 = vld [vmem:[%s1386_s0 + $0x18] sm:$0xff]  ;;  %v1022_v36 = vld [vmem:[%s1386_s0 + $0x20] sm:$0xff] }
  0x18   :  { %404 = vmatpush.bf16.msra.mxu0 %v925_v4  ;;  %v1023_v37 = vld [vmem:[%s1386_s0 + $0x28] sm:$0xff]  ;;  %v1024_v38 = vld [vmem:[%s1386_s0 + $0x30] sm:$0xff]  ;;  %v1025_v39 = vld [vmem:[%s1386_s0 + $0x38] sm:$0xff] }
  0x19   :  { %453 = vmatpush.bf16.msra.mxu1 %v929_v5  ;;  %502 = vmatpush.bf16.msra.mxu2 %v933_v6 }
  0x1a   :  { %551 = vmatpush.bf16.msra.mxu3 %v937_v10 }
  0x1c   :  { %405 = vmatpush.bf16.msra.mxu0 %v909_v16 }
  0x1d   :  { %454 = vmatpush.bf16.msra.mxu1 %v913_v17  ;;  %503 = vmatpush.bf16.msra.mxu2 %v917_v18 }
  0x1e   :  { %552 = vmatpush.bf16.msra.mxu3 %v921_v22 }
  0x20   :  { %406 = vmatpush.bf16.msra.mxu0 %v893_v28 }
  0x21   :  { %455 = vmatpush.bf16.msra.mxu1 %v897_v29  ;;  %504 = vmatpush.bf16.msra.mxu2 %v901_v30 }
  0x22   :  { %553 = vmatpush.bf16.msra.mxu3 %v905_v31 }
  0x23   :  { %407 = vmatmul.bf16.vlgmr.msra.gmra.mxu0 %v1018_v32 }
  0x24   :  { %456 = vmatmul.bf16.vlgmr.msra.gmra.mxu1 %v1018_v32  ;;  %505 = vmatmul.bf16.vlgmr.msra.gmra.mxu2 %v1018_v32 }
  0x25   :  { %554 = vmatmul.bf16.vlgmr.msra.gmra.mxu3 %v1018_v32 }
  0x33   :  { %412 = vmatmul.bf16.gmra.mxu0 %v1019_v33 }
  0x34   :  { %461 = vmatmul.bf16.gmra.mxu1 %v1019_v33  ;;  %510 = vmatmul.bf16.gmra.mxu2 %v1019_v33 }
  0x35   :  { %559 = vmatmul.bf16.gmra.mxu3 %v1019_v33 }
  0x43   :  { %417 = vmatmul.bf16.gmra.mxu0 %v1020_v34 }
  0x44   :  { %466 = vmatmul.bf16.gmra.mxu1 %v1020_v34  ;;  %515 = vmatmul.bf16.gmra.mxu2 %v1020_v34 }
  0x45   :  { %564 = vmatmul.bf16.gmra.mxu3 %v1020_v34 }
  0x53   :  { %422 = vmatmul.bf16.gmra.mxu0 %v1021_v35 }
  0x54   :  { %471 = vmatmul.bf16.gmra.mxu1 %v1021_v35  ;;  %520 = vmatmul.bf16.gmra.mxu2 %v1021_v35 }
  0x55   :  { %569 = vmatmul.bf16.gmra.mxu3 %v1021_v35 }
  0x63   :  { %427 = vmatmul.bf16.gmra.mxu0 %v1022_v36 }
  0x64   :  { %476 = vmatmul.bf16.gmra.mxu1 %v1022_v36  ;;  %525 = vmatmul.bf16.gmra.mxu2 %v1022_v36 }
  0x65   :  { %574 = vmatmul.bf16.gmra.mxu3 %v1022_v36 }
  0x73   :  { %432 = vmatmul.bf16.gmra.mxu0 %v1023_v37 }
  0x74   :  { %481 = vmatmul.bf16.gmra.mxu1 %v1023_v37  ;;  %530 = vmatmul.bf16.gmra.mxu2 %v1023_v37 }
  0x75   :  { %579 = vmatmul.bf16.gmra.mxu3 %v1023_v37 }
  0x83   :  { %437 = vmatmul.bf16.gmra.mxu0 %v1024_v38 }
  0x84   :  { %486 = vmatmul.bf16.gmra.mxu1 %v1024_v38  ;;  %535 = vmatmul.bf16.gmra.mxu2 %v1024_v38 }
  0x85   :  { %584 = vmatmul.bf16.gmra.mxu3 %v1024_v38 }
  0x93   :  { %442 = vmatmul.bf16.gmra.mxu0 %v1025_v39 }
  0x94   :  { %491 = vmatmul.bf16.gmra.mxu1 %v1025_v39  ;;  %540 = vmatmul.bf16.gmra.mxu2 %v1025_v39 }
  0x95   :  { %589 = vmatmul.bf16.gmra.mxu3 %v1025_v39 }
  0xa0   :  { %v408_v40 = vpop.f32.mrf.mxu0 }
  0xa1   :  { %v457_v41 = vpop.f32.mrf.mxu1 }
  0xa2   :  { %v790_v42 = vpack.c.bf16 %v457_v41, %v408_v40 }
  0xa4   :  { %822 = vst [vmem:[%s1387_s2] sm:$0xff] %v790_v42 }
  0xa7   :  { %v506_v43 = vpop.f32.mrf.mxu2 }
  0xa8   :  { %v555_v44 = vpop.f32.mrf.mxu3  ;;  %v410_v45 = vpop.f32.mrf.mxu0 }
  0xa9   :  { %v791_v46 = vpack.c.bf16 %v555_v44, %v506_v43  ;;  %v459_v47 = vpop.f32.mrf.mxu1 }
  0xaa   :  { %v792_v48 = vpack.c.bf16 %v459_v47, %v410_v45 }
  0xab   :  { %823 = vst [vmem:[%s1387_s2 + $0x8] sm:$0xff] %v791_v46 }
  0xac   :  { %824 = vst [vmem:[%s1387_s2 + $0x10] sm:$0xff] %v792_v48 }
  0xaf   :  { %v508_v49 = vpop.f32.mrf.mxu2 }
  0xb0   :  { %v557_v50 = vpop.f32.mrf.mxu3  ;;  %v413_v51 = vpop.f32.mrf.mxu0 }
  0xb1   :  { %v793_v52 = vpack.c.bf16 %v557_v50, %v508_v49  ;;  %v462_v53 = vpop.f32.mrf.mxu1 }
  0xb2   :  { %v794_v54 = vpack.c.bf16 %v462_v53, %v413_v51 }
  0xb3   :  { %825 = vst [vmem:[%s1387_s2 + $0x18] sm:$0xff] %v793_v52 }
  0xb4   :  { %826 = vst [vmem:[%s1387_s2 + $0x20] sm:$0xff] %v794_v54 }
  0xb7   :  { %v511_v55 = vpop.f32.mrf.mxu2 }
  0xb8   :  { %v560_v56 = vpop.f32.mrf.mxu3  ;;  %v415_v57 = vpop.f32.mrf.mxu0 }
  0xb9   :  { %v795_v58 = vpack.c.bf16 %v560_v56, %v511_v55  ;;  %v464_v59 = vpop.f32.mrf.mxu1 }
  0xba   :  { %v796_v60 = vpack.c.bf16 %v464_v59, %v415_v57 }
  0xbb   :  { %827 = vst [vmem:[%s1387_s2 + $0x28] sm:$0xff] %v795_v58 }
  0xbc   :  { %828 = vst [vmem:[%s1387_s2 + $0x30] sm:$0xff] %v796_v60 }
  0xbf   :  { %v513_v61 = vpop.f32.mrf.mxu2 }
  0xc0   :  { %v562_v62 = vpop.f32.mrf.mxu3  ;;  %v418_v63 = vpop.f32.mrf.mxu0 }
  0xc1   :  { %v797_v0 = vpack.c.bf16 %v562_v62, %v513_v61  ;;  %v467_v1 = vpop.f32.mrf.mxu1 }
  0xc2   :  { %v798_v2 = vpack.c.bf16 %v467_v1, %v418_v63 }
  0xc3   :  { %829 = vst [vmem:[%s1387_s2 + $0x38] sm:$0xff] %v797_v0 }
  0xc4   :  { %830 = vst [vmem:[%s1387_s2 + $0x40] sm:$0xff] %v798_v2 }
  0xc7   :  { %v516_v3 = vpop.f32.mrf.mxu2 }
  0xc8   :  { %v565_v4 = vpop.f32.mrf.mxu3  ;;  %v420_v5 = vpop.f32.mrf.mxu0 }
  0xc9   :  { %v799_v6 = vpack.c.bf16 %v565_v4, %v516_v3  ;;  %v469_v7 = vpop.f32.mrf.mxu1 }
  0xca   :  { %v800_v8 = vpack.c.bf16 %v469_v7, %v420_v5 }
  0xcb   :  { %831 = vst [vmem:[%s1387_s2 + $0x48] sm:$0xff] %v799_v6 }
  0xcc   :  { %832 = vst [vmem:[%s1387_s2 + $0x50] sm:$0xff] %v800_v8 }
  0xcf   :  { %v518_v9 = vpop.f32.mrf.mxu2 }
  0xd0   :  { %v567_v10 = vpop.f32.mrf.mxu3  ;;  %v423_v11 = vpop.f32.mrf.mxu0 }
  0xd1   :  { %v801_v12 = vpack.c.bf16 %v567_v10, %v518_v9  ;;  %v472_v13 = vpop.f32.mrf.mxu1 }
  0xd2   :  { %v802_v14 = vpack.c.bf16 %v472_v13, %v423_v11 }
  0xd3   :  { %833 = vst [vmem:[%s1387_s2 + $0x58] sm:$0xff] %v801_v12 }
  0xd4   :  { %834 = vst [vmem:[%s1387_s2 + $0x60] sm:$0xff] %v802_v14 }
  0xd7   :  { %v521_v15 = vpop.f32.mrf.mxu2 }
  0xd8   :  { %v570_v16 = vpop.f32.mrf.mxu3  ;;  %v425_v17 = vpop.f32.mrf.mxu0 }
  0xd9   :  { %v803_v18 = vpack.c.bf16 %v570_v16, %v521_v15  ;;  %v474_v19 = vpop.f32.mrf.mxu1 }
  0xda   :  { %v804_v20 = vpack.c.bf16 %v474_v19, %v425_v17 }
  0xdb   :  { %835 = vst [vmem:[%s1387_s2 + $0x68] sm:$0xff] %v803_v18 }
  0xdc   :  { %836 = vst [vmem:[%s1387_s2 + $0x70] sm:$0xff] %v804_v20 }
  0xdf   :  { %v523_v21 = vpop.f32.mrf.mxu2 }
  0xe0   :  { %v572_v22 = vpop.f32.mrf.mxu3  ;;  %v428_v23 = vpop.f32.mrf.mxu0 }
  0xe1   :  { %v805_v24 = vpack.c.bf16 %v572_v22, %v523_v21  ;;  %v477_v25 = vpop.f32.mrf.mxu1 }
  0xe2   :  { %v806_v26 = vpack.c.bf16 %v477_v25, %v428_v23 }
  0xe3   :  { %837 = vst [vmem:[%s1387_s2 + $0x78] sm:$0xff] %v805_v24 }
  0xe4   :  { %838 = vst [vmem:[%s1387_s2 + $0x80] sm:$0xff] %v806_v26 }
  0xe7   :  { %v526_v27 = vpop.f32.mrf.mxu2 }
  0xe8   :  { %v575_v28 = vpop.f32.mrf.mxu3  ;;  %v430_v29 = vpop.f32.mrf.mxu0 }
  0xe9   :  { %v807_v30 = vpack.c.bf16 %v575_v28, %v526_v27  ;;  %v479_v31 = vpop.f32.mrf.mxu1 }
  0xea   :  { %v808_v32 = vpack.c.bf16 %v479_v31, %v430_v29 }
  0xeb   :  { %839 = vst [vmem:[%s1387_s2 + $0x88] sm:$0xff] %v807_v30 }
  0xec   :  { %840 = vst [vmem:[%s1387_s2 + $0x90] sm:$0xff] %v808_v32 }
  0xef   :  { %v528_v33 = vpop.f32.mrf.mxu2 }
  0xf0   :  { %v577_v34 = vpop.f32.mrf.mxu3  ;;  %v433_v35 = vpop.f32.mrf.mxu0 }
  0xf1   :  { %v809_v36 = vpack.c.bf16 %v577_v34, %v528_v33  ;;  %v482_v37 = vpop.f32.mrf.mxu1 }
  0xf2   :  { %v810_v38 = vpack.c.bf16 %v482_v37, %v433_v35 }
  0xf3   :  { %841 = vst [vmem:[%s1387_s2 + $0x98] sm:$0xff] %v809_v36 }
  0xf4   :  { %842 = vst [vmem:[%s1387_s2 + $0xa0] sm:$0xff] %v810_v38 }
  0xf7   :  { %v531_v39 = vpop.f32.mrf.mxu2 }
  0xf8   :  { %v580_v40 = vpop.f32.mrf.mxu3  ;;  %v435_v41 = vpop.f32.mrf.mxu0 }
  0xf9   :  { %v811_v42 = vpack.c.bf16 %v580_v40, %v531_v39  ;;  %v484_v43 = vpop.f32.mrf.mxu1 }
  0xfa   :  { %v812_v44 = vpack.c.bf16 %v484_v43, %v435_v41 }
  0xfb   :  { %843 = vst [vmem:[%s1387_s2 + $0xa8] sm:$0xff] %v811_v42 }
  0xfc   :  { %844 = vst [vmem:[%s1387_s2 + $0xb0] sm:$0xff] %v812_v44 }
  0xff   :  { %v533_v45 = vpop.f32.mrf.mxu2 }
 0x100   :  { %v582_v46 = vpop.f32.mrf.mxu3  ;;  %v438_v47 = vpop.f32.mrf.mxu0 }
 0x101   :  { %v813_v48 = vpack.c.bf16 %v582_v46, %v533_v45  ;;  %v487_v49 = vpop.f32.mrf.mxu1 }
 0x102   :  { %v814_v50 = vpack.c.bf16 %v487_v49, %v438_v47 }
 0x103   :  { %845 = vst [vmem:[%s1387_s2 + $0xb8] sm:$0xff] %v813_v48 }
 0x104   :  { %846 = vst [vmem:[%s1387_s2 + $0xc0] sm:$0xff] %v814_v50 }
 0x107   :  { %v536_v51 = vpop.f32.mrf.mxu2 }
 0x108   :  { %v585_v52 = vpop.f32.mrf.mxu3  ;;  %v440_v53 = vpop.f32.mrf.mxu0 }
 0x109   :  { %v815_v54 = vpack.c.bf16 %v585_v52, %v536_v51  ;;  %v489_v55 = vpop.f32.mrf.mxu1 }
 0x10a   :  { %v816_v56 = vpack.c.bf16 %v489_v55, %v440_v53 }
 0x10b   :  { %847 = vst [vmem:[%s1387_s2 + $0xc8] sm:$0xff] %v815_v54 }
 0x10c   :  { %848 = vst [vmem:[%s1387_s2 + $0xd0] sm:$0xff] %v816_v56 }
 0x10f   :  { %v538_v57 = vpop.f32.mrf.mxu2 }
 0x110   :  { %v587_v58 = vpop.f32.mrf.mxu3  ;;  %v443_v59 = vpop.f32.mrf.mxu0 }
 0x111   :  { %v817_v60 = vpack.c.bf16 %v587_v58, %v538_v57  ;;  %v492_v61 = vpop.f32.mrf.mxu1 }
 0x112   :  { %v818_v62 = vpack.c.bf16 %v492_v61, %v443_v59 }
 0x113   :  { %849 = vst [vmem:[%s1387_s2 + $0xd8] sm:$0xff] %v817_v60 }
 0x114   :  { %850 = vst [vmem:[%s1387_s2 + $0xe0] sm:$0xff] %v818_v62 }
 0x117   :  { %v541_v63 = vpop.f32.mrf.mxu2 }
 0x118   :  { %v590_v0 = vpop.f32.mrf.mxu3  ;;  %v445_v1 = vpop.f32.mrf.mxu0 }
 0x119   :  { %v819_v2 = vpack.c.bf16 %v590_v0, %v541_v63  ;;  %v494_v3 = vpop.f32.mrf.mxu1 }
 0x11a   :  { %v820_v4 = vpack.c.bf16 %v494_v3, %v445_v1 }
 0x11b   :  { %851 = vst [vmem:[%s1387_s2 + $0xe8] sm:$0xff] %v819_v2 }
 0x11c   :  { %852 = vst [vmem:[%s1387_s2 + $0xf0] sm:$0xff] %v820_v4 }
 0x11f   :  { %v543_v5 = vpop.f32.mrf.mxu2 }
 0x120   :  { %v592_v6 = vpop.f32.mrf.mxu3 }
 0x121   :  { %v821_v7 = vpack.c.bf16 %v592_v6, %v543_v5 }
 0x123   :  { %853 = vst [vmem:[%s1387_s2 + $0xf8] sm:$0xff] %v821_v7 }

// kernel: gcn_forward.10
= control target key start
LH: loop header
LB: loop body
LE: loop exit
PB: predicated region body
PF: predicated region fallthrough
CT: control target
= control target key end

     0   :  { %s862_s1 = inlined_call_operand.vmem [shape: bf16[256,128], index: 1, kind: input, shape index: {}]   ;;  %s863_s0 = inlined_call_operand.vmem [shape: bf16[128,256], index: 0, kind: input, shape index: {}]   ;;  %s864_s2 = inlined_call_operand.vmem [shape: bf16[128,128], index: 2, kind: output, shape index: {}]  }
   0x1   :  { %v607_v0 = vld [vmem:[%s862_s1 + $0x38] sm:$0xff]  ;;  %v606_v2 = vld [vmem:[%s862_s1 + $0x30] sm:$0xff]  ;;  %v605_v4 = vld [vmem:[%s862_s1 + $0x28] sm:$0xff] }
   0x2   :  { %v615_v1 = vld [vmem:[%s862_s1 + $0x78] sm:$0xff]  ;;  %271 = vmatpush.bf16.msra.mxu0 %v607_v0  ;;  %663 = vmatpush.bf16.msra.mxu2 %v607_v0  ;;  %v614_v3 = vld [vmem:[%s862_s1 + $0x70] sm:$0xff]  ;;  %v613_v5 = vld [vmem:[%s862_s1 + $0x68] sm:$0xff] }
   0x3   :  { %320 = vmatpush.bf16.msra.mxu1 %v615_v1  ;;  %671 = vmatpush.bf16.msra.mxu3 %v615_v1  ;;  %v604_v6 = vld [vmem:[%s862_s1 + $0x20] sm:$0xff]  ;;  %v603_v8 = vld [vmem:[%s862_s1 + $0x18] sm:$0xff]  ;;  %v602_v10 = vld [vmem:[%s862_s1 + $0x10] sm:$0xff] }
   0x4   :  { %v612_v7 = vld [vmem:[%s862_s1 + $0x60] sm:$0xff]  ;;  %v611_v9 = vld [vmem:[%s862_s1 + $0x58] sm:$0xff]  ;;  %v610_v11 = vld [vmem:[%s862_s1 + $0x50] sm:$0xff] }
   0x5   :  { %v601_v12 = vld [vmem:[%s862_s1 + $0x8] sm:$0xff]  ;;  %v600_v14 = vld [vmem:[%s862_s1] sm:$0xff]  ;;  %v466_v28 = vld [vmem:[%s863_s0 + $0x10] sm:$0xf] }
   0x6   :  { %272 = vmatpush.bf16.msra.mxu0 %v606_v2  ;;  %664 = vmatpush.bf16.msra.mxu2 %v606_v2  ;;  %v609_v13 = vld [vmem:[%s862_s1 + $0x48] sm:$0xff]  ;;  %v608_v15 = vld [vmem:[%s862_s1 + $0x40] sm:$0xff]  ;;  %v587_v29 = vld [vmem:[%s863_s0 + $0x14] sm:$0xf0] }
   0x7   :  { %321 = vmatpush.bf16.msra.mxu1 %v614_v3  ;;  %672 = vmatpush.bf16.msra.mxu3 %v614_v3  ;;  %v458_v16 = vld [vmem:[%s863_s0] sm:$0xf]  ;;  %v585_v17 = vld [vmem:[%s863_s0 + $0x4] sm:$0xf0]  ;;  %v584_v20 = vld [vmem:[%s863_s0 + $0x4] sm:$0xf]  ;;  %v467_v36 = vor.u32 %v587_v29, %v466_v28 }
   0x8   :  { %v490_v18 = vld [vmem:[%s863_s0 + $0x40] sm:$0xf]  ;;  %v593_v19 = vld [vmem:[%s863_s0 + $0x44] sm:$0xf0]  ;;  %v460_v21 = vld [vmem:[%s863_s0 + $0x8] sm:$0xf0]  ;;  %v459_v24 = vor.u32 %v585_v17, %v458_v16 }
   0x9   :  { %v592_v22 = vld [vmem:[%s863_s0 + $0x44] sm:$0xf]  ;;  %v492_v23 = vld [vmem:[%s863_s0 + $0x48] sm:$0xf0]  ;;  %v491_v25 = vor.u32 %v593_v19, %v490_v18  ;;  %v463_v26 = vor.u32 %v584_v20, %v460_v21  ;;  %v498_v30 = vld [vmem:[%s863_s0 + $0x50] sm:$0xf] }
   0xa   :  { %273 = vmatpush.bf16.msra.mxu0 %v605_v4  ;;  %665 = vmatpush.bf16.msra.mxu2 %v605_v4  ;;  %v495_v27 = vor.u32 %v592_v22, %v492_v23  ;;  %v595_v31 = vld [vmem:[%s863_s0 + $0x54] sm:$0xf0]  ;;  %v586_v32 = vld [vmem:[%s863_s0 + $0x14] sm:$0xf]  ;;  %v468_v33 = vld [vmem:[%s863_s0 + $0x18] sm:$0xf0] }
   0xb   :  { %322 = vmatpush.bf16.msra.mxu1 %v613_v5  ;;  %673 = vmatpush.bf16.msra.mxu3 %v613_v5  ;;  %v594_v34 = vld [vmem:[%s863_s0 + $0x54] sm:$0xf]  ;;  %v500_v35 = vld [vmem:[%s863_s0 + $0x58] sm:$0xf0]  ;;  %v499_v37 = vor.u32 %v595_v31, %v498_v30  ;;  %v471_v38 = vor.u32 %v586_v32, %v468_v33  ;;  %v474_v40 = vld [vmem:[%s863_s0 + $0x20] sm:$0xf] }
   0xc   :  { %v503_v39 = vor.u32 %v594_v34, %v500_v35  ;;  %v589_v41 = vld [vmem:[%s863_s0 + $0x24] sm:$0xf0]  ;;  %v506_v42 = vld [vmem:[%s863_s0 + $0x60] sm:$0xf]  ;;  %v588_v44 = vld [vmem:[%s863_s0 + $0x24] sm:$0xf] }
   0xd   :  { %v597_v43 = vld [vmem:[%s863_s0 + $0x64] sm:$0xf0]  ;;  %v476_v45 = vld [vmem:[%s863_s0 + $0x28] sm:$0xf0]  ;;  %v596_v46 = vld [vmem:[%s863_s0 + $0x64] sm:$0xf]  ;;  %v475_v48 = vor.u32 %v589_v41, %v474_v40 }
   0xe   :  { %274 = vmatpush.bf16.msra.mxu0 %v604_v6  ;;  %666 = vmatpush.bf16.msra.mxu2 %v604_v6  ;;  %v508_v47 = vld [vmem:[%s863_s0 + $0x68] sm:$0xf0]  ;;  %v507_v49 = vor.u32 %v597_v43, %v506_v42  ;;  %v479_v50 = vor.u32 %v588_v44, %v476_v45  ;;  %v482_v52 = vld [vmem:[%s863_s0 + $0x30] sm:$0xf]  ;;  %v591_v53 = vld [vmem:[%s863_s0 + $0x34] sm:$0xf0] }
   0xf   :  { %323 = vmatpush.bf16.msra.mxu1 %v612_v7  ;;  %674 = vmatpush.bf16.msra.mxu3 %v612_v7  ;;  %v511_v51 = vor.u32 %v596_v46, %v508_v47  ;;  %v514_v54 = vld [vmem:[%s863_s0 + $0x70] sm:$0xf]  ;;  %v599_v55 = vld [vmem:[%s863_s0 + $0x74] sm:$0xf0]  ;;  %v590_v56 = vld [vmem:[%s863_s0 + $0x34] sm:$0xf]  ;;  %v483_v60 = vor.u32 %v591_v53, %v482_v52 }
  0x10   :  { %v484_v57 = vld [vmem:[%s863_s0 + $0x38] sm:$0xf0]  ;;  %v598_v58 = vld [vmem:[%s863_s0 + $0x74] sm:$0xf]  ;;  %v515_v61 = vor.u32 %v599_v55, %v514_v54 }
  0x11   :  { %v516_v59 = vld [vmem:[%s863_s0 + $0x78] sm:$0xf0]  ;;  %v487_v62 = vor.u32 %v590_v56, %v484_v57 }
  0x12   :  { %275 = vmatpush.bf16.msra.mxu0 %v603_v8  ;;  %667 = vmatpush.bf16.msra.mxu2 %v603_v8  ;;  %v519_v63 = vor.u32 %v598_v58, %v516_v59 }
  0x13   :  { %324 = vmatpush.bf16.msra.mxu1 %v611_v9  ;;  %675 = vmatpush.bf16.msra.mxu3 %v611_v9 }
  0x16   :  { %276 = vmatpush.bf16.msra.mxu0 %v602_v10  ;;  %668 = vmatpush.bf16.msra.mxu2 %v602_v10 }
  0x17   :  { %325 = vmatpush.bf16.msra.mxu1 %v610_v11  ;;  %676 = vmatpush.bf16.msra.mxu3 %v610_v11 }
  0x1a   :  { %277 = vmatpush.bf16.msra.mxu0 %v601_v12  ;;  %669 = vmatpush.bf16.msra.mxu2 %v601_v12 }
  0x1b   :  { %326 = vmatpush.bf16.msra.mxu1 %v609_v13  ;;  %677 = vmatpush.bf16.msra.mxu3 %v609_v13 }
  0x1e   :  { %278 = vmatpush.bf16.msra.mxu0 %v600_v14  ;;  %670 = vmatpush.bf16.msra.mxu2 %v600_v14 }
  0x1f   :  { %327 = vmatpush.bf16.msra.mxu1 %v608_v15  ;;  %678 = vmatpush.bf16.msra.mxu3 %v608_v15 }
  0x21   :  { %279 = vmatmul.bf16.vlgmr.msra.gmra.mxu0 %v459_v24  ;;  %299 = vmatmul.bf16.vlgmr.msra.gmra.mxu2 %v491_v25 }
  0x22   :  { %328 = vmatmul.bf16.vlgmr.msra.gmra.mxu1 %v463_v26  ;;  %348 = vmatmul.bf16.vlgmr.msra.gmra.mxu3 %v495_v27 }
  0x31   :  { %284 = vmatmul.bf16.gmra.mxu0 %v467_v36  ;;  %304 = vmatmul.bf16.gmra.mxu2 %v499_v37 }
  0x32   :  { %333 = vmatmul.bf16.gmra.mxu1 %v471_v38  ;;  %353 = vmatmul.bf16.gmra.mxu3 %v503_v39 }
  0x41   :  { %289 = vmatmul.bf16.gmra.mxu0 %v475_v48  ;;  %309 = vmatmul.bf16.gmra.mxu2 %v507_v49 }
  0x42   :  { %338 = vmatmul.bf16.gmra.mxu1 %v479_v50  ;;  %358 = vmatmul.bf16.gmra.mxu3 %v511_v51 }
  0x51   :  { %294 = vmatmul.bf16.gmra.mxu0 %v483_v60  ;;  %314 = vmatmul.bf16.gmra.mxu2 %v515_v61 }
  0x52   :  { %343 = vmatmul.bf16.gmra.mxu1 %v487_v62  ;;  %363 = vmatmul.bf16.gmra.mxu3 %v519_v63 }
  0x9e   :  { %v280_v0 = vpop.f32.mrf.mxu0 }
  0x9f   :  { %v329_v1 = vpop.f32.mrf.mxu1 }
  0xa0   :  { %v330_v6 = vadd.f32 %v329_v1, %v280_v0 }
  0xa4   :  { %v300_v2 = vpop.f32.mrf.mxu2 }
  0xa5   :  { %v349_v3 = vpop.f32.mrf.mxu3 }
  0xa6   :  { %v282_v4 = vpop.f32.mrf.mxu0  ;;  %v350_v11 = vadd.f32 %v349_v3, %v300_v2 }
  0xa7   :  { %v331_v5 = vpop.f32.mrf.mxu1 }
  0xa8   :  { %v332_v7 = vadd.f32 %v331_v5, %v282_v4 }
  0xaa   :  { %v619_v8 = vpack.c.bf16 %v332_v7, %v330_v6 }
  0xac   :  { %620 = vst [vmem:[%s864_s2] sm:$0xff] %v619_v8   ;;  %v302_v9 = vpop.f32.mrf.mxu2 }
  0xad   :  { %v351_v10 = vpop.f32.mrf.mxu3 }
  0xae   :  { %v352_v12 = vadd.f32 %v351_v10, %v302_v9  ;;  %v285_v13 = vpop.f32.mrf.mxu0 }
  0xaf   :  { %v334_v14 = vpop.f32.mrf.mxu1 }
  0xb0   :  { %v639_v15 = vpack.c.bf16 %v352_v12, %v350_v11  ;;  %v335_v20 = vadd.f32 %v334_v14, %v285_v13 }
  0xb2   :  { %659 = vst [vmem:[%s864_s2 + $0x20] sm:$0xff] %v639_v15  }
  0xb4   :  { %v305_v16 = vpop.f32.mrf.mxu2 }
  0xb5   :  { %v354_v17 = vpop.f32.mrf.mxu3 }
  0xb6   :  { %v287_v18 = vpop.f32.mrf.mxu0  ;;  %v355_v25 = vadd.f32 %v354_v17, %v305_v16 }
  0xb7   :  { %v336_v19 = vpop.f32.mrf.mxu1 }
  0xb8   :  { %v337_v21 = vadd.f32 %v336_v19, %v287_v18 }
  0xba   :  { %v624_v22 = vpack.c.bf16 %v337_v21, %v335_v20 }
  0xbc   :  { %656 = vst [vmem:[%s864_s2 + $0x8] sm:$0xff] %v624_v22   ;;  %v307_v23 = vpop.f32.mrf.mxu2 }
  0xbd   :  { %v356_v24 = vpop.f32.mrf.mxu3 }
  0xbe   :  { %v357_v26 = vadd.f32 %v356_v24, %v307_v23  ;;  %v290_v27 = vpop.f32.mrf.mxu0 }
  0xbf   :  { %v339_v28 = vpop.f32.mrf.mxu1 }
  0xc0   :  { %v644_v29 = vpack.c.bf16 %v357_v26, %v355_v25  ;;  %v340_v34 = vadd.f32 %v339_v28, %v290_v27 }
  0xc2   :  { %660 = vst [vmem:[%s864_s2 + $0x28] sm:$0xff] %v644_v29  }
  0xc4   :  { %v310_v30 = vpop.f32.mrf.mxu2 }
  0xc5   :  { %v359_v31 = vpop.f32.mrf.mxu3 }
  0xc6   :  { %v292_v32 = vpop.f32.mrf.mxu0  ;;  %v360_v39 = vadd.f32 %v359_v31, %v310_v30 }
  0xc7   :  { %v341_v33 = vpop.f32.mrf.mxu1 }
  0xc8   :  { %v342_v35 = vadd.f32 %v341_v33, %v292_v32 }
  0xca   :  { %v629_v36 = vpack.c.bf16 %v342_v35, %v340_v34 }
  0xcc   :  { %657 = vst [vmem:[%s864_s2 + $0x10] sm:$0xff] %v629_v36   ;;  %v312_v37 = vpop.f32.mrf.mxu2 }
  0xcd   :  { %v361_v38 = vpop.f32.mrf.mxu3 }
  0xce   :  { %v362_v40 = vadd.f32 %v361_v38, %v312_v37  ;;  %v295_v41 = vpop.f32.mrf.mxu0 }
  0xcf   :  { %v344_v42 = vpop.f32.mrf.mxu1 }
  0xd0   :  { %v649_v43 = vpack.c.bf16 %v362_v40, %v360_v39  ;;  %v345_v48 = vadd.f32 %v344_v42, %v295_v41 }
  0xd2   :  { %661 = vst [vmem:[%s864_s2 + $0x30] sm:$0xff] %v649_v43  }
  0xd4   :  { %v315_v44 = vpop.f32.mrf.mxu2 }
  0xd5   :  { %v364_v45 = vpop.f32.mrf.mxu3 }
  0xd6   :  { %v297_v46 = vpop.f32.mrf.mxu0  ;;  %v365_v53 = vadd.f32 %v364_v45, %v315_v44 }
  0xd7   :  { %v346_v47 = vpop.f32.mrf.mxu1 }
  0xd8   :  { %v347_v49 = vadd.f32 %v346_v47, %v297_v46 }
  0xda   :  { %v634_v50 = vpack.c.bf16 %v347_v49, %v345_v48 }
  0xdc   :  { %658 = vst [vmem:[%s864_s2 + $0x18] sm:$0xff] %v634_v50   ;;  %v317_v51 = vpop.f32.mrf.mxu2 }
  0xdd   :  { %v366_v52 = vpop.f32.mrf.mxu3 }
  0xde   :  { %v367_v54 = vadd.f32 %v366_v52, %v317_v51 }
  0xe0   :  { %v654_v55 = vpack.c.bf16 %v367_v54, %v365_v53 }
  0xe2   :  { %662 = vst [vmem:[%s864_s2 + $0x38] sm:$0xff] %v654_v55  }

// kernel: gcn_forward.11
= control target key start
LH: loop header
LB: loop body
LE: loop exit
PB: predicated region body
PF: predicated region fallthrough
CT: control target
= control target key end

     0   :  { %s759_s1 = inlined_call_operand.vmem [shape: bf16[128,128], index: 1, kind: input, shape index: {}]   ;;  %s760_s2 = inlined_call_operand.vmem [shape: f32[1,128], index: 2, kind: input, shape index: {}]   ;;  %s761_s0 = inlined_call_operand.vmem [shape: bf16[128,128], index: 0, kind: input, shape index: {}]   ;;  %s762_s3 = inlined_call_operand.vmem [shape: bf16[128,128], index: 3, kind: input, shape index: {}]   ;;  %s763_s4 = inlined_call_operand.vmem [shape: f32[1,128], index: 4, kind: input, shape index: {}]   ;;  %s764_s5 = inlined_call_operand.vmem [shape: f32[128,128], index: 5, kind: output, shape index: {}]  }
   0x1   :  { %v576_v0 = vld [vmem:[%s759_s1 + $0x38] sm:$0xff]  ;;  %v575_v1 = vld [vmem:[%s759_s1 + $0x30] sm:$0xff]  ;;  %v574_v2 = vld [vmem:[%s759_s1 + $0x28] sm:$0xff] }
   0x2   :  { %184 = vmatpush.bf16.msra.mxu0 %v576_v0  ;;  %585 = vmatpush.bf16.msra.mxu2 %v576_v0  ;;  %v573_v3 = vld [vmem:[%s759_s1 + $0x20] sm:$0xff]  ;;  %v572_v4 = vld [vmem:[%s759_s1 + $0x18] sm:$0xff]  ;;  %v571_v5 = vld [vmem:[%s759_s1 + $0x10] sm:$0xff] }
   0x3   :  { %v570_v6 = vld [vmem:[%s759_s1 + $0x8] sm:$0xff]  ;;  %v569_v7 = vld [vmem:[%s759_s1] sm:$0xff]  ;;  %v584_v12 = vld [vmem:[%s762_s3 + $0x38] sm:$0xff] }
   0x4   :  { %v561_v8 = vld [vmem:[%s761_s0] sm:$0xff]  ;;  %v562_v10 = vld [vmem:[%s761_s0 + $0x8] sm:$0xff]  ;;  %396 = vmatpush.bf16.msra.mxu1 %v584_v12  ;;  %v583_v13 = vld [vmem:[%s762_s3 + $0x30] sm:$0xff]  ;;  %593 = vmatpush.bf16.msra.mxu3 %v584_v12 }
   0x5   :  { %v565_v9 = vld [vmem:[%s761_s0 + $0x20] sm:$0xff]  ;;  %v566_v11 = vld [vmem:[%s761_s0 + $0x28] sm:$0xff]  ;;  %v563_v16 = vld [vmem:[%s761_s0 + $0x10] sm:$0xff] }
   0x6   :  { %185 = vmatpush.bf16.msra.mxu0 %v575_v1  ;;  %586 = vmatpush.bf16.msra.mxu2 %v575_v1  ;;  %v582_v14 = vld [vmem:[%s762_s3 + $0x28] sm:$0xff]  ;;  %v581_v15 = vld [vmem:[%s762_s3 + $0x20] sm:$0xff]  ;;  %v567_v17 = vld [vmem:[%s761_s0 + $0x30] sm:$0xff] }
   0x7   :  { %v564_v18 = vld [vmem:[%s761_s0 + $0x18] sm:$0xff]  ;;  %v579_v21 = vld [vmem:[%s762_s3 + $0x10] sm:$0xff]  ;;  %v578_v22 = vld [vmem:[%s762_s3 + $0x8] sm:$0xff] }
   0x8   :  { %397 = vmatpush.bf16.msra.mxu1 %v583_v13  ;;  %594 = vmatpush.bf16.msra.mxu3 %v583_v13  ;;  %v568_v19 = vld [vmem:[%s761_s0 + $0x38] sm:$0xff]  ;;  %v577_v23 = vld [vmem:[%s762_s3] sm:$0xff] }
   0x9   :  { %v580_v20 = vld [vmem:[%s762_s3 + $0x18] sm:$0xff]  ;;  %v601_v25 = vld [vmem:[%s760_s2] ss:$0 sm:$0xff] }
   0xa   :  { %186 = vmatpush.bf16.msra.mxu0 %v574_v2  ;;  %587 = vmatpush.bf16.msra.mxu2 %v574_v2 }
   0xc   :  { %398 = vmatpush.bf16.msra.mxu1 %v582_v14  ;;  %595 = vmatpush.bf16.msra.mxu3 %v582_v14 }
   0xe   :  { %187 = vmatpush.bf16.msra.mxu0 %v573_v3  ;;  %588 = vmatpush.bf16.msra.mxu2 %v573_v3 }
  0x10   :  { %399 = vmatpush.bf16.msra.mxu1 %v581_v15  ;;  %596 = vmatpush.bf16.msra.mxu3 %v581_v15 }
  0x12   :  { %188 = vmatpush.bf16.msra.mxu0 %v572_v4  ;;  %589 = vmatpush.bf16.msra.mxu2 %v572_v4 }
  0x14   :  { %400 = vmatpush.bf16.msra.mxu1 %v580_v20  ;;  %597 = vmatpush.bf16.msra.mxu3 %v580_v20 }
  0x16   :  { %189 = vmatpush.bf16.msra.mxu0 %v571_v5  ;;  %590 = vmatpush.bf16.msra.mxu2 %v571_v5 }
  0x18   :  { %401 = vmatpush.bf16.msra.mxu1 %v579_v21  ;;  %598 = vmatpush.bf16.msra.mxu3 %v579_v21 }
  0x1a   :  { %190 = vmatpush.bf16.msra.mxu0 %v570_v6  ;;  %591 = vmatpush.bf16.msra.mxu2 %v570_v6 }
  0x1c   :  { %402 = vmatpush.bf16.msra.mxu1 %v578_v22  ;;  %599 = vmatpush.bf16.msra.mxu3 %v578_v22 }
  0x1e   :  { %191 = vmatpush.bf16.msra.mxu0 %v569_v7  ;;  %592 = vmatpush.bf16.msra.mxu2 %v569_v7 }
  0x20   :  { %403 = vmatpush.bf16.msra.mxu1 %v577_v23  ;;  %600 = vmatpush.bf16.msra.mxu3 %v577_v23 }
  0x21   :  { %192 = vmatmul.bf16.vlgmr.msra.gmra.mxu0 %v561_v8  ;;  %212 = vmatmul.bf16.vlgmr.msra.gmra.mxu2 %v565_v9 }
  0x31   :  { %197 = vmatmul.bf16.gmra.mxu0 %v562_v10  ;;  %217 = vmatmul.bf16.gmra.mxu2 %v566_v11 }
  0x41   :  { %202 = vmatmul.bf16.gmra.mxu0 %v563_v16  ;;  %222 = vmatmul.bf16.gmra.mxu2 %v567_v17  ;;  %v602_v17 = vld [vmem:[%s763_s4] ss:$0 sm:$0xff] }
  0x51   :  { %207 = vmatmul.bf16.gmra.mxu0 %v564_v18  ;;  %227 = vmatmul.bf16.gmra.mxu2 %v568_v19 }
  0x9e   :  { %v193_v24 = vpop.f32.mrf.mxu0 }
  0x9f   :  { %v288_v26 = vadd.f32 %v601_v25, %v193_v24 }
  0xa1   :  { %v304_v29 = vmax.f32 %v288_v26, 0.0 }
  0xa4   :  { %v213_v27 = vpop.f32.mrf.mxu2 }
  0xa5   :  { %v296_v32 = vadd.f32 %v601_v25, %v213_v27 }
  0xa6   :  { %v195_v28 = vpop.f32.mrf.mxu0 }
  0xa7   :  { %v289_v30 = vadd.f32 %v601_v25, %v195_v28  ;;  %v312_v37 = vmax.f32 %v296_v32, 0.0 }
  0xa9   :  { %v305_v31 = vmax.f32 %v289_v30, 0.0 }
  0xab   :  { %v320_v33 = vpack.c.bf16 %v305_v31, %v304_v29 }
  0xac   :  { %v215_v34 = vpop.f32.mrf.mxu2 }
  0xad   :  { %v297_v35 = vadd.f32 %v601_v25, %v215_v34  ;;  %404 = vmatmul.bf16.vlgmr.msra.gmra.mxu1 %v320_v33 }
  0xae   :  { %v198_v36 = vpop.f32.mrf.mxu0 }
  0xaf   :  { %v313_v38 = vmax.f32 %v297_v35, 0.0  ;;  %v290_v40 = vadd.f32 %v601_v25, %v198_v36 }
  0xb1   :  { %v324_v39 = vpack.c.bf16 %v313_v38, %v312_v37  ;;  %v306_v43 = vmax.f32 %v290_v40, 0.0 }
  0xb3   :  { %424 = vmatmul.bf16.vlgmr.msra.gmra.mxu3 %v324_v39 }
  0xb4   :  { %v218_v41 = vpop.f32.mrf.mxu2 }
  0xb5   :  { %v298_v46 = vadd.f32 %v601_v25, %v218_v41 }
  0xb6   :  { %v200_v42 = vpop.f32.mrf.mxu0 }
  0xb7   :  { %v291_v44 = vadd.f32 %v601_v25, %v200_v42  ;;  %v314_v51 = vmax.f32 %v298_v46, 0.0 }
  0xb9   :  { %v307_v45 = vmax.f32 %v291_v44, 0.0 }
  0xbb   :  { %v321_v47 = vpack.c.bf16 %v307_v45, %v306_v43 }
  0xbc   :  { %v220_v48 = vpop.f32.mrf.mxu2 }
  0xbd   :  { %v299_v49 = vadd.f32 %v601_v25, %v220_v48  ;;  %409 = vmatmul.bf16.gmra.mxu1 %v321_v47 }
  0xbe   :  { %v203_v50 = vpop.f32.mrf.mxu0 }
  0xbf   :  { %v315_v52 = vmax.f32 %v299_v49, 0.0  ;;  %v292_v54 = vadd.f32 %v601_v25, %v203_v50 }
  0xc1   :  { %v325_v53 = vpack.c.bf16 %v315_v52, %v314_v51  ;;  %v308_v57 = vmax.f32 %v292_v54, 0.0 }
  0xc3   :  { %429 = vmatmul.bf16.gmra.mxu3 %v325_v53 }
  0xc4   :  { %v223_v55 = vpop.f32.mrf.mxu2 }
  0xc5   :  { %v300_v60 = vadd.f32 %v601_v25, %v223_v55 }
  0xc6   :  { %v205_v56 = vpop.f32.mrf.mxu0 }
  0xc7   :  { %v293_v58 = vadd.f32 %v601_v25, %v205_v56  ;;  %v316_v1 = vmax.f32 %v300_v60, 0.0 }
  0xc9   :  { %v309_v59 = vmax.f32 %v293_v58, 0.0 }
  0xcb   :  { %v322_v61 = vpack.c.bf16 %v309_v59, %v308_v57 }
  0xcc   :  { %v225_v62 = vpop.f32.mrf.mxu2 }
  0xcd   :  { %v301_v63 = vadd.f32 %v601_v25, %v225_v62  ;;  %414 = vmatmul.bf16.gmra.mxu1 %v322_v61 }
  0xce   :  { %v208_v0 = vpop.f32.mrf.mxu0 }
  0xcf   :  { %v317_v2 = vmax.f32 %v301_v63, 0.0  ;;  %v294_v4 = vadd.f32 %v601_v25, %v208_v0 }
  0xd1   :  { %v326_v3 = vpack.c.bf16 %v317_v2, %v316_v1  ;;  %v310_v7 = vmax.f32 %v294_v4, 0.0 }
  0xd3   :  { %434 = vmatmul.bf16.gmra.mxu3 %v326_v3 }
  0xd4   :  { %v228_v5 = vpop.f32.mrf.mxu2 }
  0xd5   :  { %v302_v10 = vadd.f32 %v601_v25, %v228_v5 }
  0xd6   :  { %v210_v6 = vpop.f32.mrf.mxu0 }
  0xd7   :  { %v295_v8 = vadd.f32 %v601_v25, %v210_v6  ;;  %v318_v14 = vmax.f32 %v302_v10, 0.0 }
  0xd9   :  { %v311_v9 = vmax.f32 %v295_v8, 0.0 }
  0xdb   :  { %v323_v11 = vpack.c.bf16 %v311_v9, %v310_v7 }
  0xdc   :  { %v230_v12 = vpop.f32.mrf.mxu2 }
  0xdd   :  { %v303_v13 = vadd.f32 %v601_v25, %v230_v12  ;;  %419 = vmatmul.bf16.gmra.mxu1 %v323_v11 }
  0xdf   :  { %v319_v15 = vmax.f32 %v303_v13, 0.0 }
  0xe1   :  { %v327_v16 = vpack.c.bf16 %v319_v15, %v318_v14 }
  0xe3   :  { %439 = vmatmul.bf16.gmra.mxu3 %v327_v16 }
 0x12a   :  { %v405_v18 = vpop.f32.mrf.mxu1 }
 0x12b   :  { %v406_v19 = vadd.f32 %v602_v17, %v405_v18 }
 0x12d   :  { %445 = vst [vmem:[%s764_s5] sm:$0xff] %v406_v19 }
 0x132   :  { %v407_v20 = vpop.f32.mrf.mxu1 }
 0x133   :  { %v408_v21 = vadd.f32 %v602_v17, %v407_v20 }
 0x135   :  { %446 = vst [vmem:[%s764_s5 + $0x8] sm:$0xff] %v408_v21 }
 0x136   :  { %v425_v22 = vpop.f32.mrf.mxu3 }
 0x137   :  { %v426_v23 = vadd.f32 %v602_v17, %v425_v22 }
 0x139   :  { %453 = vst [vmem:[%s764_s5 + $0x40] sm:$0xff] %v426_v23 }
 0x13a   :  { %v410_v24 = vpop.f32.mrf.mxu1 }
 0x13b   :  { %v411_v25 = vadd.f32 %v602_v17, %v410_v24 }
 0x13d   :  { %447 = vst [vmem:[%s764_s5 + $0x10] sm:$0xff] %v411_v25 }
 0x13e   :  { %v427_v26 = vpop.f32.mrf.mxu3 }
 0x13f   :  { %v428_v27 = vadd.f32 %v602_v17, %v427_v26 }
 0x141   :  { %454 = vst [vmem:[%s764_s5 + $0x48] sm:$0xff] %v428_v27 }
 0x142   :  { %v412_v28 = vpop.f32.mrf.mxu1 }
 0x143   :  { %v413_v29 = vadd.f32 %v602_v17, %v412_v28 }
 0x145   :  { %448 = vst [vmem:[%s764_s5 + $0x18] sm:$0xff] %v413_v29 }
 0x146   :  { %v430_v30 = vpop.f32.mrf.mxu3 }
 0x147   :  { %v431_v31 = vadd.f32 %v602_v17, %v430_v30 }
 0x149   :  { %455 = vst [vmem:[%s764_s5 + $0x50] sm:$0xff] %v431_v31 }
 0x14a   :  { %v415_v32 = vpop.f32.mrf.mxu1 }
 0x14b   :  { %v416_v33 = vadd.f32 %v602_v17, %v415_v32 }
 0x14d   :  { %449 = vst [vmem:[%s764_s5 + $0x20] sm:$0xff] %v416_v33 }
 0x14e   :  { %v432_v34 = vpop.f32.mrf.mxu3 }
 0x14f   :  { %v433_v35 = vadd.f32 %v602_v17, %v432_v34 }
 0x151   :  { %456 = vst [vmem:[%s764_s5 + $0x58] sm:$0xff] %v433_v35 }
 0x152   :  { %v417_v36 = vpop.f32.mrf.mxu1 }
 0x153   :  { %v418_v37 = vadd.f32 %v602_v17, %v417_v36 }
 0x155   :  { %450 = vst [vmem:[%s764_s5 + $0x28] sm:$0xff] %v418_v37 }
 0x156   :  { %v435_v38 = vpop.f32.mrf.mxu3 }
 0x157   :  { %v436_v39 = vadd.f32 %v602_v17, %v435_v38 }
 0x159   :  { %457 = vst [vmem:[%s764_s5 + $0x60] sm:$0xff] %v436_v39 }
 0x15a   :  { %v420_v40 = vpop.f32.mrf.mxu1 }
 0x15b   :  { %v421_v41 = vadd.f32 %v602_v17, %v420_v40 }
 0x15d   :  { %451 = vst [vmem:[%s764_s5 + $0x30] sm:$0xff] %v421_v41 }
 0x15e   :  { %v437_v42 = vpop.f32.mrf.mxu3 }
 0x15f   :  { %v438_v43 = vadd.f32 %v602_v17, %v437_v42 }
 0x161   :  { %458 = vst [vmem:[%s764_s5 + $0x68] sm:$0xff] %v438_v43 }
 0x162   :  { %v422_v44 = vpop.f32.mrf.mxu1 }
 0x163   :  { %v423_v45 = vadd.f32 %v602_v17, %v422_v44 }
 0x165   :  { %452 = vst [vmem:[%s764_s5 + $0x38] sm:$0xff] %v423_v45 }
 0x166   :  { %v440_v46 = vpop.f32.mrf.mxu3 }
 0x167   :  { %v441_v47 = vadd.f32 %v602_v17, %v440_v46 }
 0x169   :  { %459 = vst [vmem:[%s764_s5 + $0x70] sm:$0xff] %v441_v47 }
 0x16e   :  { %v442_v48 = vpop.f32.mrf.mxu3 }
 0x16f   :  { %v443_v49 = vadd.f32 %v602_v17, %v442_v48 }
 0x171   :  { %460 = vst [vmem:[%s764_s5 + $0x78] sm:$0xff] %v443_v49 }

</bundles_post_ra>
